<compile_context>
chip_gen: v7x
topology: tpu7x:2x2x1
jax: 0.10.0
libtpu: 0.0.40
codegen_flags: <defaults>
</compile_context>

<pallas_src>
import functools
import math

import jax
import jax.numpy as jnp
from jax.experimental import pallas as pl
from jax.experimental.pallas import tpu as pltpu


# ----------------------------------------------------------------------------
# Fused kernel: one batch element per grid step, all three stages inside.
# ----------------------------------------------------------------------------
def _iota_f32(shape, dim):
    return jax.lax.broadcasted_iota(jnp.int32, shape, dim).astype(jnp.float32)


def _floor_div(x, k):
    # Exact for small integer-valued float x and power-of-two k.
    return jnp.floor(x * (1.0 / float(k)))


def fused_alignment_kernel(obj_ref, pe_ref, lang_ref,
                           wqkv_ref, bqkv_ref, wo_ref, bo_ref,
                           gamma_ref, beta_ref, out_ref,
                           *, n_obj, t, d, num_heads, num_groups, eps):
    f32 = jnp.float32
    R = n_obj * t                       # rows per batch element (obj-major)
    H = num_heads
    hd = d // num_heads
    cg = d // num_groups
    scale = 1.0 / math.sqrt(hd)

    # ---- masks / averaging maps, built once per grid step from iota --------
    # row order is r = oi * t + ti  (matches reshape(b, n_obj*t, d))
    r_col = _iota_f32((R, 1), 0)
    oi_r = _floor_div(r_col, t)
    ti_r = r_col - t * oi_r
    c_row = _iota_f32((1, R), 1)
    oi_c = _floor_div(c_row, t)
    ti_c = c_row - t * oi_c

    # head-stacked query rows: hr = h * R + i
    hr = _iota_f32((H * R, 1), 0)
    head_r = _floor_div(hr, R)
    i_r = hr - R * head_r
    oi_ir = _floor_div(i_r, t)
    ti_ir = i_r - t * oi_ir

    ch = _iota_f32((1, d), 1)
    head_c = _floor_div(ch, hd)
    grp_c = _floor_div(ch, cg)
    grp_r = _floor_div(_iota_f32((d, 1), 0), cg)

    # head-selection mask for stacked queries and context un-stacking (H*R, d)
    qmask = (head_r == head_c).astype(f32)

    # block-attention validity masks (same time step / same object), (H*R, R)
    valid_obj = ti_ir == ti_c
    valid_motion = oi_ir == oi_c

    # GroupNorm averaging matrices: mean = A @ x @ Bg
    Bg = (grp_r == grp_c).astype(f32) * (1.0 / cg)           # channel-group avg
    A_obj = (ti_r == ti_c).astype(f32) * (1.0 / n_obj)       # stage 1 rows
    A_motion = (oi_r == oi_c).astype(f32) * (1.0 / t)        # stage 2 rows
    A_all = jnp.full((R, R), 1.0 / R, dtype=f32)             # stage 3 rows

    def attention(qp, kp, vp, valid):
        # qp: (R, d); kp, vp: (Rk, d). Heads stacked along sublanes.
        q_stack = jnp.broadcast_to((qp * scale)[None], (H, R, d)).reshape(H * R, d)
        q_stack = q_stack * qmask
        s = jax.lax.dot_general(q_stack, kp, (((1,), (1,)), ((), ())),
                                preferred_element_type=f32)          # (H*R, Rk)
        if valid is not None:
            s = jnp.where(valid, s, -1e30)
        s = s - jnp.max(s, axis=-1, keepdims=True)
        p = jnp.exp(s)
        p = p / jnp.sum(p, axis=-1, keepdims=True)
        ctx_stack = jnp.dot(p, vp, preferred_element_type=f32)       # (H*R, d)
        # fold heads back: ctx[i, c] = ctx_stack[(c // hd) * R + i, c]
        ctx = jnp.sum(ctx_stack.reshape(H, R, d) * qmask.reshape(H, R, d), axis=0)
        return ctx

    def group_norm(x, A, gamma, beta):
        mean = jnp.dot(jnp.dot(A, x, preferred_element_type=f32), Bg,
                       preferred_element_type=f32)
        xc = x - mean
        var = jnp.dot(jnp.dot(A, xc * xc, preferred_element_type=f32), Bg,
                      preferred_element_type=f32)
        return xc * jax.lax.rsqrt(var + eps) * gamma + beta

    x = obj_ref[0].reshape(R, d).astype(f32)
    pe = pe_ref[0].reshape(R, d).astype(f32)
    lang = lang_ref[0].astype(f32)

    # ---------------- stage 1: inter-object attention + GN ------------------
    w, bqkv = wqkv_ref[0], bqkv_ref[0]
    proj = jnp.dot(x, w, preferred_element_type=f32) + bqkv          # (R, 3d)
    ctx = attention(proj[:, :d], proj[:, d:2 * d], proj[:, 2 * d:], valid_obj)
    x = x + jnp.dot(ctx, wo_ref[0], preferred_element_type=f32) + bo_ref[0]
    x = group_norm(x, A_obj, gamma_ref[0], beta_ref[0])

    # ---------------- stage 2: temporal (motion) attention + GN -------------
    w, bqkv = wqkv_ref[1], bqkv_ref[1]
    x_pe = x + pe
    proj_qk = jnp.dot(x_pe, w[:, :2 * d], preferred_element_type=f32) + bqkv[:, :2 * d]
    vp = jnp.dot(x, w[:, 2 * d:], preferred_element_type=f32) + bqkv[:, 2 * d:]
    ctx = attention(proj_qk[:, :d], proj_qk[:, d:], vp, valid_motion)
    x = x + jnp.dot(ctx, wo_ref[1], preferred_element_type=f32) + bo_ref[1]
    x = group_norm(x, A_motion, gamma_ref[1], beta_ref[1])

    # ---------------- stage 3: object -> language cross attention + GN ------
    w, bqkv = wqkv_ref[2], bqkv_ref[2]
    qp = jnp.dot(x, w[:, :d], preferred_element_type=f32) + bqkv[:, :d]
    proj_kv = jnp.dot(lang, w[:, d:], preferred_element_type=f32) + bqkv[:, d:]
    ctx = attention(qp, proj_kv[:, :d], proj_kv[:, d:], None)
    x = x + jnp.dot(ctx, wo_ref[2], preferred_element_type=f32) + bo_ref[2]
    x = group_norm(x, A_all, gamma_ref[2], beta_ref[2])

    out_ref[0] = x.reshape(n_obj, t, d).astype(out_ref.dtype)


# ----------------------------------------------------------------------------
# Forward pass: one pallas_call for the whole layer.
# ----------------------------------------------------------------------------
def forward(object_tokens, object_tokens_pe, lang_tokens, params,
            num_groups, num_heads=8, eps=1e-5):
    b, n_obj, t, d = object_tokens.shape
    n_lang = lang_tokens.shape[1]

    # Pack per-stage weights: qkv fused along the lane axis, stages stacked.
    wqkv = jnp.stack([jnp.concatenate([p['wq'], p['wk'], p['wv']], axis=1)
                      for p in params['attn']])                      # (3, d, 3d)
    bqkv = jnp.stack([jnp.concatenate([p['bq'], p['bk'], p['bv']], axis=1)
                      for p in params['attn']])                      # (3, 1, 3d)
    wo = jnp.stack([p['wo'] for p in params['attn']])                # (3, d, d)
    bo = jnp.stack([p['bo'] for p in params['attn']])                # (3, 1, d)
    gamma = jnp.stack([p['gamma'] for p in params['gn']])            # (3, 1, d)
    beta = jnp.stack([p['beta'] for p in params['gn']])              # (3, 1, d)

    kernel = functools.partial(
        fused_alignment_kernel, n_obj=n_obj, t=t, d=d,
        num_heads=num_heads, num_groups=num_groups, eps=eps)

    def full_spec(shape):
        return pl.BlockSpec(shape, lambda i: (0,) * len(shape))

    out = pl.pallas_call(
        kernel,
        out_shape=jax.ShapeDtypeStruct((b, n_obj, t, d), object_tokens.dtype),
        grid=(b,),
        in_specs=[
            pl.BlockSpec((1, n_obj, t, d), lambda i: (i, 0, 0, 0)),
            pl.BlockSpec((1, n_obj, t, d), lambda i: (i, 0, 0, 0)),
            pl.BlockSpec((1, n_lang, d), lambda i: (i, 0, 0)),
            full_spec((3, d, 3 * d)),
            full_spec((3, 1, 3 * d)),
            full_spec((3, d, d)),
            full_spec((3, 1, d)),
            full_spec((3, 1, d)),
            full_spec((3, 1, d)),
        ],
        out_specs=pl.BlockSpec((1, n_obj, t, d), lambda i: (i, 0, 0, 0)),
        # "parallel" batch axis keeps both v7x TensorCores busy; VMEM use is
        # far below the default scoped limit on every generation at this size.
        compiler_params=pltpu.CompilerParams(dimension_semantics=("parallel",)),
    )(object_tokens, object_tokens_pe, lang_tokens, wqkv, bqkv, wo, bo, gamma, beta)
    return out, lang_tokens


# ----------------------------------------------------------------------------
# Pure-JAX reference (for correctness check)
# ----------------------------------------------------------------------------
def mha_ref(q, k, v, p, num_heads):
    B, Sq, d = q.shape
    hd = d // num_heads
    qp = q @ p['wq'] + p['bq']
    kp = k @ p['wk'] + p['bk']
    vp = v @ p['wv'] + p['bv']
    qh = qp.reshape(B, Sq, num_heads, hd).transpose(0, 2, 1, 3)
    kh = kp.reshape(B, -1, num_heads, hd).transpose(0, 2, 1, 3)
    vh = vp.reshape(B, -1, num_heads, hd).transpose(0, 2, 1, 3)
    s = jnp.einsum('bhqd,bhkd->bhqk', qh, kh) / jnp.sqrt(hd)
    a = jax.nn.softmax(s, axis=-1)
    ctx = jnp.einsum('bhqk,bhkd->bhqd', a, vh).transpose(0, 2, 1, 3).reshape(B, Sq, d)
    return ctx @ p['wo'] + p['bo']


def gn_ref(x, p, num_groups, eps=1e-5):
    B, S, d = x.shape
    cg = d // num_groups
    xr = x.reshape(B, S, num_groups, cg)
    mean = xr.mean(axis=(1, 3), keepdims=True)
    var = xr.var(axis=(1, 3), keepdims=True)
    y = ((xr - mean) / jnp.sqrt(var + eps)).reshape(B, S, d)
    return y * p['gamma'] + p['beta']


def forward_ref(object_tokens, object_tokens_pe, lang_tokens, params, num_groups,
                num_heads=8):
    b, n_obj, t, d = object_tokens.shape
    x = object_tokens.transpose(0, 2, 1, 3).reshape(b * t, n_obj, d)
    x = x + mha_ref(x, x, x, params['attn'][0], num_heads)
    x = gn_ref(x, params['gn'][0], num_groups)
    x = x.reshape(b, t, n_obj, d).transpose(0, 2, 1, 3)
    x_pe = x + object_tokens_pe
    x = x.reshape(b * n_obj, t, d)
    x_pe = x_pe.reshape(b * n_obj, t, d)
    x = x + mha_ref(x_pe, x_pe, x, params['attn'][1], num_heads)
    x = gn_ref(x, params['gn'][1], num_groups)
    x = x.reshape(b, n_obj * t, d)
    x = x + mha_ref(x, lang_tokens, lang_tokens, params['attn'][2], num_heads)
    x = gn_ref(x, params['gn'][2], num_groups)
    return x.reshape(b, n_obj, t, d), lang_tokens


# ----------------------------------------------------------------------------
# Deterministic parameter init (module __init__ shapes; synthetic weights)
# ----------------------------------------------------------------------------
def init_attn_params(key, d):
    ks = jax.random.split(key, 8)
    std = 0.3
    return {
        'wq': std * jax.random.normal(ks[0], (d, d), jnp.float32),
        'bq': std * jax.random.normal(ks[1], (1, d), jnp.float32),
        'wk': std * jax.random.normal(ks[2], (d, d), jnp.float32),
        'bk': std * jax.random.normal(ks[3], (1, d), jnp.float32),
        'wv': std * jax.random.normal(ks[4], (d, d), jnp.float32),
        'bv': std * jax.random.normal(ks[5], (1, d), jnp.float32),
        'wo': std * jax.random.normal(ks[6], (d, d), jnp.float32),
        'bo': std * jax.random.normal(ks[7], (1, d), jnp.float32),
    }


def init_params(key, d):
    ka = jax.random.split(key, 6)
    attn = [init_attn_params(ka[i], d) for i in range(3)]
    gn = []
    for i in range(3):
        kg, kb = jax.random.split(ka[3 + i])
        gn.append({
            'gamma': 1.0 + 0.1 * jax.random.normal(kg, (1, d), jnp.float32),
            'beta': 0.1 * jax.random.normal(kb, (1, d), jnp.float32),
        })
    return {'attn': attn, 'gn': gn}


if __name__ == "__main__":
    # configs: {'lang_token_dim': 32, 'n_groups_module': 4}
    b, n_obj, t, d = 2, 4, 8, 32
    n_lang = 8
    num_groups = 4

    key = jax.random.PRNGKey(0)
    k1, k2, k3, kp = jax.random.split(key, 4)
    object_tokens = jax.random.normal(k1, (b, n_obj, t, d), jnp.float32)
    object_tokens_pe = jax.random.normal(k2, (b, n_obj, t, d), jnp.float32)
    lang_tokens = jax.random.normal(k3, (b, n_lang, d), jnp.float32)
    params = init_params(kp, d)

    forward_jit = jax.jit(forward, static_argnames=("num_groups", "num_heads"))
    out, lang_out = forward_jit(object_tokens, object_tokens_pe, lang_tokens,
                                params, num_groups=num_groups)
    jax.block_until_ready(out)

    ref_out, _ = forward_ref(object_tokens, object_tokens_pe, lang_tokens,
                             params, num_groups)
    assert out.shape == (b, n_obj, t, d)
    assert jnp.allclose(out, ref_out, atol=1e-3, rtol=1e-3), "mismatch vs reference"
    assert jnp.allclose(lang_out, lang_tokens)

    print("KERNEL_OK")
</pallas_src>

<mosaic_0001>
module attributes {stable_mosaic.version = 11 : i64} {
  func.func @fused_alignment_kernel(%arg0: i32, %arg1: memref<1x4x8x32xf32, #tpu.memory_space<vmem>>, %arg2: memref<1x4x8x32xf32, #tpu.memory_space<vmem>>, %arg3: memref<1x8x32xf32, #tpu.memory_space<vmem>>, %arg4: memref<3x32x96xf32, #tpu.memory_space<vmem>>, %arg5: memref<3x1x96xf32, #tpu.memory_space<vmem>>, %arg6: memref<3x32x32xf32, #tpu.memory_space<vmem>>, %arg7: memref<3x1x32xf32, #tpu.memory_space<vmem>>, %arg8: memref<3x1x32xf32, #tpu.memory_space<vmem>>, %arg9: memref<3x1x32xf32, #tpu.memory_space<vmem>>, %arg10: memref<1x4x8x32xf32, #tpu.memory_space<vmem>>) attributes {dimension_semantics = [#tpu.dimension_semantics<parallel>], iteration_bounds = array<i64: 2>, scalar_prefetch = 0 : i64, scratch_operands = 0 : i64, tpu.core_type = #tpu.core_type<tc>, window_params = [{transform_indices = @transform_0, window_bounds = array<i64: 1, 4, 8, 32>}, {transform_indices = @transform_1, window_bounds = array<i64: 1, 4, 8, 32>}, {transform_indices = @transform_2, window_bounds = array<i64: 1, 8, 32>}, {pipeline_mode = #tpu.pipeline_mode<synchronous>, transform_indices = @transform_3, window_bounds = array<i64: 3, 32, 96>}, {pipeline_mode = #tpu.pipeline_mode<synchronous>, transform_indices = @transform_4, window_bounds = array<i64: 3, 1, 96>}, {pipeline_mode = #tpu.pipeline_mode<synchronous>, transform_indices = @transform_5, window_bounds = array<i64: 3, 32, 32>}, {pipeline_mode = #tpu.pipeline_mode<synchronous>, transform_indices = @transform_6, window_bounds = array<i64: 3, 1, 32>}, {pipeline_mode = #tpu.pipeline_mode<synchronous>, transform_indices = @transform_7, window_bounds = array<i64: 3, 1, 32>}, {pipeline_mode = #tpu.pipeline_mode<synchronous>, transform_indices = @transform_8, window_bounds = array<i64: 3, 1, 32>}, {transform_indices = @transform_9, window_bounds = array<i64: 1, 4, 8, 32>}]} {
    %0 = tpu.iota {dimensions = array<i32: 0>} : vector<32x1xi32>
    %1 = arith.sitofp %0 : vector<32x1xi32> to vector<32x1xf32>
    %cst = arith.constant 1.250000e-01 : f32
    %2 = vector.broadcast %cst : f32 to vector<32x1xf32>
    %3 = arith.mulf %1, %2 : vector<32x1xf32>
    %4 = math.floor %3 : vector<32x1xf32>
    %cst_0 = arith.constant 8.000000e+00 : f32
    %5 = vector.broadcast %cst_0 : f32 to vector<32x1xf32>
    %6 = arith.mulf %5, %4 : vector<32x1xf32>
    %7 = arith.subf %1, %6 : vector<32x1xf32>
    %8 = tpu.iota {dimensions = array<i32: 1>} : vector<1x32xi32>
    %9 = arith.sitofp %8 : vector<1x32xi32> to vector<1x32xf32>
    %cst_1 = arith.constant 1.250000e-01 : f32
    %10 = vector.broadcast %cst_1 : f32 to vector<1x32xf32>
    %11 = arith.mulf %9, %10 : vector<1x32xf32>
    %12 = math.floor %11 : vector<1x32xf32>
    %cst_2 = arith.constant 8.000000e+00 : f32
    %13 = vector.broadcast %cst_2 : f32 to vector<1x32xf32>
    %14 = arith.mulf %13, %12 : vector<1x32xf32>
    %15 = arith.subf %9, %14 : vector<1x32xf32>
    %16 = tpu.iota {dimensions = array<i32: 0>} : vector<256x1xi32>
    %17 = arith.sitofp %16 : vector<256x1xi32> to vector<256x1xf32>
    %cst_3 = arith.constant 3.125000e-02 : f32
    %18 = vector.broadcast %cst_3 : f32 to vector<256x1xf32>
    %19 = arith.mulf %17, %18 : vector<256x1xf32>
    %20 = math.floor %19 : vector<256x1xf32>
    %cst_4 = arith.constant 3.200000e+01 : f32
    %21 = vector.broadcast %cst_4 : f32 to vector<256x1xf32>
    %22 = arith.mulf %21, %20 : vector<256x1xf32>
    %23 = arith.subf %17, %22 : vector<256x1xf32>
    %cst_5 = arith.constant 1.250000e-01 : f32
    %24 = vector.broadcast %cst_5 : f32 to vector<256x1xf32>
    %25 = arith.mulf %23, %24 : vector<256x1xf32>
    %26 = math.floor %25 : vector<256x1xf32>
    %cst_6 = arith.constant 8.000000e+00 : f32
    %27 = vector.broadcast %cst_6 : f32 to vector<256x1xf32>
    %28 = arith.mulf %27, %26 : vector<256x1xf32>
    %29 = arith.subf %23, %28 : vector<256x1xf32>
    %30 = tpu.iota {dimensions = array<i32: 1>} : vector<1x32xi32>
    %31 = arith.sitofp %30 : vector<1x32xi32> to vector<1x32xf32>
    %cst_7 = arith.constant 2.500000e-01 : f32
    %32 = vector.broadcast %cst_7 : f32 to vector<1x32xf32>
    %33 = arith.mulf %31, %32 : vector<1x32xf32>
    %34 = math.floor %33 : vector<1x32xf32>
    %cst_8 = arith.constant 1.250000e-01 : f32
    %35 = vector.broadcast %cst_8 : f32 to vector<1x32xf32>
    %36 = arith.mulf %31, %35 : vector<1x32xf32>
    %37 = math.floor %36 : vector<1x32xf32>
    %38 = tpu.iota {dimensions = array<i32: 0>} : vector<32x1xi32>
    %39 = arith.sitofp %38 : vector<32x1xi32> to vector<32x1xf32>
    %cst_9 = arith.constant 1.250000e-01 : f32
    %40 = vector.broadcast %cst_9 : f32 to vector<32x1xf32>
    %41 = arith.mulf %39, %40 : vector<32x1xf32>
    %42 = math.floor %41 : vector<32x1xf32>
    %43 = vector.broadcast %20 : vector<256x1xf32> to vector<256x32xf32>
    %44 = vector.broadcast %34 : vector<1x32xf32> to vector<256x32xf32>
    %45 = arith.cmpf oeq, %43, %44 : vector<256x32xf32>
    %46 = arith.extui %45 : vector<256x32xi1> to vector<256x32xi32>
    %47 = arith.sitofp %46 : vector<256x32xi32> to vector<256x32xf32>
    %48 = vector.broadcast %29 : vector<256x1xf32> to vector<256x32xf32>
    %49 = vector.broadcast %15 : vector<1x32xf32> to vector<256x32xf32>
    %50 = arith.cmpf oeq, %48, %49 : vector<256x32xf32>
    %51 = vector.broadcast %26 : vector<256x1xf32> to vector<256x32xf32>
    %52 = vector.broadcast %12 : vector<1x32xf32> to vector<256x32xf32>
    %53 = arith.cmpf oeq, %51, %52 : vector<256x32xf32>
    %54 = vector.broadcast %42 : vector<32x1xf32> to vector<32x32xf32>
    %55 = vector.broadcast %37 : vector<1x32xf32> to vector<32x32xf32>
    %56 = arith.cmpf oeq, %54, %55 : vector<32x32xf32>
    %57 = arith.extui %56 : vector<32x32xi1> to vector<32x32xi32>
    %58 = arith.sitofp %57 : vector<32x32xi32> to vector<32x32xf32>
    %cst_10 = arith.constant 1.250000e-01 : f32
    %59 = vector.broadcast %cst_10 : f32 to vector<32x32xf32>
    %60 = arith.mulf %58, %59 : vector<32x32xf32>
    %61 = vector.broadcast %7 : vector<32x1xf32> to vector<32x32xf32>
    %62 = vector.broadcast %15 : vector<1x32xf32> to vector<32x32xf32>
    %63 = arith.cmpf oeq, %61, %62 : vector<32x32xf32>
    %64 = arith.extui %63 : vector<32x32xi1> to vector<32x32xi32>
    %65 = arith.sitofp %64 : vector<32x32xi32> to vector<32x32xf32>
    %cst_11 = arith.constant 2.500000e-01 : f32
    %66 = vector.broadcast %cst_11 : f32 to vector<32x32xf32>
    %67 = arith.mulf %65, %66 : vector<32x32xf32>
    %68 = vector.broadcast %4 : vector<32x1xf32> to vector<32x32xf32>
    %69 = vector.broadcast %12 : vector<1x32xf32> to vector<32x32xf32>
    %70 = arith.cmpf oeq, %68, %69 : vector<32x32xf32>
    %71 = arith.extui %70 : vector<32x32xi1> to vector<32x32xi32>
    %72 = arith.sitofp %71 : vector<32x32xi32> to vector<32x32xf32>
    %cst_12 = arith.constant 1.250000e-01 : f32
    %73 = vector.broadcast %cst_12 : f32 to vector<32x32xf32>
    %74 = arith.mulf %72, %73 : vector<32x32xf32>
    %cst_13 = arith.constant 3.125000e-02 : f32
    %75 = vector.broadcast %cst_13 : f32 to vector<32x32xf32>
    %c0 = arith.constant 0 : index
    %c0_14 = arith.constant 0 : index
    %c0_15 = arith.constant 0 : index
    %c0_16 = arith.constant 0 : index
    %76 = vector.load %arg1[%c0, %c0_14, %c0_15, %c0_16] : memref<1x4x8x32xf32, #tpu.memory_space<vmem>>, vector<1x4x8x32xf32>
    %77 = vector.shape_cast %76 : vector<1x4x8x32xf32> to vector<4x8x32xf32>
    %78 = vector.shape_cast %77 : vector<4x8x32xf32> to vector<32x32xf32>
    %c0_17 = arith.constant 0 : index
    %c0_18 = arith.constant 0 : index
    %c0_19 = arith.constant 0 : index
    %c0_20 = arith.constant 0 : index
    %79 = vector.load %arg2[%c0_17, %c0_18, %c0_19, %c0_20] : memref<1x4x8x32xf32, #tpu.memory_space<vmem>>, vector<1x4x8x32xf32>
    %80 = vector.shape_cast %79 : vector<1x4x8x32xf32> to vector<4x8x32xf32>
    %81 = vector.shape_cast %80 : vector<4x8x32xf32> to vector<32x32xf32>
    %c0_21 = arith.constant 0 : index
    %c0_22 = arith.constant 0 : index
    %c0_23 = arith.constant 0 : index
    %82 = vector.load %arg3[%c0_21, %c0_22, %c0_23] : memref<1x8x32xf32, #tpu.memory_space<vmem>>, vector<1x8x32xf32>
    %83 = vector.shape_cast %82 : vector<1x8x32xf32> to vector<8x32xf32>
    %c0_24 = arith.constant 0 : index
    %c0_25 = arith.constant 0 : index
    %c0_26 = arith.constant 0 : index
    %84 = vector.load %arg4[%c0_24, %c0_25, %c0_26] : memref<3x32x96xf32, #tpu.memory_space<vmem>>, vector<1x32x96xf32>
    %85 = vector.shape_cast %84 : vector<1x32x96xf32> to vector<32x96xf32>
    %c0_27 = arith.constant 0 : index
    %c0_28 = arith.constant 0 : index
    %c0_29 = arith.constant 0 : index
    %86 = vector.load %arg5[%c0_27, %c0_28, %c0_29] : memref<3x1x96xf32, #tpu.memory_space<vmem>>, vector<1x1x96xf32>
    %87 = vector.shape_cast %86 : vector<1x1x96xf32> to vector<1x96xf32>
    %cst_30 = arith.constant dense<0.000000e+00> : vector<32x96xf32>
    %88 = tpu.matmul %78, %85, %cst_30 {dimension_numbers = #tpu.dot_dimension_numbers<[1], [0], [0], [1], [0, 0, 1, 1], [], []>} : vector<32x32xf32>, vector<32x96xf32>, vector<32x96xf32> -> vector<32x96xf32>
    %89 = vector.broadcast %87 : vector<1x96xf32> to vector<32x96xf32>
    %90 = arith.addf %88, %89 : vector<32x96xf32>
    %91 = vector.extract_strided_slice %90 {offsets = [0, 0], sizes = [32, 32], strides = [1, 1]} : vector<32x96xf32> to vector<32x32xf32>
    %92 = vector.extract_strided_slice %90 {offsets = [0, 32], sizes = [32, 32], strides = [1, 1]} : vector<32x96xf32> to vector<32x32xf32>
    %93 = vector.extract_strided_slice %90 {offsets = [0, 64], sizes = [32, 32], strides = [1, 1]} : vector<32x96xf32> to vector<32x32xf32>
    %cst_31 = arith.constant 5.000000e-01 : f32
    %94 = vector.broadcast %cst_31 : f32 to vector<32x32xf32>
    %95 = arith.mulf %91, %94 : vector<32x32xf32>
    %96 = vector.shape_cast %95 : vector<32x32xf32> to vector<1x32x32xf32>
    %97 = vector.shape_cast %96 : vector<1x32x32xf32> to vector<1x32x32xf32>
    %98 = vector.broadcast %97 : vector<1x32x32xf32> to vector<8x32x32xf32>
    %99 = vector.shape_cast %98 : vector<8x32x32xf32> to vector<256x32xf32>
    %100 = arith.mulf %99, %47 : vector<256x32xf32>
    %cst_32 = arith.constant dense<0.000000e+00> : vector<256x32xf32>
    %101 = tpu.matmul %100, %92, %cst_32 {dimension_numbers = #tpu.dot_dimension_numbers<[1], [1], [0], [0], [0, 0, 1, 0], [], []>} : vector<256x32xf32>, vector<32x32xf32>, vector<256x32xf32> -> vector<256x32xf32>
    %cst_33 = arith.constant -1.000000e+30 : f32
    %102 = vector.broadcast %cst_33 : f32 to vector<256x32xf32>
    %103 = arith.select %50, %101, %102 : vector<256x32xi1>, vector<256x32xf32>
    %cst_34 = arith.constant dense<0xFF800000> : vector<256xf32>
    %104 = vector.multi_reduction <maximumf>, %103, %cst_34 [1] : vector<256x32xf32> to vector<256xf32>
    %105 = vector.shape_cast %104 : vector<256xf32> to vector<256x1xf32>
    %106 = vector.broadcast %105 : vector<256x1xf32> to vector<256x32xf32>
    %107 = arith.subf %103, %106 : vector<256x32xf32>
    %108 = math.exp %107 : vector<256x32xf32>
    %cst_35 = arith.constant dense<0.000000e+00> : vector<256xf32>
    %109 = vector.multi_reduction <add>, %108, %cst_35 [1] : vector<256x32xf32> to vector<256xf32>
    %110 = vector.shape_cast %109 : vector<256xf32> to vector<256x1xf32>
    %111 = vector.broadcast %110 : vector<256x1xf32> to vector<256x32xf32>
    %112 = arith.divf %108, %111 : vector<256x32xf32>
    %cst_36 = arith.constant dense<0.000000e+00> : vector<256x32xf32>
    %113 = tpu.matmul %112, %93, %cst_36 {dimension_numbers = #tpu.dot_dimension_numbers<[1], [0], [0], [1], [0, 0, 1, 1], [], []>} : vector<256x32xf32>, vector<32x32xf32>, vector<256x32xf32> -> vector<256x32xf32>
    %114 = vector.shape_cast %113 : vector<256x32xf32> to vector<8x32x32xf32>
    %115 = vector.shape_cast %47 : vector<256x32xf32> to vector<8x32x32xf32>
    %116 = arith.mulf %114, %115 : vector<8x32x32xf32>
    %cst_37 = arith.constant dense<0.000000e+00> : vector<32x32xf32>
    %117 = vector.multi_reduction <add>, %116, %cst_37 [0] : vector<8x32x32xf32> to vector<32x32xf32>
    %c0_38 = arith.constant 0 : index
    %c0_39 = arith.constant 0 : index
    %c0_40 = arith.constant 0 : index
    %118 = vector.load %arg6[%c0_38, %c0_39, %c0_40] : memref<3x32x32xf32, #tpu.memory_space<vmem>>, vector<1x32x32xf32>
    %119 = vector.shape_cast %118 : vector<1x32x32xf32> to vector<32x32xf32>
    %cst_41 = arith.constant dense<0.000000e+00> : vector<32x32xf32>
    %120 = tpu.matmul %117, %119, %cst_41 {dimension_numbers = #tpu.dot_dimension_numbers<[1], [0], [0], [1], [0, 0, 1, 1], [], []>} : vector<32x32xf32>, vector<32x32xf32>, vector<32x32xf32> -> vector<32x32xf32>
    %121 = arith.addf %78, %120 : vector<32x32xf32>
    %c0_42 = arith.constant 0 : index
    %c0_43 = arith.constant 0 : index
    %c0_44 = arith.constant 0 : index
    %122 = vector.load %arg7[%c0_42, %c0_43, %c0_44] : memref<3x1x32xf32, #tpu.memory_space<vmem>>, vector<1x1x32xf32>
    %123 = vector.shape_cast %122 : vector<1x1x32xf32> to vector<1x32xf32>
    %124 = vector.broadcast %123 : vector<1x32xf32> to vector<32x32xf32>
    %125 = arith.addf %121, %124 : vector<32x32xf32>
    %c0_45 = arith.constant 0 : index
    %c0_46 = arith.constant 0 : index
    %c0_47 = arith.constant 0 : index
    %126 = vector.load %arg8[%c0_45, %c0_46, %c0_47] : memref<3x1x32xf32, #tpu.memory_space<vmem>>, vector<1x1x32xf32>
    %127 = vector.shape_cast %126 : vector<1x1x32xf32> to vector<1x32xf32>
    %c0_48 = arith.constant 0 : index
    %c0_49 = arith.constant 0 : index
    %c0_50 = arith.constant 0 : index
    %128 = vector.load %arg9[%c0_48, %c0_49, %c0_50] : memref<3x1x32xf32, #tpu.memory_space<vmem>>, vector<1x1x32xf32>
    %129 = vector.shape_cast %128 : vector<1x1x32xf32> to vector<1x32xf32>
    %cst_51 = arith.constant dense<0.000000e+00> : vector<32x32xf32>
    %130 = tpu.matmul %67, %125, %cst_51 {dimension_numbers = #tpu.dot_dimension_numbers<[1], [0], [0], [1], [0, 0, 1, 1], [], []>} : vector<32x32xf32>, vector<32x32xf32>, vector<32x32xf32> -> vector<32x32xf32>
    %cst_52 = arith.constant dense<0.000000e+00> : vector<32x32xf32>
    %131 = tpu.matmul %130, %60, %cst_52 {dimension_numbers = #tpu.dot_dimension_numbers<[1], [0], [0], [1], [0, 0, 1, 1], [], []>} : vector<32x32xf32>, vector<32x32xf32>, vector<32x32xf32> -> vector<32x32xf32>
    %132 = arith.subf %125, %131 : vector<32x32xf32>
    %133 = arith.mulf %132, %132 : vector<32x32xf32>
    %cst_53 = arith.constant dense<0.000000e+00> : vector<32x32xf32>
    %134 = tpu.matmul %67, %133, %cst_53 {dimension_numbers = #tpu.dot_dimension_numbers<[1], [0], [0], [1], [0, 0, 1, 1], [], []>} : vector<32x32xf32>, vector<32x32xf32>, vector<32x32xf32> -> vector<32x32xf32>
    %cst_54 = arith.constant dense<0.000000e+00> : vector<32x32xf32>
    %135 = tpu.matmul %134, %60, %cst_54 {dimension_numbers = #tpu.dot_dimension_numbers<[1], [0], [0], [1], [0, 0, 1, 1], [], []>} : vector<32x32xf32>, vector<32x32xf32>, vector<32x32xf32> -> vector<32x32xf32>
    %cst_55 = arith.constant 9.99999974E-6 : f32
    %136 = vector.broadcast %cst_55 : f32 to vector<32x32xf32>
    %137 = arith.addf %135, %136 : vector<32x32xf32>
    %138 = math.rsqrt %137 : vector<32x32xf32>
    %139 = arith.mulf %132, %138 : vector<32x32xf32>
    %140 = vector.broadcast %127 : vector<1x32xf32> to vector<32x32xf32>
    %141 = arith.mulf %139, %140 : vector<32x32xf32>
    %142 = vector.broadcast %129 : vector<1x32xf32> to vector<32x32xf32>
    %143 = arith.addf %141, %142 : vector<32x32xf32>
    %c1 = arith.constant 1 : index
    %c0_56 = arith.constant 0 : index
    %c0_57 = arith.constant 0 : index
    %144 = vector.load %arg4[%c1, %c0_56, %c0_57] : memref<3x32x96xf32, #tpu.memory_space<vmem>>, vector<1x32x96xf32>
    %145 = vector.shape_cast %144 : vector<1x32x96xf32> to vector<32x96xf32>
    %c1_58 = arith.constant 1 : index
    %c0_59 = arith.constant 0 : index
    %c0_60 = arith.constant 0 : index
    %146 = vector.load %arg5[%c1_58, %c0_59, %c0_60] : memref<3x1x96xf32, #tpu.memory_space<vmem>>, vector<1x1x96xf32>
    %147 = vector.shape_cast %146 : vector<1x1x96xf32> to vector<1x96xf32>
    %148 = arith.addf %143, %81 : vector<32x32xf32>
    %149 = vector.extract_strided_slice %145 {offsets = [0, 0], sizes = [32, 64], strides = [1, 1]} : vector<32x96xf32> to vector<32x64xf32>
    %cst_61 = arith.constant dense<0.000000e+00> : vector<32x64xf32>
    %150 = tpu.matmul %148, %149, %cst_61 {dimension_numbers = #tpu.dot_dimension_numbers<[1], [0], [0], [1], [0, 0, 1, 1], [], []>} : vector<32x32xf32>, vector<32x64xf32>, vector<32x64xf32> -> vector<32x64xf32>
    %151 = vector.extract_strided_slice %147 {offsets = [0, 0], sizes = [1, 64], strides = [1, 1]} : vector<1x96xf32> to vector<1x64xf32>
    %152 = vector.broadcast %151 : vector<1x64xf32> to vector<32x64xf32>
    %153 = arith.addf %150, %152 : vector<32x64xf32>
    %154 = vector.extract_strided_slice %145 {offsets = [0, 64], sizes = [32, 32], strides = [1, 1]} : vector<32x96xf32> to vector<32x32xf32>
    %cst_62 = arith.constant dense<0.000000e+00> : vector<32x32xf32>
    %155 = tpu.matmul %143, %154, %cst_62 {dimension_numbers = #tpu.dot_dimension_numbers<[1], [0], [0], [1], [0, 0, 1, 1], [], []>} : vector<32x32xf32>, vector<32x32xf32>, vector<32x32xf32> -> vector<32x32xf32>
    %156 = vector.extract_strided_slice %147 {offsets = [0, 64], sizes = [1, 32], strides = [1, 1]} : vector<1x96xf32> to vector<1x32xf32>
    %157 = vector.broadcast %156 : vector<1x32xf32> to vector<32x32xf32>
    %158 = arith.addf %155, %157 : vector<32x32xf32>
    %159 = vector.extract_strided_slice %153 {offsets = [0, 0], sizes = [32, 32], strides = [1, 1]} : vector<32x64xf32> to vector<32x32xf32>
    %160 = vector.extract_strided_slice %153 {offsets = [0, 32], sizes = [32, 32], strides = [1, 1]} : vector<32x64xf32> to vector<32x32xf32>
    %cst_63 = arith.constant 5.000000e-01 : f32
    %161 = vector.broadcast %cst_63 : f32 to vector<32x32xf32>
    %162 = arith.mulf %159, %161 : vector<32x32xf32>
    %163 = vector.shape_cast %162 : vector<32x32xf32> to vector<1x32x32xf32>
    %164 = vector.shape_cast %163 : vector<1x32x32xf32> to vector<1x32x32xf32>
    %165 = vector.broadcast %164 : vector<1x32x32xf32> to vector<8x32x32xf32>
    %166 = vector.shape_cast %165 : vector<8x32x32xf32> to vector<256x32xf32>
    %167 = arith.mulf %166, %47 : vector<256x32xf32>
    %cst_64 = arith.constant dense<0.000000e+00> : vector<256x32xf32>
    %168 = tpu.matmul %167, %160, %cst_64 {dimension_numbers = #tpu.dot_dimension_numbers<[1], [1], [0], [0], [0, 0, 1, 0], [], []>} : vector<256x32xf32>, vector<32x32xf32>, vector<256x32xf32> -> vector<256x32xf32>
    %cst_65 = arith.constant -1.000000e+30 : f32
    %169 = vector.broadcast %cst_65 : f32 to vector<256x32xf32>
    %170 = arith.select %53, %168, %169 : vector<256x32xi1>, vector<256x32xf32>
    %cst_66 = arith.constant dense<0xFF800000> : vector<256xf32>
    %171 = vector.multi_reduction <maximumf>, %170, %cst_66 [1] : vector<256x32xf32> to vector<256xf32>
    %172 = vector.shape_cast %171 : vector<256xf32> to vector<256x1xf32>
    %173 = vector.broadcast %172 : vector<256x1xf32> to vector<256x32xf32>
    %174 = arith.subf %170, %173 : vector<256x32xf32>
    %175 = math.exp %174 : vector<256x32xf32>
    %cst_67 = arith.constant dense<0.000000e+00> : vector<256xf32>
    %176 = vector.multi_reduction <add>, %175, %cst_67 [1] : vector<256x32xf32> to vector<256xf32>
    %177 = vector.shape_cast %176 : vector<256xf32> to vector<256x1xf32>
    %178 = vector.broadcast %177 : vector<256x1xf32> to vector<256x32xf32>
    %179 = arith.divf %175, %178 : vector<256x32xf32>
    %cst_68 = arith.constant dense<0.000000e+00> : vector<256x32xf32>
    %180 = tpu.matmul %179, %158, %cst_68 {dimension_numbers = #tpu.dot_dimension_numbers<[1], [0], [0], [1], [0, 0, 1, 1], [], []>} : vector<256x32xf32>, vector<32x32xf32>, vector<256x32xf32> -> vector<256x32xf32>
    %181 = vector.shape_cast %180 : vector<256x32xf32> to vector<8x32x32xf32>
    %182 = vector.shape_cast %47 : vector<256x32xf32> to vector<8x32x32xf32>
    %183 = arith.mulf %181, %182 : vector<8x32x32xf32>
    %cst_69 = arith.constant dense<0.000000e+00> : vector<32x32xf32>
    %184 = vector.multi_reduction <add>, %183, %cst_69 [0] : vector<8x32x32xf32> to vector<32x32xf32>
    %c1_70 = arith.constant 1 : index
    %c0_71 = arith.constant 0 : index
    %c0_72 = arith.constant 0 : index
    %185 = vector.load %arg6[%c1_70, %c0_71, %c0_72] : memref<3x32x32xf32, #tpu.memory_space<vmem>>, vector<1x32x32xf32>
    %186 = vector.shape_cast %185 : vector<1x32x32xf32> to vector<32x32xf32>
    %cst_73 = arith.constant dense<0.000000e+00> : vector<32x32xf32>
    %187 = tpu.matmul %184, %186, %cst_73 {dimension_numbers = #tpu.dot_dimension_numbers<[1], [0], [0], [1], [0, 0, 1, 1], [], []>} : vector<32x32xf32>, vector<32x32xf32>, vector<32x32xf32> -> vector<32x32xf32>
    %188 = arith.addf %143, %187 : vector<32x32xf32>
    %c1_74 = arith.constant 1 : index
    %c0_75 = arith.constant 0 : index
    %c0_76 = arith.constant 0 : index
    %189 = vector.load %arg7[%c1_74, %c0_75, %c0_76] : memref<3x1x32xf32, #tpu.memory_space<vmem>>, vector<1x1x32xf32>
    %190 = vector.shape_cast %189 : vector<1x1x32xf32> to vector<1x32xf32>
    %191 = vector.broadcast %190 : vector<1x32xf32> to vector<32x32xf32>
    %192 = arith.addf %188, %191 : vector<32x32xf32>
    %c1_77 = arith.constant 1 : index
    %c0_78 = arith.constant 0 : index
    %c0_79 = arith.constant 0 : index
    %193 = vector.load %arg8[%c1_77, %c0_78, %c0_79] : memref<3x1x32xf32, #tpu.memory_space<vmem>>, vector<1x1x32xf32>
    %194 = vector.shape_cast %193 : vector<1x1x32xf32> to vector<1x32xf32>
    %c1_80 = arith.constant 1 : index
    %c0_81 = arith.constant 0 : index
    %c0_82 = arith.constant 0 : index
    %195 = vector.load %arg9[%c1_80, %c0_81, %c0_82] : memref<3x1x32xf32, #tpu.memory_space<vmem>>, vector<1x1x32xf32>
    %196 = vector.shape_cast %195 : vector<1x1x32xf32> to vector<1x32xf32>
    %cst_83 = arith.constant dense<0.000000e+00> : vector<32x32xf32>
    %197 = tpu.matmul %74, %192, %cst_83 {dimension_numbers = #tpu.dot_dimension_numbers<[1], [0], [0], [1], [0, 0, 1, 1], [], []>} : vector<32x32xf32>, vector<32x32xf32>, vector<32x32xf32> -> vector<32x32xf32>
    %cst_84 = arith.constant dense<0.000000e+00> : vector<32x32xf32>
    %198 = tpu.matmul %197, %60, %cst_84 {dimension_numbers = #tpu.dot_dimension_numbers<[1], [0], [0], [1], [0, 0, 1, 1], [], []>} : vector<32x32xf32>, vector<32x32xf32>, vector<32x32xf32> -> vector<32x32xf32>
    %199 = arith.subf %192, %198 : vector<32x32xf32>
    %200 = arith.mulf %199, %199 : vector<32x32xf32>
    %cst_85 = arith.constant dense<0.000000e+00> : vector<32x32xf32>
    %201 = tpu.matmul %74, %200, %cst_85 {dimension_numbers = #tpu.dot_dimension_numbers<[1], [0], [0], [1], [0, 0, 1, 1], [], []>} : vector<32x32xf32>, vector<32x32xf32>, vector<32x32xf32> -> vector<32x32xf32>
    %cst_86 = arith.constant dense<0.000000e+00> : vector<32x32xf32>
    %202 = tpu.matmul %201, %60, %cst_86 {dimension_numbers = #tpu.dot_dimension_numbers<[1], [0], [0], [1], [0, 0, 1, 1], [], []>} : vector<32x32xf32>, vector<32x32xf32>, vector<32x32xf32> -> vector<32x32xf32>
    %cst_87 = arith.constant 9.99999974E-6 : f32
    %203 = vector.broadcast %cst_87 : f32 to vector<32x32xf32>
    %204 = arith.addf %202, %203 : vector<32x32xf32>
    %205 = math.rsqrt %204 : vector<32x32xf32>
    %206 = arith.mulf %199, %205 : vector<32x32xf32>
    %207 = vector.broadcast %194 : vector<1x32xf32> to vector<32x32xf32>
    %208 = arith.mulf %206, %207 : vector<32x32xf32>
    %209 = vector.broadcast %196 : vector<1x32xf32> to vector<32x32xf32>
    %210 = arith.addf %208, %209 : vector<32x32xf32>
    %c2 = arith.constant 2 : index
    %c0_88 = arith.constant 0 : index
    %c0_89 = arith.constant 0 : index
    %211 = vector.load %arg4[%c2, %c0_88, %c0_89] : memref<3x32x96xf32, #tpu.memory_space<vmem>>, vector<1x32x96xf32>
    %212 = vector.shape_cast %211 : vector<1x32x96xf32> to vector<32x96xf32>
    %c2_90 = arith.constant 2 : index
    %c0_91 = arith.constant 0 : index
    %c0_92 = arith.constant 0 : index
    %213 = vector.load %arg5[%c2_90, %c0_91, %c0_92] : memref<3x1x96xf32, #tpu.memory_space<vmem>>, vector<1x1x96xf32>
    %214 = vector.shape_cast %213 : vector<1x1x96xf32> to vector<1x96xf32>
    %215 = vector.extract_strided_slice %212 {offsets = [0, 0], sizes = [32, 32], strides = [1, 1]} : vector<32x96xf32> to vector<32x32xf32>
    %cst_93 = arith.constant dense<0.000000e+00> : vector<32x32xf32>
    %216 = tpu.matmul %210, %215, %cst_93 {dimension_numbers = #tpu.dot_dimension_numbers<[1], [0], [0], [1], [0, 0, 1, 1], [], []>} : vector<32x32xf32>, vector<32x32xf32>, vector<32x32xf32> -> vector<32x32xf32>
    %217 = vector.extract_strided_slice %214 {offsets = [0, 0], sizes = [1, 32], strides = [1, 1]} : vector<1x96xf32> to vector<1x32xf32>
    %218 = vector.broadcast %217 : vector<1x32xf32> to vector<32x32xf32>
    %219 = arith.addf %216, %218 : vector<32x32xf32>
    %220 = vector.extract_strided_slice %212 {offsets = [0, 32], sizes = [32, 64], strides = [1, 1]} : vector<32x96xf32> to vector<32x64xf32>
    %cst_94 = arith.constant dense<0.000000e+00> : vector<8x64xf32>
    %221 = tpu.matmul %83, %220, %cst_94 {dimension_numbers = #tpu.dot_dimension_numbers<[1], [0], [0], [1], [0, 0, 1, 1], [], []>} : vector<8x32xf32>, vector<32x64xf32>, vector<8x64xf32> -> vector<8x64xf32>
    %222 = vector.extract_strided_slice %214 {offsets = [0, 32], sizes = [1, 64], strides = [1, 1]} : vector<1x96xf32> to vector<1x64xf32>
    %223 = vector.broadcast %222 : vector<1x64xf32> to vector<8x64xf32>
    %224 = arith.addf %221, %223 : vector<8x64xf32>
    %225 = vector.extract_strided_slice %224 {offsets = [0, 0], sizes = [8, 32], strides = [1, 1]} : vector<8x64xf32> to vector<8x32xf32>
    %226 = vector.extract_strided_slice %224 {offsets = [0, 32], sizes = [8, 32], strides = [1, 1]} : vector<8x64xf32> to vector<8x32xf32>
    %cst_95 = arith.constant 5.000000e-01 : f32
    %227 = vector.broadcast %cst_95 : f32 to vector<32x32xf32>
    %228 = arith.mulf %219, %227 : vector<32x32xf32>
    %229 = vector.shape_cast %228 : vector<32x32xf32> to vector<1x32x32xf32>
    %230 = vector.shape_cast %229 : vector<1x32x32xf32> to vector<1x32x32xf32>
    %231 = vector.broadcast %230 : vector<1x32x32xf32> to vector<8x32x32xf32>
    %232 = vector.shape_cast %231 : vector<8x32x32xf32> to vector<256x32xf32>
    %233 = arith.mulf %232, %47 : vector<256x32xf32>
    %cst_96 = arith.constant dense<0.000000e+00> : vector<256x8xf32>
    %234 = tpu.matmul %233, %225, %cst_96 {dimension_numbers = #tpu.dot_dimension_numbers<[1], [1], [0], [0], [0, 0, 1, 0], [], []>} : vector<256x32xf32>, vector<8x32xf32>, vector<256x8xf32> -> vector<256x8xf32>
    %cst_97 = arith.constant dense<0xFF800000> : vector<256xf32>
    %235 = vector.multi_reduction <maximumf>, %234, %cst_97 [1] : vector<256x8xf32> to vector<256xf32>
    %236 = vector.shape_cast %235 : vector<256xf32> to vector<256x1xf32>
    %237 = vector.broadcast %236 : vector<256x1xf32> to vector<256x8xf32>
    %238 = arith.subf %234, %237 : vector<256x8xf32>
    %239 = math.exp %238 : vector<256x8xf32>
    %cst_98 = arith.constant dense<0.000000e+00> : vector<256xf32>
    %240 = vector.multi_reduction <add>, %239, %cst_98 [1] : vector<256x8xf32> to vector<256xf32>
    %241 = vector.shape_cast %240 : vector<256xf32> to vector<256x1xf32>
    %242 = vector.broadcast %241 : vector<256x1xf32> to vector<256x8xf32>
    %243 = arith.divf %239, %242 : vector<256x8xf32>
    %cst_99 = arith.constant dense<0.000000e+00> : vector<256x32xf32>
    %244 = tpu.matmul %243, %226, %cst_99 {dimension_numbers = #tpu.dot_dimension_numbers<[1], [0], [0], [1], [0, 0, 1, 1], [], []>} : vector<256x8xf32>, vector<8x32xf32>, vector<256x32xf32> -> vector<256x32xf32>
    %245 = vector.shape_cast %244 : vector<256x32xf32> to vector<8x32x32xf32>
    %246 = vector.shape_cast %47 : vector<256x32xf32> to vector<8x32x32xf32>
    %247 = arith.mulf %245, %246 : vector<8x32x32xf32>
    %cst_100 = arith.constant dense<0.000000e+00> : vector<32x32xf32>
    %248 = vector.multi_reduction <add>, %247, %cst_100 [0] : vector<8x32x32xf32> to vector<32x32xf32>
    %c2_101 = arith.constant 2 : index
    %c0_102 = arith.constant 0 : index
    %c0_103 = arith.constant 0 : index
    %249 = vector.load %arg6[%c2_101, %c0_102, %c0_103] : memref<3x32x32xf32, #tpu.memory_space<vmem>>, vector<1x32x32xf32>
    %250 = vector.shape_cast %249 : vector<1x32x32xf32> to vector<32x32xf32>
    %cst_104 = arith.constant dense<0.000000e+00> : vector<32x32xf32>
    %251 = tpu.matmul %248, %250, %cst_104 {dimension_numbers = #tpu.dot_dimension_numbers<[1], [0], [0], [1], [0, 0, 1, 1], [], []>} : vector<32x32xf32>, vector<32x32xf32>, vector<32x32xf32> -> vector<32x32xf32>
    %252 = arith.addf %210, %251 : vector<32x32xf32>
    %c2_105 = arith.constant 2 : index
    %c0_106 = arith.constant 0 : index
    %c0_107 = arith.constant 0 : index
    %253 = vector.load %arg7[%c2_105, %c0_106, %c0_107] : memref<3x1x32xf32, #tpu.memory_space<vmem>>, vector<1x1x32xf32>
    %254 = vector.shape_cast %253 : vector<1x1x32xf32> to vector<1x32xf32>
    %255 = vector.broadcast %254 : vector<1x32xf32> to vector<32x32xf32>
    %256 = arith.addf %252, %255 : vector<32x32xf32>
    %c2_108 = arith.constant 2 : index
    %c0_109 = arith.constant 0 : index
    %c0_110 = arith.constant 0 : index
    %257 = vector.load %arg8[%c2_108, %c0_109, %c0_110] : memref<3x1x32xf32, #tpu.memory_space<vmem>>, vector<1x1x32xf32>
    %258 = vector.shape_cast %257 : vector<1x1x32xf32> to vector<1x32xf32>
    %c2_111 = arith.constant 2 : index
    %c0_112 = arith.constant 0 : index
    %c0_113 = arith.constant 0 : index
    %259 = vector.load %arg9[%c2_111, %c0_112, %c0_113] : memref<3x1x32xf32, #tpu.memory_space<vmem>>, vector<1x1x32xf32>
    %260 = vector.shape_cast %259 : vector<1x1x32xf32> to vector<1x32xf32>
    %cst_114 = arith.constant dense<0.000000e+00> : vector<32x32xf32>
    %261 = tpu.matmul %75, %256, %cst_114 {dimension_numbers = #tpu.dot_dimension_numbers<[1], [0], [0], [1], [0, 0, 1, 1], [], []>} : vector<32x32xf32>, vector<32x32xf32>, vector<32x32xf32> -> vector<32x32xf32>
    %cst_115 = arith.constant dense<0.000000e+00> : vector<32x32xf32>
    %262 = tpu.matmul %261, %60, %cst_115 {dimension_numbers = #tpu.dot_dimension_numbers<[1], [0], [0], [1], [0, 0, 1, 1], [], []>} : vector<32x32xf32>, vector<32x32xf32>, vector<32x32xf32> -> vector<32x32xf32>
    %263 = arith.subf %256, %262 : vector<32x32xf32>
    %264 = arith.mulf %263, %263 : vector<32x32xf32>
    %cst_116 = arith.constant dense<0.000000e+00> : vector<32x32xf32>
    %265 = tpu.matmul %75, %264, %cst_116 {dimension_numbers = #tpu.dot_dimension_numbers<[1], [0], [0], [1], [0, 0, 1, 1], [], []>} : vector<32x32xf32>, vector<32x32xf32>, vector<32x32xf32> -> vector<32x32xf32>
    %cst_117 = arith.constant dense<0.000000e+00> : vector<32x32xf32>
    %266 = tpu.matmul %265, %60, %cst_117 {dimension_numbers = #tpu.dot_dimension_numbers<[1], [0], [0], [1], [0, 0, 1, 1], [], []>} : vector<32x32xf32>, vector<32x32xf32>, vector<32x32xf32> -> vector<32x32xf32>
    %cst_118 = arith.constant 9.99999974E-6 : f32
    %267 = vector.broadcast %cst_118 : f32 to vector<32x32xf32>
    %268 = arith.addf %266, %267 : vector<32x32xf32>
    %269 = math.rsqrt %268 : vector<32x32xf32>
    %270 = arith.mulf %263, %269 : vector<32x32xf32>
    %271 = vector.broadcast %258 : vector<1x32xf32> to vector<32x32xf32>
    %272 = arith.mulf %270, %271 : vector<32x32xf32>
    %273 = vector.broadcast %260 : vector<1x32xf32> to vector<32x32xf32>
    %274 = arith.addf %272, %273 : vector<32x32xf32>
    %275 = vector.shape_cast %274 : vector<32x32xf32> to vector<4x8x32xf32>
    %c0_119 = arith.constant 0 : index
    %c0_120 = arith.constant 0 : index
    %c0_121 = arith.constant 0 : index
    %c0_122 = arith.constant 0 : index
    %276 = vector.load %arg10[%c0_119, %c0_120, %c0_121, %c0_122] : memref<1x4x8x32xf32, #tpu.memory_space<vmem>>, vector<1x4x8x32xf32>
    %277 = vector.shape_cast %276 : vector<1x4x8x32xf32> to vector<4x8x32xf32>
    %278 = vector.shape_cast %275 : vector<4x8x32xf32> to vector<1x4x8x32xf32>
    tpu.vector_store %arg10[%c0_119, %c0_120, %c0_121, %c0_122], %278 {strides = array<i32>} : memref<1x4x8x32xf32, #tpu.memory_space<vmem>>, vector<1x4x8x32xf32>,
    return
  }
  func.func @transform_0(%arg0: i32) -> (i32, i32, i32, i32) {
    %c0_i32 = arith.constant 0 : i32
    %c0_i32_0 = arith.constant 0 : i32
    %c0_i32_1 = arith.constant 0 : i32
    %c0_i32_2 = arith.constant 0 : i32
    return %arg0, %c0_i32, %c0_i32_0, %c0_i32_1 : i32, i32, i32, i32
  }
  func.func @transform_1(%arg0: i32) -> (i32, i32, i32, i32) {
    %c0_i32 = arith.constant 0 : i32
    %c0_i32_0 = arith.constant 0 : i32
    %c0_i32_1 = arith.constant 0 : i32
    %c0_i32_2 = arith.constant 0 : i32
    return %arg0, %c0_i32, %c0_i32_0, %c0_i32_1 : i32, i32, i32, i32
  }
  func.func @transform_2(%arg0: i32) -> (i32, i32, i32) {
    %c0_i32 = arith.constant 0 : i32
    %c0_i32_0 = arith.constant 0 : i32
    %c0_i32_1 = arith.constant 0 : i32
    return %arg0, %c0_i32, %c0_i32_0 : i32, i32, i32
  }
  func.func @transform_3(%arg0: i32) -> (i32, i32, i32) {
    %c0_i32 = arith.constant 0 : i32
    %c0_i32_0 = arith.constant 0 : i32
    %c0_i32_1 = arith.constant 0 : i32
    %c0_i32_2 = arith.constant 0 : i32
    return %c0_i32, %c0_i32_0, %c0_i32_1 : i32, i32, i32
  }
  func.func @transform_4(%arg0: i32) -> (i32, i32, i32) {
    %c0_i32 = arith.constant 0 : i32
    %c0_i32_0 = arith.constant 0 : i32
    %c0_i32_1 = arith.constant 0 : i32
    %c0_i32_2 = arith.constant 0 : i32
    return %c0_i32, %c0_i32_0, %c0_i32_1 : i32, i32, i32
  }
  func.func @transform_5(%arg0: i32) -> (i32, i32, i32) {
    %c0_i32 = arith.constant 0 : i32
    %c0_i32_0 = arith.constant 0 : i32
    %c0_i32_1 = arith.constant 0 : i32
    %c0_i32_2 = arith.constant 0 : i32
    return %c0_i32, %c0_i32_0, %c0_i32_1 : i32, i32, i32
  }
  func.func @transform_6(%arg0: i32) -> (i32, i32, i32) {
    %c0_i32 = arith.constant 0 : i32
    %c0_i32_0 = arith.constant 0 : i32
    %c0_i32_1 = arith.constant 0 : i32
    %c0_i32_2 = arith.constant 0 : i32
    return %c0_i32, %c0_i32_0, %c0_i32_1 : i32, i32, i32
  }
  func.func @transform_7(%arg0: i32) -> (i32, i32, i32) {
    %c0_i32 = arith.constant 0 : i32
    %c0_i32_0 = arith.constant 0 : i32
    %c0_i32_1 = arith.constant 0 : i32
    %c0_i32_2 = arith.constant 0 : i32
    return %c0_i32, %c0_i32_0, %c0_i32_1 : i32, i32, i32
  }
  func.func @transform_8(%arg0: i32) -> (i32, i32, i32) {
    %c0_i32 = arith.constant 0 : i32
    %c0_i32_0 = arith.constant 0 : i32
    %c0_i32_1 = arith.constant 0 : i32
    %c0_i32_2 = arith.constant 0 : i32
    return %c0_i32, %c0_i32_0, %c0_i32_1 : i32, i32, i32
  }
  func.func @transform_9(%arg0: i32) -> (i32, i32, i32, i32) {
    %c0_i32 = arith.constant 0 : i32
    %c0_i32_0 = arith.constant 0 : i32
    %c0_i32_1 = arith.constant 0 : i32
    %c0_i32_2 = arith.constant 0 : i32
    return %arg0, %c0_i32, %c0_i32_0, %c0_i32_1 : i32, i32, i32, i32
  }
}

</mosaic_0001>

<bundles_post_ra>
// kernel: forward.1
= control target key start
LH: loop header
LB: loop body
LE: loop exit
PB: predicated region body
PF: predicated region fallthrough
CT: control target
= control target key end

     0   :  { %14 = vsyncpa [#allocation3], 0  ;;  %s11965_s0 = inlined_call_operand.vmem [shape: f32[2,4,8,32], index: 0, kind: input, shape index: {}]   ;;  %s11966_s1 = inlined_call_operand.vmem [shape: f32[2,4,8,32], index: 1, kind: input, shape index: {}]   ;;  %s11967_s2 = inlined_call_operand.vmem [shape: f32[2,8,32], index: 2, kind: input, shape index: {}]   ;;  %s11968_s3 = inlined_call_operand.vmem [shape: f32[3,32,96], index: 3, kind: input, shape index: {}]   ;;  %s11969_s4 = inlined_call_operand.vmem [shape: f32[3,1,96], index: 4, kind: input, shape index: {}]   ;;  %s11970_s5 = inlined_call_operand.vmem [shape: f32[3,32,32], index: 5, kind: input, shape index: {}]   ;;  %s11971_s6 = inlined_call_operand.vmem [shape: f32[3,1,32], index: 6, kind: input, shape index: {}]   ;;  %s11972_s7 = inlined_call_operand.vmem [shape: f32[3,1,32], index: 7, kind: input, shape index: {}]   ;;  %s11973_s8 = inlined_call_operand.vmem [shape: f32[3,1,32], index: 8, kind: input, shape index: {}]   ;;  %s11974_s9 = inlined_call_operand.hbm [shape: f32[2,4,8,32], index: 9, kind: output, shape index: {}]  }
   0x1   :  { %16 = vsyncpa [#allocation3 + $0x1], 0  ;;  %s8808_s30 = smov 0   ;;  %s8810_s10 = smov 0  }
   0x2   :  { %s8812_s11 = smov 0   ;;  %s8814_s12 = smov 0  }
   0x3 LB: > { %s8829_s13 = sadd.s32 4294967295, %s8747_s12   ;;  %s6638_s14 = sadd.s32 4294967294, %s8747_s12   ;;  %s8747_s12 = sphi %s8814_s12, %s12629_s12   ;;  %s8743_s11 = sphi %s8812_s11, %s12628_s11   ;;  %s8739_s10 = sphi %s8810_s10, %s12627_s10   ;;  %s8735_s30 = sphi %s8808_s30, %s12626_s30  }
   0x4   : > { %s8833_s15 = sadd.s32 1, %s8747_s12   ;;  %s233_s16 = sadd.s32 1, %s8743_s11 }
   0x5   : > { %s230_s17 = ssub.s32 %s8747_s12, %s8833_s15  ;;  %p243_p0 = scmp.ne.s32.totalorder %s8743_s11, %s8739_s10 }
   0x6   : > { %p231_p1 = scmp.eq.s32.totalorder %s230_s17, 0  ;;  %p244_p2 = scmp.eq.s32.totalorder %s8829_s13, 1 }
   0x7   : > { %p249_p3 = scmp.ne.s32.totalorder %s8739_s10, %s8735_s30  ;;  %p250_p4 = scmp.eq.s32.totalorder %s6638_s14, 1 }
   0x8   : > { %s8844_s18 = scalar_select %p231_p1, %s8743_s11, %s233_s16  }
   0x9   : > { %p8846_p5 = por %p244_p2, %p243_p0  ;;  %p8850_p6 = por %p250_p4, %p249_p3 }
   0xa   : > { %p6641_p7 = scmp.ge.s32.totalorder %s8747_s12, 1  ;;  %p309_p8 = scmp.lt.s32.totalorder %s8747_s12, 3 }
   0xc   : > { %p310_p9 = pnand %p6641_p7, %p309_p8 }
   0xe   : > { %313 = sbr.rel (%p310_p9) target bundleno = 6878 (0x1ade), region = 56 }
  0x15   : > { %v915_v0 = vld [vmem:[%s11968_s3] sm:$0xff]  ;;  %v916_v1 = vld [vmem:[%s11968_s3 + $0x8] sm:$0xff]  ;;  %v917_v2 = vld [vmem:[%s11968_s3 + $0x10] sm:$0xff]  ;;  %p354_p10 = scmp.lt.s32.totalorder %s8829_s13, 1  ;;  %vm926_vm0 = vcmask 261120   ;;  %v368_v10 = vlaneseq  ;;  %v12005_v24 = vmov 0.0  }
  0x16   : > { %v7978_v3 = vpack.c.bf16 %v916_v1, %v915_v0  ;;  %v918_v4 = vld [vmem:[%s11968_s3 + $0x18] sm:$0xff]  ;;  %v6688_v19 = vld [vmem:[%s11969_s4] ss:$0 sm:$0xff]  ;;  %s8750_s24 = smov 96   ;;  %vm8937_vm2 = vmpackc.low %vm926_vm0, %vm926_vm0  ;;  %v12215_v42 = vmov 0  ;;  %s12132_s25 = smov 64  }
  0x17   : > { %v7982_v5 = vpack.c.bf16 %v918_v4, %v917_v2  ;;  %s8870_s29 = scalar_select %p354_p10, %s8829_s13, 1  ;;  %v394_v11 = vand.u32 127, %v368_v10  ;;  %v8888_v12 = vshrl.u32 %v368_v10, 7  ;;  %v12216_v42 = vsel %vm8937_vm2, 4294967295, %v12215_v42 }
  0x18   : > { %7979 = vmatprep.subr.bf16.mxu0 %v7978_v3  ;;  %12217 = vst [vmem:[#allocation10_spill] sm:$0xff] %v12216_v42  ;;  %s351_s17 = sand.u32 1, %s8739_s10   ;;  %s7009_s26 = sshll.u32 %s8829_s13, 9 }
  0x19   : > { %7981 = vmatpush3.bf16.msra.mxu0 %v7978_v3  ;;  %s7007_s14 = sshll.u32 %s8870_s29, 5  ;;  %v8891_v13 = vcvt.s32.f32 %v8888_v12  ;;  %v8893_v14 = vcvt.s32.f32 %v394_v11  ;;  %v370_v34 = vadd.s32 8, %v8888_v12  ;;  %v371_v35 = vadd.s32 16, %v8888_v12  ;;  %s6647_s23 = sshll.u32 %s8870_s29, 3 }
  0x1a   : > { %7983 = vmatprep.subr.bf16.mxu0 %v7982_v5  ;;  %s8878_s21 = scalar_lea.vmem %s11965_s0, %s7007_s14  ;;  %v8930_v37 = vadd.s32 32, %v8888_v12  ;;  %v372_v41 = vadd.s32 24, %v8888_v12  ;;  %v8945_v47 = vadd.s32 40, %v8888_v12  ;;  %v8960_v53 = vadd.s32 48, %v8888_v12  ;;  %s363_s16 = scalar_lea.vmem %s11966_s1, %s7007_s14 }
  0x1b   : > { %v906_v6 = vld [vmem:[%s8878_s21] sm:$0xff]  ;;  %v907_v7 = vld [vmem:[%s8878_s21 + $0x8] sm:$0xff]  ;;  %v908_v8 = vld [vmem:[%s8878_s21 + $0x10] sm:$0xff]  ;;  %12210 = vst [vmem:[#allocation5_spill] sm:$0xff] %v8891_v13  ;;  %v8896_v15 = vmul.f32 0.03125, %v8891_v13  ;;  %v712_v16 = vmul.f32 0.25, %v8893_v14  ;;  %v8932_v40 = vcvt.s32.f32 %v370_v34  ;;  %v8941_v43 = vcvt.s32.f32 %v371_v35 }
  0x1c   : > { %7385 = vmatprep.mubr.msk.f32.mxu0 %vm926_vm0, %v906_v6  ;;  %v909_v9 = vld [vmem:[%s8878_s21 + $0x18] sm:$0xff]  ;;  %v11984_v46 = vcvt.s32.f32 %v8930_v37  ;;  %v8952_v51 = vcvt.s32.f32 %v372_v41  ;;  %v11986_v55 = vcvt.s32.f32 %v8945_v47  ;;  %v8964_v56 = vadd.s32 64, %v8888_v12  ;;  %s6642_s14 = sshll.u32 %s351_s17, 5  ;;  %s11924_s13 = scalar_lea.sflag [#allocation3], %s351_s17 }
  0x1d   : > { %7985 = vmatpush3.bf16.msra.mxu0 %v7982_v5  ;;  %v11993_v17 = vfloor.f32 %v8896_v15  ;;  %v8900_v18 = vfloor.f32 %v712_v16  ;;  %12214 = vst [vmem:[#allocation9_spill] sm:$0xff] %v8932_v40  ;;  %12218 = vst [vmem:[#allocation11_spill] sm:$0xff] %v8941_v43  ;;  %v8950_v50 = vmul.f32 0.03125, %v8932_v40  ;;  %v8957_v52 = vmul.f32 0.03125, %v8941_v43 }
  0x1e   : > { %12219 = vst [vmem:[#allocation12_spill] sm:$0xff] %v8952_v51  ;;  %v8970_v58 = vmul.f32 0.03125, %v8952_v51  ;;  %v8974_v59 = vmul.f32 0.03125, %v11984_v46  ;;  %v8977_v60 = vadd.s32 56, %v8888_v12  ;;  %v11979_v62 = vcvt.s32.f32 %v8960_v53 }
  0x1f   : > { %vm714_vm1 = vcmp.eq.f32.partialorder %v11993_v17, %v8900_v18  ;;  %v11994_v57 = vfloor.f32 %v8950_v50  ;;  %v11989_v61 = vfloor.f32 %v8957_v52  ;;  %v8983_v63 = vmul.f32 0.03125, %v11986_v55 }
  0x20   : > { %7386 = vmatmul.mubr.msk.f32.vlgmr.msra.gmra.mrb[0].mxu0 %vm926_vm0, %v907_v7  ;;  %v8909_v25 = vsel %vm714_vm1, 1.0, %v12005_v24  ;;  %v11975_v0 = vcvt.s32.f32 %v8964_v56  ;;  %v8987_v1 = vadd.s32 72, %v8888_v12  ;;  %v11991_v2 = vfloor.f32 %v8970_v58 }
  0x21   : > { %7388 = vmatprep.mubr.msk.f32.mxu0 %vm926_vm0, %v908_v8  ;;  %12211 = vst [vmem:[#allocation6_spill] sm:$0xff] %v8909_v25  ;;  %vm715_vm3 = vcmp.eq.f32.partialorder %v11994_v57, %v8900_v18  ;;  %v11987_v3 = vfloor.f32 %v8974_v59  ;;  %v11981_v4 = vcvt.s32.f32 %v8977_v60  ;;  %vm716_vm4 = vcmp.eq.f32.partialorder %v11989_v61, %v8900_v18 }
  0x22   : > { %v9002_v5 = vmul.f32 0.03125, %v11979_v62  ;;  %v9005_v6 = vadd.s32 80, %v8888_v12  ;;  %v9008_v7 = vadd.s32 88, %v8888_v12  ;;  %v9018_v11 = vsel %vm715_vm3, 1.0, %v12005_v24 }
  0x23   : > { %12220 = vst [vmem:[#allocation13_spill] sm:$0xff] %v9018_v11  ;;  %v9022_v16 = vmul.f32 0.03125, %v11975_v0  ;;  %vm717_vm5 = vcmp.eq.f32.partialorder %v11991_v2, %v8900_v18  ;;  %vm718_vm6 = vcmp.eq.f32.partialorder %v11987_v3, %v8900_v18  ;;  %v9048_v34 = vadd.s32 104, %v8888_v12 }
  0x24   : > { %7389 = vmatmul.mubr.msk.f32.gmra.mrb[2].mxu0 %vm926_vm0, %v909_v9  ;;  %v9013_v9 = vadd.s32 96, %v8888_v12  ;;  %v9160_v57 = vadd.s32 152, %v8888_v12 }
  0xf3   : > { %v7387_v20 = vpop.f32.mrb[0].mxu0 }
  0xf4   : > { %v1011_v21 = vadd.f32 %v7387_v20, %v6688_v19  ;;  %v1005_v22 = vpop.f32.mrb[1].mxu0  ;;  %v9026_v20 = vsel %vm716_vm4, 1.0, %v12005_v24 }
  0xf5   : > { %v1006_v23 = vadd.f32 %v6688_v19, %v1005_v22  ;;  %12221 = vst [vmem:[#allocation14_spill] sm:$0xff] %v9026_v20  ;;  %v9034_v22 = vmul.f32 0.03125, %v11981_v4 }
  0xf6   : > { %v9010_v8 = vmul.f32 0.5, %v1011_v21 }
  0xf7   : > { %v8911_v26 = vmul.f32 0.5, %v1006_v23  ;;  %v8913_v27 = vpack.i.bf16 %v1011_v21, %v1006_v23  ;;  %v7390_v28 = vpop.f32.mrb[2].mxu0  ;;  %v11988_v21 = vfloor.f32 %v8983_v63  ;;  %v11982_v23 = vfloor.f32 %v9002_v5 }
  0xf8   : > { %v8915_v29 = vadd.f32 %v7390_v28, %v6688_v19  ;;  %v1015_v30 = vpop.f32.mrb[3].mxu0  ;;  %v11976_v28 = vcvt.s32.f32 %v9005_v6  ;;  %v11983_v41 = vfloor.f32 %v9034_v22 }
  0xf9   : > { %12212 = vst [vmem:[#allocation7_spill] sm:$0xff] %v8913_v27  ;;  %8224 = vrot.lane.b32.xlu0 %v8913_v27, %s8750_s24  ;;  %v1016_v31 = vadd.f32 %v6688_v19, %v1015_v30  ;;  %v1028_v32 = vmul.f32 %v8909_v25, %v8911_v26  ;;  %v11977_v19 = vcvt.s32.f32 %v8987_v1  ;;  %v11978_v30 = vcvt.s32.f32 %v9008_v7 }
  0xfa   : > { %vm719_vm7 = vcmp.eq.f32.partialorder %v11988_v21, %v8900_v18  ;;  %vm720_vm8 = vcmp.eq.f32.partialorder %v11982_v23, %v8900_v18  ;;  %vm721_vm9 = vcmp.eq.f32.partialorder %v11983_v41, %v8900_v18  ;;  %v9115_v23 = vadd.s32 128, %v8888_v12 }
  0xfb   : > { %7399 = vmatprep.mubr.msk.f32.mxu1 %vm926_vm0, %v1028_v32  ;;  %v8923_v33 = vpack.i.bf16 %v8915_v29, %v1016_v31  ;;  %v9015_v10 = vmul.f32 0.5, %v1016_v31  ;;  %v9043_v31 = vmul.f32 0.5, %v8915_v29  ;;  %v1029_v32 = vmul.f32 %v9018_v11, %v9010_v8 }
  0xfc   : > { %v9062_v29 = vsel %vm718_vm6, 1.0, %v12005_v24  ;;  %v9090_v0 = vsel %vm719_vm7, 1.0, %v12005_v24  ;;  %12227 = vst [vmem:[#allocation20_spill] sm:$0xff] %v9115_v23  ;;  %v9129_v55 = vsel %vm721_vm9, 1.0, %v12005_v24  ;;  %v9133_v21 = vadd.s32 144, %v8888_v12 }
  0xfd   : > { %12213 = vst [vmem:[#allocation8_spill] sm:$0xff] %v8923_v33  ;;  %8229 = vrot.lane.b32.xlu0 %v8923_v33, %s8750_s24  ;;  %v1030_v35 = vmul.f32 %v9026_v20, %v9015_v10  ;;  %12223 = vst [vmem:[#allocation16_spill] sm:$0xff] %v9062_v29  ;;  %v1033_v41 = vmul.f32 %v9090_v0, %v9010_v8  ;;  %v12236_v2 = vcvt.s32.f32 %v9115_v23 }
  0xfe   : > { %12225 = vst [vmem:[#allocation18_spill] sm:$0xff] %v9090_v0  ;;  %12228 = vst [vmem:[#allocation21_spill] sm:$0xff] %v9129_v55 }
  0xff   : > { %12229 = vst [vmem:[#allocation22_spill] sm:$0xff] %v9133_v21 }
 0x16b   : > { %v8225_v36 = vpop.permute.xlu0 %8224 }
 0x16c   : > { %v8227_v38 = vunpack.i.h.bf16 %v8225_v36  ;;  %v8226_v39 = vunpack.i.l.bf16 %v8225_v36  ;;  %v9053_v36 = vsel %vm717_vm5, 1.0, %v12005_v24 }
 0x16d   : > { %12222 = vst [vmem:[#allocation15_spill] sm:$0xff] %v9053_v36 }
 0x16e   : > { %v7986_v44 = vpack.c.bf16 %v8227_v38, %v8226_v39  ;;  %v9057_v38 = vmul.f32 0.03125, %v11977_v19  ;;  %v11980_v39 = vcvt.s32.f32 %v9013_v9  ;;  %v9097_v19 = vadd.s32 120, %v8888_v12 }
 0x16f   : > { %v8230_v45 = vpop.permute.xlu0 %8229 }
 0x170   : > { %7988 = vmatprep.subr.msk.bf16.mxu1 %vm8937_vm2, %v7986_v44  ;;  %v8232_v48 = vunpack.i.h.bf16 %v8230_v45  ;;  %v8231_v49 = vunpack.i.l.bf16 %v8230_v45  ;;  %v9075_v45 = vmul.f32 0.03125, %v11976_v28  ;;  %v9094_v28 = vmul.f32 0.03125, %v11980_v39 }
 0x171   : > { %7991 = vmatpush3.bf16.xpose.msk.msra.mxu1 %vm8937_vm2, %v7986_v44  ;;  %v11985_v44 = vfloor.f32 %v9022_v16  ;;  %v11992_v62 = vfloor.f32 %v9057_v38  ;;  %v12000_v3 = vcvt.s32.f32 %v9097_v19 }
 0x172   : > { %v7992_v54 = vpack.c.bf16 %v8232_v48, %v8231_v49  ;;  %v9079_v48 = vmul.f32 0.03125, %v11978_v30  ;;  %v9082_v49 = vadd.s32 112, %v8888_v12  ;;  %v9101_v30 = vsel %vm720_vm8, 1.0, %v12005_v24 }
 0x173   : > { %12226 = vst [vmem:[#allocation19_spill] sm:$0xff] %v9101_v30  ;;  %vm722_vm10 = vcmp.eq.f32.partialorder %v11985_v44, %v8900_v18  ;;  %v11995_v39 = vfloor.f32 %v9075_v45  ;;  %v9124_v44 = vadd.s32 136, %v8888_v12  ;;  %vm723_vm11 = vcmp.eq.f32.partialorder %v11992_v62, %v8900_v18 }
 0x174   : > { %7994 = vmatprep.subr.msk.bf16.mxu1 %vm8937_vm2, %v7992_v54  ;;  %12224 = vst [vmem:[#allocation17_spill] sm:$0xff] %v9082_v49  ;;  %v11996_v4 = vfloor.f32 %v9079_v48  ;;  %v9137_v61 = vsel %vm722_vm10, 1.0, %v12005_v24  ;;  %v1035_v62 = vmul.f32 %v9129_v55, %v9043_v31  ;;  %v12235_v42 = vfloor.f32 %v9094_v28 }
 0x175   : > { %12230 = vst [vmem:[#allocation23_spill] sm:$0xff] %v9137_v61  ;;  %vm724_vm12 = vcmp.eq.f32.partialorder %v11995_v39, %v8900_v18  ;;  %v1036_v39 = vmul.f32 %v9137_v61, %v8911_v26  ;;  %v9217_v55 = vadd.s32 176, %v8888_v12 }
 0x176   : > { %vm725_vm13 = vcmp.eq.f32.partialorder %v11996_v4, %v8900_v18  ;;  %v9165_v4 = vsel %vm723_vm11, 1.0, %v12005_v24  ;;  %v9174_v17 = vsel %vm724_vm12, 1.0, %v12005_v24  ;;  %vm726_vm14 = vcmp.eq.f32.partialorder %v12235_v42, %v8900_v18 }
 0x177   : > { %12231 = vst [vmem:[#allocation24_spill] sm:$0xff] %v9165_v4  ;;  %12232 = vst [vmem:[#allocation25_spill] sm:$0xff] %v9174_v17  ;;  %v1037_v61 = vmul.f32 %v9165_v4, %v9010_v8  ;;  %v1038_v42 = vmul.f32 %v9174_v17, %v9015_v10  ;;  %v9209_v4 = vadd.s32 168, %v8888_v12 }
 0x178   : > { %12244 = vst [vmem:[#allocation31_spill] sm:$0xff] %v9217_v55 }
 0x179   : > { %7997 = vmatpush3.bf16.xpose.msk.msra.mxu1 %vm8937_vm2, %v7992_v54  ;;  %v1031_v54 = vmul.f32 %v9053_v36, %v9043_v31  ;;  %v12258_v33 = vcvt.s32.f32 %v9209_v4 }
 0x17b   : > { %v9276_v27 = vmul.f32 0.03125, %v12258_v33  ;;  %v9330_v33 = vadd.s32 224, %v8888_v12 }
 0x17d   : > { %12271 = vst [vmem:[#allocation45_spill] sm:$0xff] %v9330_v33 }
 0x180   : > { %7400 = vmatmul.mubr.msk.f32.vlgmr.msra.gmra.mrb[0].mxu1 %vm926_vm0, %v1029_v32  ;;  %v11990_v32 = vcvt.s32.f32 %v9048_v34 }
 0x181   : > { %7402 = vmatprep.mubr.msk.f32.mxu1 %vm926_vm0, %v1030_v35  ;;  %v1032_v35 = vmul.f32 %v9062_v29, %v8911_v26 }
 0x182   : > { %v9121_v46 = vmul.f32 0.03125, %v11990_v32  ;;  %v9181_v32 = vsel %vm725_vm13, 1.0, %v12005_v24 }
 0x183   : > { %12234 = vst [vmem:[#allocation27_spill] sm:$0xff] %v9181_v32  ;;  %v1039_v17 = vmul.f32 %v9181_v32, %v9043_v31 }
 0x184   : > { %7403 = vmatmul.mubr.msk.f32.gmra.mrb[2].mxu1 %vm926_vm0, %v1031_v54  ;;  %v11997_v54 = vcvt.s32.f32 %v9082_v49  ;;  %v12284_v49 = vcvt.s32.f32 %v9330_v33 }
 0x185   : > { %7405 = vmatprep.mubr.msk.f32.mxu1 %vm926_vm0, %v1032_v35  ;;  %v1034_v35 = vmul.f32 %v9101_v30, %v9015_v10  ;;  %v12238_v30 = vfloor.f32 %v9121_v46 }
 0x187   : > { %vm727_vm15 = vcmp.eq.f32.partialorder %v12238_v30, %v8900_v18  ;;  %v12242_v30 = vmov 0.0  }
 0x188   : > { %7406 = vmatmul.mubr.msk.f32.gmra.mrb[4].mxu1 %vm926_vm0, %v1033_v41  ;;  %v9152_v41 = vmul.f32 0.03125, %v11997_v54  ;;  %v9169_v54 = vmul.f32 0.03125, %v12000_v3  ;;  %v9213_v36 = vsel %vm726_vm14, 1.0, %v12242_v30 }
 0x189   : > { %7408 = vmatprep.mubr.msk.f32.mxu1 %vm926_vm0, %v1034_v35  ;;  %v9177_v35 = vadd.s32 160, %v8888_v12  ;;  %12243 = vst [vmem:[#allocation30_spill] sm:$0xff] %v9213_v36 }
 0x18a   : > { %v12245_v3 = vfloor.f32 %v9152_v41 }
 0x18b   : > { %12233 = vst [vmem:[#allocation26_spill] sm:$0xff] %v9177_v35  ;;  %v12250_v29 = vcvt.s32.f32 %v9177_v35 }
 0x18c   : > { %7409 = vmatmul.mubr.msk.f32.gmra.mrb[6].mxu1 %vm926_vm0, %v1035_v62  ;;  %v9189_v62 = vmul.f32 0.03125, %v12236_v2  ;;  %v12240_v2 = vcvt.s32.f32 %v9133_v21  ;;  %vm728_vm1 = vcmp.eq.f32.partialorder %v12245_v3, %v8900_v18  ;;  %v12248_v3 = vfloor.f32 %v9169_v54 }
 0x18d   : > { %7411 = vmatprep.mubr.msk.f32.mxu1 %vm926_vm0, %v1036_v39  ;;  %v12239_v39 = vcvt.s32.f32 %v9124_v44  ;;  %v9243_v25 = vsel %vm728_vm1, 1.0, %v12242_v30  ;;  %v9294_v21 = vadd.s32 208, %v8888_v12 }
 0x18e   : > { %12237 = vst [vmem:[#allocation28_spill] sm:$0xff] %v9189_v62  ;;  %v9206_v20 = vmul.f32 0.03125, %v12240_v2  ;;  %vm729_vm3 = vcmp.eq.f32.partialorder %v12248_v3, %v8900_v18  ;;  %12249 = vst [vmem:[#allocation33_spill] sm:$0xff] %v9243_v25  ;;  %v12253_v3 = vfloor.f32 %v9189_v62 }
 0x18f   : > { %v9198_v24 = vmul.f32 0.03125, %v12239_v39  ;;  %v12247_v39 = vcvt.s32.f32 %v9160_v57  ;;  %12263 = vst [vmem:[#allocation41_spill] sm:$0xff] %v9294_v21 }
 0x190   : > { %12241 = vst [vmem:[#allocation29_spill] sm:$0xff] %v9206_v20  ;;  %7412 = vmatmul.mubr.msk.f32.gmra.mrb[8].mxu1 %vm926_vm0, %v1037_v61  ;;  %v9227_v61 = vsel %vm727_vm15, 1.0, %v12242_v30  ;;  %vm730_vm4 = vcmp.eq.f32.partialorder %v12253_v3, %v8900_v18  ;;  %v12257_v3 = vfloor.f32 %v9206_v20 }
 0x191   : > { %7414 = vmatprep.mubr.msk.f32.mxu1 %vm926_vm0, %v1038_v42  ;;  %12246 = vst [vmem:[#allocation32_spill] sm:$0xff] %v9227_v61  ;;  %v9232_v0 = vmul.f32 0.03125, %v12247_v39  ;;  %v1040_v42 = vmul.f32 %v9213_v36, %v8911_v26  ;;  %v9247_v39 = vmul.f32 0.03125, %v12250_v29  ;;  %v9251_v36 = vadd.s32 184, %v8888_v12 }
 0x192   : > { %v1041_v32 = vmul.f32 %v9227_v61, %v9010_v8  ;;  %v9263_v29 = vsel %vm729_vm3, 1.0, %v12242_v30  ;;  %v12256_v11 = vfloor.f32 %v9198_v24  ;;  %vm732_vm6 = vcmp.eq.f32.partialorder %v12257_v3, %v8900_v18 }
 0x193   : > { %12251 = vst [vmem:[#allocation34_spill] sm:$0xff] %v9247_v39  ;;  %12252 = vst [vmem:[#allocation35_spill] sm:$0xff] %v9251_v36  ;;  %v9279_v61 = vadd.s32 200, %v8888_v12  ;;  %v9302_v2 = vsel %vm732_vm6, 1.0, %v12242_v30  ;;  %v12268_v20 = vcvt.s32.f32 %v9251_v36  ;;  %v9356_v36 = vadd.s32 232, %v8888_v12 }
 0x194   : > { %7415 = vmatmul.mubr.msk.f32.gmra.mrb[10].mxu1 %vm926_vm0, %v1039_v17  ;;  %v9258_v17 = vadd.s32 192, %v8888_v12  ;;  %12255 = vst [vmem:[#allocation37_spill] sm:$0xff] %v9263_v29  ;;  %vm731_vm5 = vcmp.eq.f32.partialorder %v12256_v11, %v8900_v18  ;;  %v9283_v11 = vsel %vm730_vm4, 1.0, %v12242_v30  ;;  %12265 = vst [vmem:[#allocation43_spill] sm:$0xff] %v9302_v2 }
 0x195   : > { %7417 = vmatprep.mubr.msk.f32.mxu1 %vm926_vm0, %v1040_v42  ;;  %v1042_v42 = vmul.f32 %v9243_v25, %v9015_v10  ;;  %12259 = vst [vmem:[#allocation38_spill] sm:$0xff] %v9279_v61  ;;  %12260 = vst [vmem:[#allocation39_spill] sm:$0xff] %v9283_v11  ;;  %v12261_v25 = vcvt.s32.f32 %v9217_v55  ;;  %v9299_v23 = vsel %vm731_vm5, 1.0, %v12242_v30  ;;  %v9318_v62 = vmul.f32 0.03125, %v12268_v20 }
 0x196   : > { %12254 = vst [vmem:[#allocation36_spill] sm:$0xff] %v9258_v17  ;;  %12264 = vst [vmem:[#allocation42_spill] sm:$0xff] %v9299_v23  ;;  %v1046_v55 = vmul.f32 %v9302_v2, %v9015_v10 }
 0x197   : > { %v9288_v35 = vmul.f32 0.03125, %v12261_v25  ;;  %v1044_v25 = vmul.f32 %v9283_v11, %v8911_v26  ;;  %v9321_v11 = vadd.s32 216, %v8888_v12 }
 0x198   : > { %7418 = vmatmul.mubr.msk.f32.gmra.mrb[12].mxu1 %vm926_vm0, %v1041_v32  ;;  %v1043_v32 = vmul.f32 %v9263_v29, %v9043_v31  ;;  %v12267_v29 = vfloor.f32 %v9247_v39 }
 0x199   : > { %12262 = vst [vmem:[#allocation40_spill] sm:$0xff] %v9288_v35  ;;  %7420 = vmatprep.mubr.msk.f32.mxu1 %vm926_vm0, %v1042_v42  ;;  %v12266_v42 = vfloor.f32 %v9232_v0 }
 0x19a   : > { %vm734_vm8 = vcmp.eq.f32.partialorder %v12267_v29, %v8900_v18  ;;  %v1045_v29 = vmul.f32 %v9299_v23, %v9010_v8  ;;  %v12276_v23 = vfloor.f32 %v9288_v35  ;;  %v9366_v35 = vadd.s32 240, %v8888_v12 }
 0x19b   : > { %vm733_vm7 = vcmp.eq.f32.partialorder %v12266_v42, %v8900_v18  ;;  %v12269_v42 = vcvt.s32.f32 %v9258_v17 }
 0x19c   : > { %7421 = vmatmul.mubr.msk.f32.gmra.mrb[14].mxu1 %vm926_vm0, %v1043_v32  ;;  %v9335_v20 = vsel %vm733_vm7, 1.0, %v12242_v30  ;;  %v12275_v32 = vcvt.s32.f32 %v9279_v61  ;;  %vm736_vm10 = vcmp.eq.f32.partialorder %v12276_v23, %v8900_v18  ;;  %12278 = vst [vmem:[#allocation48_spill] sm:$0xff] %v9366_v35 }
 0x19d   : > { %7423 = vmatprep.mubr.msk.f32.mxu1 %vm926_vm0, %v1044_v25  ;;  %v9326_v3 = vmul.f32 0.03125, %v12269_v42  ;;  %12272 = vst [vmem:[#allocation46_spill] sm:$0xff] %v9335_v20  ;;  %v9340_v25 = vsel %vm734_vm8, 1.0, %v12242_v30  ;;  %v12274_v42 = vfloor.f32 %v9276_v27  ;;  %v1047_v23 = vmul.f32 %v9335_v20, %v9043_v31 }
 0x19e   : > { %12273 = vst [vmem:[#allocation47_spill] sm:$0xff] %v9340_v25  ;;  %v9347_v17 = vmul.f32 0.03125, %v12275_v32  ;;  %v12277_v32 = vcvt.s32.f32 %v9294_v21  ;;  %v1048_v2 = vmul.f32 %v9340_v25, %v8911_v26  ;;  %v9389_v21 = vadd.s32 248, %v8888_v12 }
 0x19f   : > { %12270 = vst [vmem:[#allocation44_spill] sm:$0xff] %v9326_v3  ;;  %vm735_vm9 = vcmp.eq.f32.partialorder %v12274_v42, %v8900_v18  ;;  %v12282_v42 = vcvt.s32.f32 %v9321_v11 }
 0x1a0   : > { %7424 = vmatmul.mubr.msk.f32.gmra.mrb[16].mxu1 %vm926_vm0, %v1045_v29  ;;  %v9362_v61 = vmul.f32 0.03125, %v12277_v32  ;;  %v9373_v39 = vsel %vm735_vm9, 1.0, %v12242_v30  ;;  %v12281_v29 = vfloor.f32 %v9318_v62  ;;  %v12283_v32 = vfloor.f32 %v9326_v3 }
 0x1a1   : > { %7426 = vmatprep.mubr.msk.f32.mxu1 %vm926_vm0, %v1046_v55  ;;  %12279 = vst [vmem:[#allocation49_spill] sm:$0xff] %v9373_v39  ;;  %v9376_v55 = vsel %vm736_vm10, 1.0, %v12242_v30  ;;  %v9385_v20 = vmul.f32 0.03125, %v12282_v42  ;;  %v1049_v25 = vmul.f32 %v9373_v39, %v9010_v8 }
 0x1a2   : > { %12280 = vst [vmem:[#allocation50_spill] sm:$0xff] %v9376_v55  ;;  %vm737_vm11 = vcmp.eq.f32.partialorder %v12281_v29, %v8900_v18  ;;  %vm738_vm12 = vcmp.eq.f32.partialorder %v12283_v32, %v8900_v18  ;;  %v9398_v29 = vmul.f32 0.03125, %v12284_v49  ;;  %v1050_v12 = vmul.f32 %v9376_v55, %v9015_v10 }
 0x1a3   : > { %v12286_v32 = vfloor.f32 %v9347_v17  ;;  %v9413_v49 = vsel %vm738_vm12, 1.0, %v12242_v30  ;;  %v12289_v33 = vfloor.f32 %v9362_v61 }
 0x1a4   : > { %7427 = vmatmul.mubr.msk.f32.gmra.mrb[18].mxu1 %vm926_vm0, %v1047_v23  ;;  %12287 = vst [vmem:[#allocation52_spill] sm:$0xff] %v9413_v49  ;;  %v12288_v23 = vcvt.s32.f32 %v9356_v36 }
 0x1a5   : > { %7429 = vmatprep.mubr.msk.f32.mxu1 %vm926_vm0, %v1048_v2  ;;  %v9406_v2 = vsel %vm737_vm11, 1.0, %v12242_v30  ;;  %vm739_vm13 = vcmp.eq.f32.partialorder %v12286_v32, %v8900_v18  ;;  %vm740_vm14 = vcmp.eq.f32.partialorder %v12289_v33, %v8900_v18  ;;  %v12293_v33 = vfloor.f32 %v9385_v20 }
 0x1a6   : > { %12285 = vst [vmem:[#allocation51_spill] sm:$0xff] %v9406_v2  ;;  %v9418_v39 = vmul.f32 0.03125, %v12288_v23  ;;  %v1051_v42 = vmul.f32 %v9406_v2, %v9043_v31  ;;  %v1052_v23 = vmul.f32 %v9413_v49, %v8911_v26  ;;  %v9435_v55 = vsel %vm739_vm13, 1.0, %v12242_v30 }
 0x1a7   : > { %12291 = vst [vmem:[#allocation53_spill] sm:$0xff] %v9435_v55  ;;  %vm741_vm15 = vcmp.eq.f32.partialorder %v12293_v33, %v8900_v18  ;;  %v12294_v32 = vcvt.s32.f32 %v9389_v21  ;;  %v12295_v49 = vfloor.f32 %v9398_v29 }
 0x1a8   : > { %7430 = vmatmul.mubr.msk.f32.gmra.mrb[20].mxu1 %vm926_vm0, %v1049_v25  ;;  %v12290_v25 = vcvt.s32.f32 %v9366_v35  ;;  %v1053_v35 = vmul.f32 %v9435_v55, %v9010_v8 }
 0x1a9   : > { %7432 = vmatprep.mubr.msk.f32.mxu1 %vm926_vm0, %v1050_v12  ;;  %v9439_v12 = vsel %vm740_vm14, 1.0, %v12242_v30  ;;  %v9447_v2 = vmul.f32 0.03125, %v12294_v32  ;;  %vm742_vm1 = vcmp.eq.f32.partialorder %v12295_v49, %v8900_v18 }
 0x1aa   : > { %v9428_v3 = vmul.f32 0.03125, %v12290_v25  ;;  %12292 = vst [vmem:[#allocation54_spill] sm:$0xff] %v9439_v12  ;;  %v1054_v33 = vmul.f32 %v9439_v12, %v9015_v10  ;;  %v9459_v25 = vsel %vm741_vm15, 1.0, %v12242_v30  ;;  %v9463_v32 = vsel %vm742_vm1, 1.0, %v12242_v30 }
 0x1ab   : > { %12296 = vst [vmem:[#allocation55_spill] sm:$0xff] %v9459_v25  ;;  %12297 = vst [vmem:[#allocation56_spill] sm:$0xff] %v9463_v32  ;;  %v12076_v49 = vfloor.f32 %v9447_v2  ;;  %v1055_v12 = vmul.f32 %v9459_v25, %v9043_v31 }
 0x1ac   : > { %7433 = vmatmul.mubr.msk.f32.gmra.mrb[22].mxu1 %vm926_vm0, %v1051_v42  ;;  %v12075_v42 = vfloor.f32 %v9428_v3 }
 0x1ad   : > { %7435 = vmatprep.mubr.msk.f32.mxu1 %vm926_vm0, %v1052_v23  ;;  %v12298_v23 = vfloor.f32 %v9418_v39  ;;  %vm745_vm5 = vcmp.eq.f32.partialorder %v12076_v49, %v8900_v18 }
 0x1ae   : > { %vm744_vm4 = vcmp.eq.f32.partialorder %v12075_v42, %v8900_v18  ;;  %v9493_v42 = vsel %vm745_vm5, 1.0, %v12242_v30 }
 0x1af   : > { %vm743_vm3 = vcmp.eq.f32.partialorder %v12298_v23, %v8900_v18  ;;  %v9482_v23 = vsel %vm744_vm4, 1.0, %v12242_v30  ;;  %12301 = vst [vmem:[#allocation59_spill] sm:$0xff] %v9493_v42  ;;  %v12302_v18 = vfloor.f32 %v8950_v50 }
 0x1b0   : > { %7436 = vmatmul.mubr.msk.f32.gmra.mrb[24].mxu1 %vm926_vm0, %v1053_v35  ;;  %v1056_v35 = vmul.f32 %v9463_v32, %v8911_v26  ;;  %v9478_v55 = vsel %vm743_vm3, 1.0, %v12242_v30  ;;  %12300 = vst [vmem:[#allocation58_spill] sm:$0xff] %v9482_v23  ;;  %v1058_v26 = vmul.f32 %v9482_v23, %v9015_v10  ;;  %v12304_v30 = vfloor.f32 %v8970_v58 }
 0x1b1   : > { %7438 = vmatprep.mubr.msk.f32.mxu1 %vm926_vm0, %v1054_v33  ;;  %12299 = vst [vmem:[#allocation57_spill] sm:$0xff] %v9478_v55  ;;  %v1057_v33 = vmul.f32 %v9478_v55, %v9010_v8  ;;  %v12303_v8 = vfloor.f32 %v8896_v15  ;;  %v12309_v58 = vfloor.f32 %v8974_v59 }
 0x1b2   : > { %v523_v23 = vmul.f32 32.0, %v12304_v30 }
 0x1b3   : > { %v520_v49 = vmul.f32 32.0, %v12303_v8  ;;  %v524_v30 = vmul.f32 32.0, %v12309_v58 }
 0x1b4   : > { %7439 = vmatmul.mubr.msk.f32.gmra.mrb[26].mxu1 %vm926_vm0, %v1055_v12  ;;  %v1059_v12 = vmul.f32 %v9493_v42, %v9043_v31  ;;  %v396_v31 = vmul.f32 0.125, %v8893_v14  ;;  %v555_v50 = vsub.f32 %v8952_v51, %v523_v23  ;;  %v12313_v23 = vcvt.s32.f32 %v8945_v47 }
 0x1b5   : > { %7441 = vmatprep.mubr.msk.f32.mxu1 %vm926_vm0, %v1056_v35  ;;  %v521_v35 = vmul.f32 32.0, %v12302_v18  ;;  %v12308_v18 = vfloor.f32 %v8983_v63  ;;  %v12314_v63 = vcvt.s32.f32 %v8930_v37  ;;  %v12317_v37 = vfloor.f32 %v9034_v22 }
 0x1b6   : > { %v9524_v8 = vmul.f32 0.125, %v555_v50  ;;  %v12322_v22 = vfloor.f32 %v9057_v38  ;;  %v12327_v38 = vfloor.f32 %v9121_v46 }
 0x1b7   : > { %v553_v10 = vsub.f32 %v8932_v40, %v521_v35  ;;  %v525_v35 = vmul.f32 32.0, %v12308_v18 }
 0x1b8   : > { %7442 = vmatmul.mubr.msk.f32.gmra.mrb[28].mxu1 %vm926_vm0, %v1057_v33  ;;  %v552_v33 = vsub.f32 %v8891_v13, %v520_v49  ;;  %v9521_v49 = vfloor.f32 %v396_v31  ;;  %12311 = vst [vmem:[#allocation63_spill] sm:$0xff] %v9524_v8 }
 0x1b9   : > { %7444 = vmatprep.mubr.msk.f32.mxu1 %vm926_vm0, %v1058_v26  ;;  %v12305_v26 = vfloor.f32 %v8957_v52  ;;  %v9511_v42 = vmul.f32 0.125, %v553_v10  ;;  %v9531_v51 = vsub.f32 %v12313_v23, %v525_v35  ;;  %v12318_v23 = vfloor.f32 %v9002_v5 }
 0x1ba   : > { %12310 = vst [vmem:[#allocation62_spill] sm:$0xff] %v9521_v49  ;;  %v398_v59 = vmul.f32 8.0, %v9521_v49 }
 0x1bb   : > { %v522_v32 = vmul.f32 32.0, %v12305_v26  ;;  %12306 = vst [vmem:[#allocation60_spill] sm:$0xff] %v9511_v42  ;;  %v12090_v52 = vfloor.f32 %v9511_v42  ;;  %v9545_v47 = vmul.f32 0.125, %v9531_v51 }
 0x1bc   : > { %7445 = vmatmul.mubr.msk.f32.gmra.mrb[30].mxu1 %vm926_vm0, %v1059_v12  ;;  %v9514_v12 = vmul.f32 0.125, %v552_v33 }
 0x1bd   : > { %v554_v15 = vsub.f32 %v8941_v43, %v522_v32  ;;  %v9535_v32 = vsub.f32 %v12314_v63, %v524_v30  ;;  %v649_v31 = vmul.f32 8.0, %v12090_v52  ;;  %12315 = vst [vmem:[#allocation65_spill] sm:$0xff] %v9545_v47  ;;  %v527_v30 = vmul.f32 32.0, %v12317_v37 }
 0x1be   : > { %12307 = vst [vmem:[#allocation61_spill] sm:$0xff] %v9514_v12  ;;  %v12092_v26 = vfloor.f32 %v9514_v12  ;;  %v526_v63 = vmul.f32 32.0, %v12318_v23  ;;  %v12319_v52 = vfloor.f32 %v9079_v48  ;;  %v9557_v12 = vsub.f32 %v8893_v14, %v398_v59 }
 0x1bf   : > { %v9527_v40 = vmul.f32 0.125, %v554_v15  ;;  %v9548_v35 = vmul.f32 0.125, %v9535_v32  ;;  %v12320_v43 = vfloor.f32 %v9524_v8  ;;  %v529_v37 = vmul.f32 32.0, %v12322_v22 }
 0x1c0   : > { %v648_v58 = vmul.f32 8.0, %v12092_v26  ;;  %v531_v18 = vmul.f32 32.0, %v12319_v52  ;;  %v681_v26 = vsub.f32 %v553_v10, %v649_v31  ;;  %v12103_v5 = vfloor.f32 %v9545_v47 }
 0x1c1   : > { %12312 = vst [vmem:[#allocation64_spill] sm:$0xff] %v9527_v40  ;;  %12316 = vst [vmem:[#allocation66_spill] sm:$0xff] %v9548_v35  ;;  %v651_v42 = vmul.f32 8.0, %v12320_v43  ;;  %v12321_v13 = vfloor.f32 %v9527_v40  ;;  %v12104_v23 = vfloor.f32 %v9548_v35  ;;  %v12323_v48 = vcvt.s32.f32 %v8977_v60  ;;  %v8684_v35 = vld [vmem:[%s8878_s21 + $0x10] sm:$0xff] }
 0x1c2   : > { %v680_v49 = vsub.f32 %v552_v33, %v648_v58  ;;  %v12324_v14 = vcvt.s32.f32 %v8960_v53  ;;  %v12325_v43 = vfloor.f32 %v9022_v16  ;;  %v533_v31 = vmul.f32 32.0, %v12327_v38 }
 0x1c3   : > { %v650_v55 = vmul.f32 8.0, %v12321_v13  ;;  %v9569_v52 = vsub.f32 %v12323_v48, %v527_v30  ;;  %v12326_v13 = vcvt.s32.f32 %v9008_v7  ;;  %vm811_vm6 = vcmp.eq.f32.partialorder %v681_v26, %v9557_v12 }
 0x1c4   : > { %v9573_v10 = vsub.f32 %v12324_v14, %v526_v63  ;;  %v528_v33 = vmul.f32 32.0, %v12325_v43  ;;  %v683_v58 = vsub.f32 %v555_v50, %v651_v42  ;;  %vm9585_vm7 = vcmp.eq.f32.partialorder %v680_v49, %v9557_v12 }
 0x1c5   : > { %v9579_v59 = vsub.f32 %v12326_v13, %v531_v18  ;;  %v682_v53 = vsub.f32 %v554_v15, %v650_v55  ;;  %v12330_v30 = vcvt.s32.f32 %v8987_v1  ;;  %v12331_v7 = vfloor.f32 %v9075_v45 }
 0x1c6   : > { %v653_v46 = vmul.f32 8.0, %v12103_v5  ;;  %v652_v42 = vmul.f32 8.0, %v12104_v23  ;;  %v9600_v50 = vmul.f32 0.125, %v9569_v52  ;;  %v9603_v49 = vmul.f32 0.125, %v9573_v10 }
 0x1c7   : > { %v9591_v16 = vsub.f32 %v12330_v30, %v529_v37  ;;  %v530_v18 = vmul.f32 32.0, %v12331_v7  ;;  %v12334_v15 = vcvt.s32.f32 %v8964_v56  ;;  %v9612_v26 = vmul.f32 0.125, %v9579_v59 }
 0x1c8   : > { %12332 = vst [vmem:[#allocation67_spill] sm:$0xff] %v9600_v50  ;;  %12333 = vst [vmem:[#allocation68_spill] sm:$0xff] %v9603_v49  ;;  %v12336_v22 = vcvt.s32.f32 %v9048_v34  ;;  %vm9621_vm8 = vcmp.eq.f32.partialorder %v683_v58, %v9557_v12  ;;  %v12339_v43 = vfloor.f32 %v9169_v54  ;;  %vm812_vm9 = vcmp.eq.f32.partialorder %v682_v53, %v9557_v12 }
 0x1c9   : > { %v9609_v45 = vsub.f32 %v12334_v15, %v528_v33  ;;  %12335 = vst [vmem:[#allocation69_spill] sm:$0xff] %v9612_v26  ;;  %v9633_v34 = vmul.f32 0.125, %v9591_v16  ;;  %v12341_v13 = vcvt.s32.f32 %v9005_v6  ;;  %v685_v58 = vsub.f32 %v9531_v51, %v653_v46 }
 0x1ca   : > { %v9616_v37 = vsub.f32 %v12336_v22, %v533_v31  ;;  %v535_v56 = vmul.f32 32.0, %v12339_v43  ;;  %v684_v54 = vsub.f32 %v9535_v32, %v652_v42  ;;  %v12100_v30 = vfloor.f32 %v9600_v50 }
 0x1cb   : > { %12340 = vst [vmem:[#allocation70_spill] sm:$0xff] %v9633_v34  ;;  %v9637_v38 = vsub.f32 %v12341_v13, %v530_v18  ;;  %v12342_v60 = vfloor.f32 %v9094_v28  ;;  %v12102_v53 = vfloor.f32 %v9603_v49  ;;  %v12101_v6 = vfloor.f32 %v9612_v26 }
 0x1cc   : > { %v9650_v18 = vmul.f32 0.125, %v9616_v37  ;;  %v12345_v32 = vcvt.s32.f32 %v9097_v19  ;;  %v12346_v46 = vfloor.f32 %v9198_v24  ;;  %v12105_v43 = vfloor.f32 %v9633_v34 }
 0x1cd   : > { %v532_v7 = vmul.f32 32.0, %v12342_v60  ;;  %v9670_v13 = vmul.f32 0.125, %v9637_v38  ;;  %vm815_vm10 = vcmp.eq.f32.partialorder %v685_v58, %v9557_v12  ;;  %v655_v24 = vmul.f32 8.0, %v12100_v30 }
 0x1ce   : > { %12344 = vst [vmem:[#allocation72_spill] sm:$0xff] %v9650_v18  ;;  %v9658_v28 = vsub.f32 %v12345_v32, %v535_v56  ;;  %v537_v42 = vmul.f32 32.0, %v12346_v46  ;;  %v12348_v14 = vcvt.s32.f32 %v9013_v9  ;;  %v12106_v46 = vfloor.f32 %v9650_v18 }
 0x1cf   : > { %12347 = vst [vmem:[#allocation73_spill] sm:$0xff] %v9670_v13  ;;  %vm9699_vm11 = vcmp.eq.f32.partialorder %v684_v54, %v9557_v12  ;;  %v657_v30 = vmul.f32 8.0, %v12105_v43  ;;  %v12356_v54 = vfloor.f32 %v9276_v27 }
 0x1d0   : > { %v9677_v56 = vsub.f32 %v12348_v14, %v532_v7  ;;  %v9690_v9 = vmul.f32 0.125, %v9658_v28 }
 0x1d2   : > { %12350 = vst [vmem:[#allocation74_spill] sm:$0xff] %v9690_v9 }
 0x253   : > { %v7401_v63 = vpop.f32.mrb[0].mxu1 }
 0x254   : > { %v9605_v55 = vsel %vm811_vm6, %v7401_v63, -1e+30  ;;  %v1242_v1 = vpop.f32.mrb[1].mxu1 }
 0x255   : > { %v1436_v48 = vsel %vm926_vm0, %v9605_v55, -inf  ;;  %v9629_v33 = vsel %vm9585_vm7, %v1242_v1, -1e+30  ;;  %v9646_v1 = vmul.f32 0.125, %v9609_v45 }
 0x256   : > { %1437 = vmax.xlane.f32.xlu1 %v1436_v48  ;;  %v1433_v51 = vsel %vm926_vm0, %v9629_v33, -inf }
 0x257   : > { %v7404_v31 = vpop.f32.mrb[2].mxu1  ;;  %12343 = vst [vmem:[#allocation71_spill] sm:$0xff] %v9646_v1  ;;  %v12107_v32 = vfloor.f32 %v9646_v1 }
 0x258   : > { %v1252_v63 = vpop.f32.mrb[3].mxu1  ;;  %v9664_v22 = vsel %vm9621_vm8, %v7404_v31, -1e+30  ;;  %v12349_v31 = vfloor.f32 %v9232_v0  ;;  %v12351_v0 = vcvt.s32.f32 %v9124_v44  ;;  %v9708_v44 = vmul.f32 0.125, %v9677_v56 }
 0x259   : > { %v9652_v15 = vsel %vm812_vm9, %v1252_v63, -1e+30  ;;  %v1442_v58 = vsel %vm926_vm0, %v9664_v22, -inf  ;;  %v656_v43 = vmul.f32 8.0, %v12107_v32 }
 0x25a   : > { %1434 = vmax.xlane.f32.xlu1 %v1433_v51  ;;  %v1439_v48 = vsel %vm926_vm0, %v9652_v15, -inf  ;;  %v539_v60 = vmul.f32 32.0, %v12349_v31  ;;  %v654_v51 = vmul.f32 8.0, %v12102_v53  ;;  %v9694_v7 = vsub.f32 %v12351_v0, %v537_v42  ;;  %12354 = vst [vmem:[#allocation75_spill] sm:$0xff] %v9708_v44 }
 0x25b   : > { %1440 = vmax.xlane.f32.xlu0 %v1439_v48  ;;  %v7407_v19 = vpop.f32.mrb[4].mxu1  ;;  %v659_v48 = vmul.f32 8.0, %v12101_v6  ;;  %v687_v53 = vsub.f32 %v9569_v52, %v655_v24  ;;  %v12355_v42 = vcvt.s32.f32 %v9160_v57  ;;  %v541_v0 = vmul.f32 32.0, %v12356_v54 }
 0x25c   : > { %v1262_v63 = vpop.f32.mrb[5].mxu1  ;;  %v9696_v14 = vsel %vm815_vm10, %v7407_v19, -1e+30  ;;  %v661_v52 = vmul.f32 8.0, %v12106_v46  ;;  %v12108_v57 = vfloor.f32 %v9690_v9  ;;  %v12359_v54 = vfloor.f32 %v9152_v41 }
 0x25d   : > { %v9712_v19 = vsub.f32 %v12355_v42, %v539_v60  ;;  %v1448_v24 = vsel %vm926_vm0, %v9696_v14, -inf  ;;  %v691_v6 = vsub.f32 %v9579_v59, %v659_v48  ;;  %v9726_v60 = vmul.f32 0.125, %v9694_v7 }
 0x25e   : > { %1443 = vmax.xlane.f32.xlu1 %v1442_v58  ;;  %v686_v58 = vsub.f32 %v9573_v10, %v654_v51  ;;  %v9730_v27 = vsel %vm9699_vm11, %v1262_v63, -1e+30  ;;  %v689_v10 = vsub.f32 %v9591_v16, %v657_v30  ;;  %v12358_v51 = vfloor.f32 %v9670_v13 }
 0x25f   : > { %v7410_v5 = vpop.f32.mrb[6].mxu1  ;;  %12357 = vst [vmem:[#allocation76_spill] sm:$0xff] %v9726_v60  ;;  %v534_v46 = vmul.f32 32.0, %v12359_v54  ;;  %vm817_vm12 = vcmp.eq.f32.partialorder %v687_v53, %v9557_v12  ;;  %v12110_v48 = vfloor.f32 %v9708_v44  ;;  %v9740_v32 = vmul.f32 0.125, %v9712_v19  ;;  %v12389_v44 = vld [vmem:[#allocation38_spill] sm:$0xff] }
 0x260   : > { %v1272_v23 = vpop.f32.mrb[7].mxu1  ;;  %v658_v42 = vmul.f32 8.0, %v12358_v51  ;;  %v12361_v63 = vcvt.s32.f32 %v9209_v4  ;;  %vm9747_vm13 = vcmp.eq.f32.partialorder %v686_v58, %v9557_v12  ;;  %v688_v41 = vsub.f32 %v9609_v45, %v656_v43 }
 0x261   : > { %12360 = vst [vmem:[#allocation77_spill] sm:$0xff] %v9740_v32  ;;  %v693_v53 = vsub.f32 %v9616_v37, %v661_v52  ;;  %v1445_v54 = vsel %vm926_vm0, %v9730_v27, -inf  ;;  %vm821_vm14 = vcmp.eq.f32.partialorder %v691_v6, %v9557_v12  ;;  %v663_v4 = vmul.f32 8.0, %v12108_v57  ;;  %v12367_v37 = vld [vmem:[#allocation17_spill] sm:$0xff] }
 0x262   : > { %1449 = vmax.xlane.f32.xlu1 %v1448_v24  ;;  %v9744_v31 = vsub.f32 %v12361_v63, %v541_v0  ;;  %v12364_v24 = vfloor.f32 %v9318_v62  ;;  %v9763_v58 = vsel %vm817_vm12, %v7410_v5, -1e+30  ;;  %vm9766_vm15 = vcmp.eq.f32.partialorder %v689_v10, %v9557_v12 }
 0x263   : > { %v7413_v59 = vpop.f32.mrb[8].mxu1  ;;  %v690_v62 = vsub.f32 %v9637_v38, %v658_v42  ;;  %v12368_v43 = vcvt.s32.f32 %v12367_v37  ;;  %v660_v63 = vmul.f32 8.0, %v12110_v48  ;;  %vm9788_vm1 = vcmp.eq.f32.partialorder %v693_v53, %v9557_v12 }
 0x264   : > { %v9752_v30 = vpop.f32.mrb[9].mxu1  ;;  %v543_v51 = vmul.f32 32.0, %v12364_v24  ;;  %v12369_v24 = vld [vmem:[#allocation28_spill] sm:$0xff]  ;;  %v9781_v10 = vmul.f32 0.125, %v9744_v31  ;;  %v695_v48 = vsub.f32 %v9658_v28, %v663_v4  ;;  %v12377_v53 = vfloor.f32 %v9726_v60 }
 0x265   : > { %v9773_v52 = vsub.f32 %v12368_v43, %v534_v46  ;;  %v12370_v57 = vfloor.f32 %v12369_v24  ;;  %v12374_v46 = vld [vmem:[#allocation35_spill] sm:$0xff]  ;;  %v1454_v24 = vsel %vm926_vm0, %v9763_v58, -inf  ;;  %v9807_v18 = vsel %vm9747_vm13, %v1272_v23, -1e+30  ;;  %v12421_v4 = vld [vmem:[#allocation44_spill] sm:$0xff] }
 0x266   : > { %1446 = vmax.xlane.f32.xlu1 %v1445_v54  ;;  %12371 = vst [vmem:[#allocation17_spill] sm:$0xff] %v9781_v10  ;;  %v12375_v42 = vcvt.s32.f32 %v12374_v46  ;;  %v665_v0 = vmul.f32 8.0, %v12377_v53  ;;  %vm9810_vm3 = vcmp.eq.f32.partialorder %v688_v41, %v9557_v12  ;;  %v12381_v46 = vld [vmem:[#allocation29_spill] sm:$0xff]  ;;  %vm9820_vm4 = vcmp.eq.f32.partialorder %v690_v62, %v9557_v12  ;;  %v12385_v41 = vld [vmem:[#allocation20_spill] sm:$0xff] }
 0x267   : > { %v7416_v6 = vpop.f32.mrb[10].mxu1  ;;  %v536_v5 = vmul.f32 32.0, %v12370_v57  ;;  %v12376_v57 = vfloor.f32 %v9347_v17  ;;  %v9815_v17 = vmul.f32 0.125, %v9773_v52  ;;  %v692_v16 = vsub.f32 %v9677_v56, %v660_v63 }
 0x268   : > { %v9783_v9 = vsel %vm821_vm14, %v7416_v6, -1e+30  ;;  %v9785_v54 = vpop.f32.mrb[11].mxu1  ;;  %v9794_v37 = vsub.f32 %v12375_v42, %v543_v51  ;;  %v12382_v42 = vfloor.f32 %v12381_v46  ;;  %v12390_v56 = vcvt.s32.f32 %v12389_v44  ;;  %v12406_v44 = vld [vmem:[#allocation40_spill] sm:$0xff] }
 0x269   : > { %v545_v43 = vmul.f32 32.0, %v12376_v57  ;;  %v1466_v6 = vsel %vm926_vm0, %v9783_v9, -inf  ;;  %12380 = vst [vmem:[#allocation28_spill] sm:$0xff] %v9815_v17  ;;  %v12386_v57 = vcvt.s32.f32 %v12385_v41  ;;  %vm825_vm5 = vcmp.eq.f32.partialorder %v695_v48, %v9557_v12 }
 0x26a   : > { %1455 = vmax.xlane.f32.xlu1 %v1454_v24  ;;  %1467 = vmax.xlane.f32.xlu0 %v1466_v6  ;;  %v538_v28 = vmul.f32 32.0, %v12382_v42  ;;  %v12387_v24 = vfloor.f32 %v9740_v32  ;;  %v9839_v42 = vmul.f32 0.125, %v9794_v37  ;;  %vm9865_vm6 = vcmp.eq.f32.partialorder %v692_v16, %v9557_v12 }
 0x26b   : > { %v7419_v23 = vpop.f32.mrb[12].mxu1  ;;  %v9827_v53 = vsub.f32 %v12386_v57, %v536_v5  ;;  %v9843_v63 = vsub.f32 %v12390_v56, %v545_v43  ;;  %v12391_v5 = vfloor.f32 %v9385_v20  ;;  %v1451_v57 = vsel %vm926_vm0, %v9807_v18, -inf  ;;  %v12392_v20 = vld [vmem:[#allocation22_spill] sm:$0xff] }
 0x26c   : > { %v667_v6 = vmul.f32 8.0, %v12387_v24  ;;  %v9834_v46 = vsel %vm9788_vm1, %v7419_v23, -1e+30  ;;  %v9836_v62 = vpop.f32.mrb[13].mxu1  ;;  %12388 = vst [vmem:[#allocation35_spill] sm:$0xff] %v9839_v42  ;;  %v697_v23 = vsub.f32 %v9694_v7, %v665_v0  ;;  %v12393_v43 = vcvt.s32.f32 %v12392_v20 }
 0x26d   : > { %v547_v41 = vmul.f32 32.0, %v12391_v5  ;;  %v1472_v38 = vsel %vm926_vm0, %v9834_v46, -inf  ;;  %v9855_v24 = vsel %vm9766_vm15, %v7413_v59, -1e+30  ;;  %v12394_v5 = vld [vmem:[#allocation34_spill] sm:$0xff]  ;;  %v9870_v59 = vmul.f32 0.125, %v9827_v53 }
 0x26e   : > { %1452 = vmax.xlane.f32.xlu1 %v1451_v57  ;;  %1473 = vmax.xlane.f32.xlu0 %v1472_v38  ;;  %v9860_v56 = vsub.f32 %v12393_v43, %v538_v28  ;;  %v12395_v60 = vfloor.f32 %v12394_v5  ;;  %v699_v0 = vsub.f32 %v9712_v19, %v667_v6  ;;  %v12399_v45 = vfloor.f32 %v9781_v10 }
 0x26f   : > { %v7422_v7 = vpop.f32.mrb[14].mxu1  ;;  %12398 = vst [vmem:[#allocation29_spill] sm:$0xff] %v9870_v59  ;;  %v9881_v16 = vmul.f32 0.125, %v9843_v63  ;;  %v12401_v20 = vcvt.s32.f32 %v9321_v11  ;;  %v1460_v5 = vsel %vm926_vm0, %v9855_v24, -inf  ;;  %vm827_vm7 = vcmp.eq.f32.partialorder %v697_v23, %v9557_v12 }
 0x270   : > { %v540_v32 = vmul.f32 32.0, %v12395_v60  ;;  %v669_v57 = vmul.f32 8.0, %v12399_v45  ;;  %v9875_v38 = vsel %vm825_vm5, %v7422_v7, -1e+30  ;;  %v9877_v28 = vpop.f32.mrb[15].mxu1  ;;  %v12402_v6 = vfloor.f32 %v9418_v39 }
 0x271   : > { %12400 = vst [vmem:[#allocation20_spill] sm:$0xff] %v9881_v16  ;;  %v9885_v43 = vsub.f32 %v12401_v20, %v547_v41  ;;  %v1478_v19 = vsel %vm926_vm0, %v9875_v38, -inf  ;;  %v9897_v45 = vsel %vm9810_vm3, %v9752_v30, -1e+30  ;;  %v9900_v11 = vmul.f32 0.125, %v9860_v56  ;;  %v12404_v41 = vld [vmem:[#allocation26_spill] sm:$0xff] }
 0x272   : > { %v549_v7 = vmul.f32 32.0, %v12402_v6  ;;  %1461 = vmax.xlane.f32.xlu1 %v1460_v5  ;;  %1479 = vmax.xlane.f32.xlu0 %v1478_v19  ;;  %v12405_v20 = vcvt.s32.f32 %v12404_v41  ;;  %v12407_v10 = vfloor.f32 %v12406_v44  ;;  %v12408_v39 = vfloor.f32 %v9815_v17  ;;  %v12416_v17 = vld [vmem:[#allocation31_spill] sm:$0xff] }
 0x273   : > { %12403 = vst [vmem:[#allocation38_spill] sm:$0xff] %v9900_v11  ;;  %v7425_v26 = vpop.f32.mrb[16].mxu1  ;;  %vm9912_vm8 = vcmp.eq.f32.partialorder %v699_v0, %v9557_v12  ;;  %v701_v5 = vsub.f32 %v9744_v31, %v669_v57  ;;  %v12411_v44 = vfloor.f32 %v9839_v42  ;;  %v1457_v0 = vsel %vm926_vm0, %v9897_v45, -inf }
 0x274   : > { %v9904_v60 = vsub.f32 %v12405_v20, %v540_v32  ;;  %v542_v23 = vmul.f32 32.0, %v12407_v10  ;;  %v662_v6 = vmul.f32 8.0, %v12408_v39  ;;  %v9917_v19 = vsel %vm827_vm7, %v7425_v26, -1e+30  ;;  %v9919_v32 = vpop.f32.mrb[17].mxu1 }
 0x275   : > { %v671_v10 = vmul.f32 8.0, %v12411_v44  ;;  %v9925_v20 = vmul.f32 0.125, %v9885_v43  ;;  %v1484_v39 = vsel %vm926_vm0, %v9917_v19, -inf  ;;  %v12413_v31 = vcvt.s32.f32 %v9356_v36 }
 0x276   : > { %v12414_v57 = vfloor.f32 %v9447_v2  ;;  %v9940_v44 = vsel %vm9820_vm4, %v9785_v54, -1e+30  ;;  %1458 = vmax.xlane.f32.xlu1 %v1457_v0  ;;  %1485 = vmax.xlane.f32.xlu0 %v1484_v39  ;;  %v9944_v42 = vmul.f32 0.125, %v9904_v60  ;;  %v12417_v13 = vcvt.s32.f32 %v12416_v17 }
 0x277   : > { %12412 = vst [vmem:[#allocation22_spill] sm:$0xff] %v9925_v20  ;;  %v9933_v26 = vsub.f32 %v12413_v31, %v549_v7  ;;  %v694_v7 = vsub.f32 %v9773_v52, %v662_v6  ;;  %v12418_v2 = vfloor.f32 %v9870_v59  ;;  %vm9954_vm9 = vcmp.eq.f32.partialorder %v701_v5, %v9557_v12 }
 0x278   : > { %v551_v51 = vmul.f32 32.0, %v12414_v57  ;;  %12415 = vst [vmem:[#allocation34_spill] sm:$0xff] %v9944_v42  ;;  %v9948_v36 = vsub.f32 %v12417_v13, %v542_v23  ;;  %v7428_v57 = vpop.f32.mrb[18].mxu1  ;;  %v12422_v0 = vfloor.f32 %v12421_v4  ;;  %v703_v52 = vsub.f32 %v9794_v37, %v671_v10 }
 0x279   : > { %v664_v31 = vmul.f32 8.0, %v12418_v2  ;;  %v9962_v41 = vsel %vm9912_vm8, %v7428_v57, -1e+30  ;;  %v9964_v13 = vpop.f32.mrb[19].mxu1  ;;  %v12423_v17 = vfloor.f32 %v9881_v16  ;;  %v1463_v5 = vsel %vm926_vm0, %v9940_v44, -inf }
 0x27a   : > { %v544_v39 = vmul.f32 32.0, %v12422_v0  ;;  %v1490_v2 = vsel %vm926_vm0, %v9962_v41, -inf  ;;  %v9975_v4 = vmul.f32 0.125, %v9933_v26  ;;  %v12425_v30 = vcvt.s32.f32 %v9389_v21  ;;  %1464 = vmax.xlane.f32.xlu1 %v1463_v5 }
 0x27b   : > { %v673_v23 = vmul.f32 8.0, %v12423_v17  ;;  %v9984_v37 = vsel %vm9865_vm6, %v9836_v62, -1e+30  ;;  %v12426_v10 = vfloor.f32 %v9900_v11  ;;  %1491 = vmax.xlane.f32.xlu0 %v1490_v2  ;;  %v12123_v17 = vfloor.f32 %v9944_v42 }
 0x27c   : > { %12424 = vst [vmem:[#allocation26_spill] sm:$0xff] %v9975_v4  ;;  %v9979_v57 = vsub.f32 %v12425_v30, %v551_v51  ;;  %v9990_v6 = vmul.f32 0.125, %v9948_v36  ;;  %vm824_vm10 = vcmp.eq.f32.partialorder %v694_v7, %v9557_v12  ;;  %v696_v21 = vsub.f32 %v9827_v53, %v664_v31  ;;  %v7431_v51 = vpop.f32.mrb[20].mxu1  ;;  %v12428_v30 = vld [vmem:[#allocation36_spill] sm:$0xff] }
 0x27d   : > { %v666_v0 = vmul.f32 8.0, %v12426_v10  ;;  %v12429_v16 = vcvt.s32.f32 %v12428_v30  ;;  %v12430_v62 = vfloor.f32 %v9362_v61  ;;  %v10002_v5 = vsel %vm9954_vm9, %v7431_v51, -1e+30  ;;  %v1342_v2 = vpop.f32.mrb[21].mxu1 }
 0x27e   : > { %12427 = vst [vmem:[#allocation40_spill] sm:$0xff] %v9990_v6  ;;  %vm10005_vm11 = vcmp.eq.f32.partialorder %v703_v52, %v9557_v12  ;;  %v705_v53 = vsub.f32 %v9843_v63, %v673_v23  ;;  %v12433_v7 = vfloor.f32 %v9925_v20  ;;  %v1496_v61 = vsel %vm926_vm0, %v10002_v5, -inf }
 0x27f   : > { %v9996_v48 = vsub.f32 %v12429_v16, %v544_v39  ;;  %v546_v11 = vmul.f32 32.0, %v12430_v62  ;;  %v1469_v16 = vsel %vm926_vm0, %v9984_v37, -inf  ;;  %v10018_v39 = vmul.f32 0.125, %v9979_v57  ;;  %1497 = vmax.xlane.f32.xlu0 %v1496_v61  ;;  %v7434_v30 = vpop.f32.mrb[22].mxu1 }
 0x280   : > { %v675_v31 = vmul.f32 8.0, %v12433_v7  ;;  %v10021_v52 = vsel %vm824_vm10, %v9877_v28, -1e+30  ;;  %v698_v51 = vsub.f32 %v9860_v56, %v666_v0  ;;  %v668_v63 = vmul.f32 8.0, %v12123_v17  ;;  %1470 = vmax.xlane.f32.xlu1 %v1469_v16  ;;  %v12436_v7 = vld [vmem:[#allocation41_spill] sm:$0xff]  ;;  %v1352_v16 = vpop.f32.mrb[23].mxu1 }
 0x281   : > { %12434 = vst [vmem:[#allocation31_spill] sm:$0xff] %v10018_v39  ;;  %v12126_v23 = vfloor.f32 %v9990_v6  ;;  %vm826_vm12 = vcmp.eq.f32.partialorder %v696_v21, %v9557_v12  ;;  %v10029_v62 = vmul.f32 0.125, %v9996_v48  ;;  %v12437_v54 = vcvt.s32.f32 %v12436_v7 }
 0x282   : > { %v12438_v28 = vfloor.f32 %v9398_v29  ;;  %v10039_v0 = vsel %vm10005_vm11, %v7434_v30, -1e+30  ;;  %vm10042_vm13 = vcmp.eq.f32.partialorder %v705_v53, %v9557_v12  ;;  %v707_v21 = vsub.f32 %v9885_v43, %v675_v31 }
 0x283   : > { %12435 = vst [vmem:[#allocation44_spill] sm:$0xff] %v10029_v62  ;;  %v10033_v20 = vsub.f32 %v12437_v54, %v546_v11  ;;  %v1475_v7 = vsel %vm926_vm0, %v10021_v52, -inf  ;;  %v1502_v11 = vsel %vm926_vm0, %v10039_v0, -inf  ;;  %v12441_v29 = vfloor.f32 %v9975_v4 }
 0x284   : > { %v548_v56 = vmul.f32 32.0, %v12438_v28  ;;  %v10055_v30 = vsel %vm826_vm12, %v9919_v32, -1e+30  ;;  %vm10058_vm14 = vcmp.eq.f32.partialorder %v698_v51, %v9557_v12  ;;  %v700_v43 = vsub.f32 %v9904_v60, %v668_v63  ;;  %1476 = vmax.xlane.f32.xlu1 %v1475_v7  ;;  %1503 = vmax.xlane.f32.xlu0 %v1502_v11  ;;  %v7437_v28 = vpop.f32.mrb[24].mxu1  ;;  %v12445_v32 = vld [vmem:[#allocation45_spill] sm:$0xff] }
 0x285   : > { %v677_v54 = vmul.f32 8.0, %v12441_v29  ;;  %v670_v31 = vmul.f32 8.0, %v12126_v23  ;;  %v12127_v29 = vfloor.f32 %v10029_v62  ;;  %v10067_v17 = vmul.f32 0.125, %v10033_v20  ;;  %v1362_v63 = vpop.f32.mrb[25].mxu1 }
 0x286   : > { %v12446_v10 = vcvt.s32.f32 %v12445_v32  ;;  %v12447_v51 = vfloor.f32 %v9428_v3  ;;  %v10075_v60 = vsel %vm10042_vm13, %v7437_v28, -1e+30  ;;  %vm837_vm15 = vcmp.eq.f32.partialorder %v707_v21, %v9557_v12  ;;  %v12450_v32 = vld [vmem:[#allocation48_spill] sm:$0xff] }
 0x287   : > { %12444 = vst [vmem:[#allocation36_spill] sm:$0xff] %v10067_v17  ;;  %v1481_v7 = vsel %vm926_vm0, %v10055_v30, -inf  ;;  %v1508_v11 = vsel %vm926_vm0, %v10075_v60, -inf  ;;  %v709_v23 = vsub.f32 %v9933_v26, %v677_v54  ;;  %v10088_v3 = vsel %vm10058_vm14, %v9964_v13, -1e+30  ;;  %v7440_v28 = vpop.f32.mrb[26].mxu1 }
 0x288   : > { %v580_v4 = vsub.f32 %v12446_v10, %v548_v56  ;;  %v550_v42 = vmul.f32 32.0, %v12447_v51  ;;  %v12448_v56 = vfloor.f32 %v10018_v39  ;;  %vm830_vm1 = vcmp.eq.f32.partialorder %v700_v43, %v9557_v12  ;;  %1482 = vmax.xlane.f32.xlu1 %v1481_v7  ;;  %1509 = vmax.xlane.f32.xlu0 %v1508_v11  ;;  %v1372_v13 = vpop.f32.mrb[27].mxu1 }
 0x289   : > { %v702_v61 = vsub.f32 %v9948_v36, %v670_v31  ;;  %v672_v21 = vmul.f32 8.0, %v12127_v29  ;;  %v12130_v26 = vfloor.f32 %v10067_v17  ;;  %v12451_v51 = vcvt.s32.f32 %v12450_v32 }
 0x28a   : > { %v679_v10 = vmul.f32 8.0, %v12448_v56  ;;  %v10095_v54 = vmul.f32 0.125, %v580_v4  ;;  %v10099_v53 = vsel %vm837_vm15, %v7440_v28, -1e+30  ;;  %v1487_v43 = vsel %vm926_vm0, %v10088_v3, -inf }
 0x28b   : > { %v582_v56 = vsub.f32 %v12451_v51, %v550_v42  ;;  %v1514_v36 = vsel %vm926_vm0, %v10099_v53, -inf  ;;  %vm839_vm3 = vcmp.eq.f32.partialorder %v709_v23, %v9557_v12  ;;  %v10107_v7 = vsel %vm830_vm1, %v1342_v2, -1e+30  ;;  %v7443_v28 = vpop.f32.mrb[28].mxu1 }
 0x28c   : > { %12449 = vst [vmem:[#allocation41_spill] sm:$0xff] %v10095_v54  ;;  %v711_v31 = vsub.f32 %v9979_v57, %v679_v10  ;;  %vm832_vm4 = vcmp.eq.f32.partialorder %v702_v61, %v9557_v12  ;;  %1488 = vmax.xlane.f32.xlu1 %v1487_v43  ;;  %1515 = vmax.xlane.f32.xlu0 %v1514_v36  ;;  %v674_v11 = vmul.f32 8.0, %v12130_v26  ;;  %v12129_v32 = vfloor.f32 %v10095_v54  ;;  %v1382_v23 = vpop.f32.mrb[29].mxu1 }
 0x28d   : > { %v704_v42 = vsub.f32 %v9996_v48, %v672_v21  ;;  %v10114_v51 = vmul.f32 0.125, %v582_v56  ;;  %v10116_v29 = vsel %vm839_vm3, %v7443_v28, -1e+30  ;;  %v1493_v57 = vsel %vm926_vm0, %v10107_v7, -inf }
 0x28e   : > { %v1520_v2 = vsel %vm926_vm0, %v10116_v29, -inf  ;;  %vm841_vm5 = vcmp.eq.f32.partialorder %v711_v31, %v9557_v12  ;;  %v10123_v48 = vsel %vm832_vm4, %v1352_v16, -1e+30  ;;  %v706_v10 = vsub.f32 %v10033_v20, %v674_v11 }
 0x28f   : > { %12452 = vst [vmem:[#allocation45_spill] sm:$0xff] %v10114_v51  ;;  %vm834_vm6 = vcmp.eq.f32.partialorder %v704_v42, %v9557_v12  ;;  %v676_v61 = vmul.f32 8.0, %v12129_v32  ;;  %v7446_v21 = vpop.f32.mrb[30].mxu1  ;;  %v12128_v43 = vfloor.f32 %v10114_v51  ;;  %v1499_v31 = vsel %vm926_vm0, %v10123_v48, -inf }
 0x290   : > { %1494 = vmax.xlane.f32.xlu1 %v1493_v57  ;;  %1521 = vmax.xlane.f32.xlu0 %v1520_v2  ;;  %v10130_v36 = vsel %vm841_vm5, %v7446_v21, -1e+30  ;;  %v1392_v28 = vpop.f32.mrb[31].mxu1  ;;  %v10136_v57 = vsel %vm834_vm6, %v1362_v63, -1e+30  ;;  %vm836_vm7 = vcmp.eq.f32.partialorder %v706_v10, %v9557_v12 }
 0x291   : > { %v1526_v16 = vsel %vm926_vm0, %v10130_v36, -inf  ;;  %v708_v20 = vsub.f32 %v580_v4, %v676_v61  ;;  %v678_v42 = vmul.f32 8.0, %v12128_v43  ;;  %v1505_v11 = vsel %vm926_vm0, %v10136_v57, -inf }
 0x292   : > { %v10143_v2 = vsel %vm836_vm7, %v1372_v13, -1e+30 }
 0x293   : > { %vm838_vm8 = vcmp.eq.f32.partialorder %v708_v20, %v9557_v12  ;;  %v710_v21 = vsub.f32 %v582_v56, %v678_v42  ;;  %v1511_v63 = vsel %vm926_vm0, %v10143_v2, -inf  ;;  %v12453_v56 = vld [vmem:[#allocation7_spill] sm:$0xff] }
 0x294   : > { %1500 = vmax.xlane.f32.xlu1 %v1499_v31  ;;  %1527 = vmax.xlane.f32.xlu0 %v1526_v16  ;;  %v10148_v31 = vsel %vm838_vm8, %v1382_v23, -1e+30 }
 0x295   : > { %vm840_vm9 = vcmp.eq.f32.partialorder %v710_v21, %v9557_v12  ;;  %v1517_v4 = vsel %vm926_vm0, %v10148_v31, -inf }
 0x296   : > { %v10153_v10 = vsel %vm840_vm9, %v1392_v28, -1e+30 }
 0x297   : > { %v1523_v13 = vsel %vm926_vm0, %v10153_v10, -inf }
 0x298   : > { %1506 = vmax.xlane.f32.xlu1 %v1505_v11 }
 0x29c   : > { %1512 = vmax.xlane.f32.xlu1 %v1511_v63 }
 0x2a0   : > { %1518 = vmax.xlane.f32.xlu1 %v1517_v4 }
 0x2a4   : > { %1524 = vmax.xlane.f32.xlu1 %v1523_v13 }
 0x2b5   : > { %8234 = vrot.lane.b32.xlu1 %v12453_v56, %s12132_s25 }
 0x2e3   : > { %v1438_v61 = vpop.xlane.xlu1 %1437 }
 0x2e4   : > { %v1530_v23 = vsub.f32 %v9605_v55, %v1438_v61 }
 0x2e6   : > { %v1563_v16 = vmul.f32 1.442695, %v1530_v23 }
 0x2e7   : > { %v1435_v20 = vpop.xlane.xlu1 %1434 }
 0x2e8   : > { %8273 = vpow2.f32 %v1563_v16  ;;  %v1529_v42 = vsub.f32 %v9629_v33, %v1435_v20  ;;  %v1441_v11 = vpop.xlane.xlu0 %1440 }
 0x2e9   : > { %v1531_v28 = vsub.f32 %v9652_v15, %v1441_v11 }
 0x2ea   : > { %v1561_v21 = vmul.f32 1.442695, %v1529_v42 }
 0x2eb   : > { %v1565_v63 = vmul.f32 1.442695, %v1531_v28  ;;  %v1444_v4 = vpop.xlane.xlu1 %1443 }
 0x2ec   : > { %8275 = vpow2.f32 %v1561_v21  ;;  %v1532_v13 = vsub.f32 %v9664_v22, %v1444_v4 }
 0x2ed   : > { %8277 = vpow2.f32 %v1565_v63 }
 0x2ee   : > { %v1567_v43 = vmul.f32 1.442695, %v1532_v13 }
 0x2ef   : > { %v1450_v56 = vpop.xlane.xlu1 %1449 }
 0x2f0   : > { %8279 = vpow2.f32 %v1567_v43  ;;  %v1534_v55 = vsub.f32 %v9696_v14, %v1450_v56 }
 0x2f2   : > { %v10164_v61 = vpop.eup %8273  ;;  %v1571_v23 = vmul.f32 1.442695, %v1534_v55 }
 0x2f3   : > { %v1447_v16 = vpop.xlane.xlu1 %1446  ;;  %v1628_v33 = vsel %vm926_vm0, %v10164_v61, 0.0 }
 0x2f4   : > { %8281 = vpow2.f32 %v1571_v23  ;;  %v1533_v15 = vsub.f32 %v9730_v27, %v1447_v16  ;;  %1629 = vadd.xlane.f32.xlu0 %v1628_v33 }
 0x2f6   : > { %v10169_v20 = vpop.eup %8275  ;;  %v1569_v22 = vmul.f32 1.442695, %v1533_v15 }
 0x2f7   : > { %v1456_v42 = vpop.xlane.xlu1 %1455  ;;  %v1625_v43 = vsel %vm926_vm0, %v10169_v20, 0.0  ;;  %v10173_v11 = vpop.eup %8277 }
 0x2f8   : > { %8283 = vpow2.f32 %v1569_v22  ;;  %v1536_v14 = vsub.f32 %v9763_v58, %v1456_v42  ;;  %1626 = vadd.xlane.f32.xlu1 %v1625_v43  ;;  %v1468_v63 = vpop.xlane.xlu0 %1467  ;;  %v1631_v13 = vsel %vm926_vm0, %v10173_v11, 0.0 }
 0x2f9   : > { %v1540_v58 = vsub.f32 %v9783_v9, %v1468_v63 }
 0x2fa   : > { %v10176_v28 = vpop.eup %8279  ;;  %v1575_v21 = vmul.f32 1.442695, %v1536_v14 }
 0x2fb   : > { %v1453_v4 = vpop.xlane.xlu1 %1452  ;;  %v1634_v27 = vsel %vm926_vm0, %v10176_v28, 0.0 }
 0x2fc   : > { %8285 = vpow2.f32 %v1575_v21  ;;  %v1535_v56 = vsub.f32 %v9807_v18, %v1453_v4  ;;  %1635 = vadd.xlane.f32.xlu0 %v1634_v27  ;;  %1632 = vadd.xlane.f32.xlu1 %v1631_v13  ;;  %v10189_v22 = vpop.xlane.xlu0 %1473  ;;  %v1583_v18 = vmul.f32 1.442695, %v1540_v58 }
 0x2fe   : > { %v10183_v55 = vpop.eup %8281  ;;  %v1573_v23 = vmul.f32 1.442695, %v1535_v56 }
 0x2ff   : > { %v1462_v16 = vpop.xlane.xlu1 %1461  ;;  %v1640_v33 = vsel %vm926_vm0, %v10183_v55, 0.0 }
 0x300   : > { %8287 = vpow2.f32 %v1573_v23  ;;  %v1538_v15 = vsub.f32 %v9855_v24, %v1462_v16  ;;  %1641 = vadd.xlane.f32.xlu0 %v1640_v33  ;;  %v1480_v24 = vpop.xlane.xlu0 %1479 }
 0x301   : > { %v1544_v23 = vsub.f32 %v9875_v38, %v1480_v24 }
 0x302   : > { %v10191_v42 = vpop.eup %8283  ;;  %v1579_v43 = vmul.f32 1.442695, %v1538_v15 }
 0x303   : > { %v1459_v14 = vpop.xlane.xlu1 %1458  ;;  %v1637_v21 = vsel %vm926_vm0, %v10191_v42, 0.0 }
 0x304   : > { %8289 = vpow2.f32 %v1579_v43  ;;  %v1537_v9 = vsub.f32 %v9897_v45, %v1459_v14  ;;  %1638 = vadd.xlane.f32.xlu1 %v1637_v21  ;;  %v1591_v43 = vmul.f32 1.442695, %v1544_v23 }
 0x305   : > { %8291 = vpow2.f32 %v1583_v18 }
 0x306   : > { %v10196_v63 = vpop.eup %8285  ;;  %v1577_v4 = vmul.f32 1.442695, %v1537_v9 }
 0x307   : > { %v1465_v27 = vpop.xlane.xlu1 %1464  ;;  %v1646_v13 = vsel %vm926_vm0, %v10196_v63, 0.0 }
 0x308   : > { %8293 = vpow2.f32 %v1577_v4  ;;  %v1539_v56 = vsub.f32 %v9940_v44, %v1465_v27  ;;  %1647 = vadd.xlane.f32.xlu0 %v1646_v13 }
 0x30a   : > { %v10201_v58 = vpop.eup %8287  ;;  %v1581_v16 = vmul.f32 1.442695, %v1539_v56 }
 0x30b   : > { %v1643_v33 = vsel %vm926_vm0, %v10201_v58, 0.0 }
 0x30c   : > { %8295 = vpow2.f32 %v1581_v16  ;;  %1644 = vadd.xlane.f32.xlu1 %v1643_v33 }
 0x30d   : > { %v1471_v45 = vpop.xlane.xlu1 %1470 }
 0x30e   : > { %v1541_v15 = vsub.f32 %v9984_v37, %v1471_v45  ;;  %v10207_v18 = vpop.eup %8289 }
 0x30f   : > { %v1652_v44 = vsel %vm926_vm0, %v10207_v18, 0.0  ;;  %v10211_v9 = vpop.eup %8291 }
 0x310   : > { %v1585_v14 = vmul.f32 1.442695, %v1541_v15  ;;  %1653 = vadd.xlane.f32.xlu0 %v1652_v44  ;;  %v1658_v27 = vsel %vm926_vm0, %v10211_v9, 0.0 }
 0x311   : > { %v1477_v21 = vpop.xlane.xlu1 %1476 }
 0x312   : > { %8297 = vpow2.f32 %v1585_v14  ;;  %v1543_v38 = vsub.f32 %v10021_v52, %v1477_v21  ;;  %v10214_v4 = vpop.eup %8293 }
 0x313   : > { %8299 = vpow2.f32 %v1591_v43  ;;  %v1649_v13 = vsel %vm926_vm0, %v10214_v4, 0.0 }
 0x314   : > { %v1589_v24 = vmul.f32 1.442695, %v1543_v38  ;;  %1659 = vadd.xlane.f32.xlu0 %v1658_v27  ;;  %1650 = vadd.xlane.f32.xlu1 %v1649_v13 }
 0x315   : > { %v1483_v37 = vpop.xlane.xlu1 %1482 }
 0x316   : > { %v1545_v56 = vsub.f32 %v10055_v30, %v1483_v37  ;;  %v10221_v23 = vpop.eup %8295  ;;  %8301 = vpow2.f32 %v1589_v24 }
 0x317   : > { %v1655_v45 = vsel %vm926_vm0, %v10221_v23, 0.0 }
 0x318   : > { %v1593_v52 = vmul.f32 1.442695, %v1545_v56  ;;  %1656 = vadd.xlane.f32.xlu0 %v1655_v45 }
 0x319   : > { %v1489_v16 = vpop.xlane.xlu1 %1488 }
 0x31a   : > { %v1547_v33 = vsub.f32 %v10088_v3, %v1489_v16  ;;  %8303 = vpow2.f32 %v1593_v52 }
 0x31c   : > { %v10226_v15 = vpop.eup %8297  ;;  %v1597_v43 = vmul.f32 1.442695, %v1547_v33 }
 0x31d   : > { %v1495_v14 = vpop.xlane.xlu1 %1494  ;;  %v1661_v30 = vsel %vm926_vm0, %v10226_v15, 0.0  ;;  %v10230_v21 = vpop.eup %8299 }
 0x31e   : > { %v1549_v44 = vsub.f32 %v10107_v7, %v1495_v14  ;;  %1662 = vadd.xlane.f32.xlu1 %v1661_v30  ;;  %8305 = vpow2.f32 %v1597_v43  ;;  %v1670_v3 = vsel %vm926_vm0, %v10230_v21, 0.0  ;;  %v1486_v30 = vpop.xlane.xlu0 %1485 }
 0x320   : > { %v1601_v38 = vmul.f32 1.442695, %v1549_v44  ;;  %v10235_v37 = vpop.eup %8301 }
 0x321   : > { %v1501_v24 = vpop.xlane.xlu1 %1500  ;;  %v1667_v52 = vsel %vm926_vm0, %v10235_v37, 0.0 }
 0x322   : > { %v1551_v27 = vsub.f32 %v10123_v48, %v1501_v24  ;;  %1671 = vadd.xlane.f32.xlu1 %v1670_v3  ;;  %8307 = vpow2.f32 %v1601_v38 }
 0x324   : > { %v1605_v13 = vmul.f32 1.442695, %v1551_v27  ;;  %v10240_v16 = vpop.eup %8303 }
 0x325   : > { %v1507_v56 = vpop.xlane.xlu1 %1506  ;;  %v1673_v43 = vsel %vm926_vm0, %v10240_v16, 0.0 }
 0x326   : > { %v1553_v7 = vsub.f32 %v10136_v57, %v1507_v56  ;;  %1668 = vadd.xlane.f32.xlu1 %v1667_v52  ;;  %8309 = vpow2.f32 %v1605_v13  ;;  %v12454_v13 = vld [vmem:[#allocation8_spill] sm:$0xff] }
 0x328   : > { %v1609_v45 = vmul.f32 1.442695, %v1553_v7  ;;  %v10245_v14 = vpop.eup %8305  ;;  %v1492_v7 = vpop.xlane.xlu0 %1491 }
 0x329   : > { %v1513_v33 = vpop.xlane.xlu1 %1512  ;;  %v1679_v24 = vsel %vm926_vm0, %v10245_v14, 0.0 }
 0x32a   : > { %v1555_v48 = vsub.f32 %v10143_v2, %v1513_v33  ;;  %1674 = vadd.xlane.f32.xlu1 %v1673_v43  ;;  %8311 = vpow2.f32 %v1609_v45 }
 0x32c   : > { %v1613_v44 = vmul.f32 1.442695, %v1555_v48  ;;  %v10250_v57 = vpop.eup %8307 }
 0x32d   : > { %v1519_v38 = vpop.xlane.xlu1 %1518  ;;  %v1685_v2 = vsel %vm926_vm0, %v10250_v57, 0.0 }
 0x32e   : > { %v1557_v3 = vsub.f32 %v10148_v31, %v1519_v38  ;;  %1680 = vadd.xlane.f32.xlu1 %v1679_v24  ;;  %8313 = vpow2.f32 %v1613_v44  ;;  %8239 = vrot.lane.b32.xlu0 %v12454_v13, %s12132_s25  ;;  %v1498_v24 = vpop.xlane.xlu0 %1497  ;;  %v1542_v13 = vsub.f32 %v9834_v46, %v10189_v22  ;;  %v1548_v22 = vsub.f32 %v9962_v41, %v1492_v7  ;;  %s12501_s25 = smov 64  }
 0x330   : > { %v1617_v27 = vmul.f32 1.442695, %v1557_v3  ;;  %v10257_v52 = vpop.eup %8309 }
 0x331   : > { %v1525_v56 = vpop.xlane.xlu1 %1524  ;;  %v1691_v31 = vsel %vm926_vm0, %v10257_v52, 0.0 }
 0x332   : > { %v1559_v45 = vsub.f32 %v10153_v10, %v1525_v56  ;;  %1686 = vadd.xlane.f32.xlu1 %v1685_v2  ;;  %8315 = vpow2.f32 %v1617_v27  ;;  %v1587_v56 = vmul.f32 1.442695, %v1542_v13  ;;  %v1546_v2 = vsub.f32 %v9917_v19, %v1486_v30 }
 0x333   : > { %v1599_v19 = vmul.f32 1.442695, %v1548_v22  ;;  %v1550_v30 = vsub.f32 %v10002_v5, %v1498_v24 }
 0x334   : > { %v1621_v33 = vmul.f32 1.442695, %v1559_v45  ;;  %v10262_v48 = vpop.eup %8311  ;;  %v1595_v46 = vmul.f32 1.442695, %v1546_v2 }
 0x335   : > { %v8235_v43 = vpop.permute.xlu1 %8234  ;;  %v1697_v10 = vsel %vm926_vm0, %v10262_v48, 0.0  ;;  %v1603_v13 = vmul.f32 1.442695, %v1550_v30 }
 0x336   : > { %v8237_v44 = vunpack.i.h.bf16 %v8235_v43  ;;  %v8236_v38 = vunpack.i.l.bf16 %v8235_v43  ;;  %1692 = vadd.xlane.f32.xlu1 %v1691_v31  ;;  %8317 = vpow2.f32 %v1621_v33  ;;  %v1504_v33 = vpop.xlane.xlu0 %1503 }
 0x337   : > { %8319 = vpow2.f32 %v1587_v56 }
 0x338   : > { %v7998_v3 = vpack.c.bf16 %v8237_v44, %v8236_v38  ;;  %v10268_v27 = vpop.eup %8313  ;;  %8321 = vpow2.f32 %v1595_v46 }
 0x339   : > { %v1703_v45 = vsel %vm926_vm0, %v10268_v27, 0.0  ;;  %8323 = vpow2.f32 %v1599_v19 }
 0x33a   : > { %1698 = vadd.xlane.f32.xlu1 %v1697_v10  ;;  %7999 = vmatprep.subr.bf16.mxu0 %v7998_v3  ;;  %v1510_v38 = vpop.xlane.xlu0 %1509  ;;  %v1552_v10 = vsub.f32 %v10039_v0, %v1504_v33  ;;  %8325 = vpow2.f32 %v1603_v13 }
 0x33b   : > { %8001 = vmatpush3.bf16.msra.mxu0 %v7998_v3  ;;  %v1554_v2 = vsub.f32 %v10075_v60, %v1510_v38 }
 0x33c   : > { %v10273_v43 = vpop.eup %8315  ;;  %v1607_v56 = vmul.f32 1.442695, %v1552_v10 }
 0x33d   : > { %v1709_v31 = vsel %vm926_vm0, %v10273_v43, 0.0  ;;  %v1611_v24 = vmul.f32 1.442695, %v1554_v2 }
 0x33e   : > { %1704 = vadd.xlane.f32.xlu1 %v1703_v45  ;;  %v1516_v41 = vpop.xlane.xlu0 %1515  ;;  %8327 = vpow2.f32 %v1607_v56 }
 0x33f   : > { %v1556_v22 = vsub.f32 %v10099_v53, %v1516_v41  ;;  %8329 = vpow2.f32 %v1611_v24 }
 0x340   : > { %v10278_v44 = vpop.eup %8317 }
 0x341   : > { %v1715_v3 = vsel %vm926_vm0, %v10278_v44, 0.0  ;;  %v10284_v7 = vpop.eup %8319 }
 0x342   : > { %1710 = vadd.xlane.f32.xlu1 %v1709_v31  ;;  %v1664_v45 = vsel %vm926_vm0, %v10284_v7, 0.0  ;;  %v10289_v46 = vpop.eup %8321  ;;  %v1522_v5 = vpop.xlane.xlu0 %1521  ;;  %v1615_v31 = vmul.f32 1.442695, %v1556_v22 }
 0x343   : > { %v1676_v0 = vsel %vm926_vm0, %v10289_v46, 0.0  ;;  %v10294_v33 = vpop.eup %8323  ;;  %v1558_v60 = vsub.f32 %v10116_v29, %v1522_v5 }
 0x344   : > { %v1682_v19 = vsel %vm926_vm0, %v10294_v33, 0.0  ;;  %v10299_v30 = vpop.eup %8325  ;;  %8331 = vpow2.f32 %v1615_v31 }
 0x345   : > { %v1688_v13 = vsel %vm926_vm0, %v10299_v30, 0.0 }
 0x346   : > { %1716 = vadd.xlane.f32.xlu1 %v1715_v3  ;;  %v1528_v38 = vpop.xlane.xlu0 %1527  ;;  %v1619_v3 = vmul.f32 1.442695, %v1558_v60 }
 0x347   : > { %v1560_v53 = vsub.f32 %v10130_v36, %v1528_v38 }
 0x348   : > { %v10304_v10 = vpop.eup %8327  ;;  %8333 = vpow2.f32 %v1619_v3 }
 0x349   : > { %v1623_v41 = vmul.f32 1.442695, %v1560_v53  ;;  %v1694_v29 = vsel %vm926_vm0, %v10304_v10, 0.0  ;;  %v10308_v56 = vpop.eup %8329 }
 0x34a   : > { %v1700_v2 = vsel %vm926_vm0, %v10308_v56, 0.0 }
 0x34b   : > { %8335 = vpow2.f32 %v1623_v41 }
 0x34d   : > { %1665 = vadd.xlane.f32.xlu0 %v1664_v45 }
 0x34e   : > { %v10312_v45 = vpop.eup %8331 }
 0x34f   : > { %v1706_v36 = vsel %vm926_vm0, %v10312_v45, 0.0 }
 0x351   : > { %1677 = vadd.xlane.f32.xlu0 %v1676_v0 }
 0x352   : > { %v10316_v5 = vpop.eup %8333 }
 0x353   : > { %v1712_v24 = vsel %vm926_vm0, %v10316_v5, 0.0 }
 0x355   : > { %1683 = vadd.xlane.f32.xlu0 %v1682_v19  ;;  %v10320_v22 = vpop.eup %8335 }
 0x356   : > { %v1718_v0 = vsel %vm926_vm0, %v10320_v22, 0.0 }
 0x359   : > { %1689 = vadd.xlane.f32.xlu0 %v1688_v13 }
 0x35d   : > { %1695 = vadd.xlane.f32.xlu0 %v1694_v29 }
 0x361   : > { %1701 = vadd.xlane.f32.xlu0 %v1700_v2 }
 0x365   : > { %1707 = vadd.xlane.f32.xlu0 %v1706_v36 }
 0x369   : > { %1713 = vadd.xlane.f32.xlu0 %v1712_v24 }
 0x36d   : > { %1719 = vadd.xlane.f32.xlu0 %v1718_v0 }
 0x381   : > { %v1630_v60 = vpop.xlane.xlu0 %1629 }
 0x385   : > { %v1627_v31 = vpop.xlane.xlu1 %1626 }
 0x386   : > { %8337 = vrcp.f32 %v1627_v31 }
 0x387   : > { %8339 = vrcp.f32 %v1630_v60 }
 0x389   : > { %v1636_v38 = vpop.xlane.xlu0 %1635  ;;  %v1633_v29 = vpop.xlane.xlu1 %1632 }
 0x38a   : > { %8341 = vrcp.f32 %v1633_v29 }
 0x38b   : > { %8343 = vrcp.f32 %v1636_v38 }
 0x38d   : > { %v1642_v53 = vpop.xlane.xlu0 %1641 }
 0x390   : > { %v8338_v19 = vpop.eup %8337 }
 0x391   : > { %v1722_v3 = vmul.f32 %v8338_v19, %v10169_v20  ;;  %v1639_v36 = vpop.xlane.xlu1 %1638  ;;  %v8340_v19 = vpop.eup %8339 }
 0x392   : > { %8345 = vrcp.f32 %v1639_v36  ;;  %v1724_v60 = vmul.f32 %v8340_v19, %v10164_v61 }
 0x393   : > { %7455 = vmatprep.mubr.msk.f32.mxu0 %vm926_vm0, %v1722_v3  ;;  %8347 = vrcp.f32 %v1642_v53 }
 0x394   : > { %v8342_v39 = vpop.eup %8341 }
 0x395   : > { %v1648_v13 = vpop.xlane.xlu0 %1647  ;;  %v8344_v29 = vpop.eup %8343  ;;  %v1726_v38 = vmul.f32 %v8342_v39, %v10173_v11 }
 0x399   : > { %v1645_v0 = vpop.xlane.xlu1 %1644 }
 0x39a   : > { %8349 = vrcp.f32 %v1645_v0 }
 0x39b   : > { %8351 = vrcp.f32 %v1648_v13 }
 0x39c   : > { %v8346_v36 = vpop.eup %8345 }
 0x39d   : > { %v1654_v41 = vpop.xlane.xlu0 %1653  ;;  %v1730_v13 = vmul.f32 %v8346_v36, %v10191_v42 }
 0x3a1   : > { %v1660_v2 = vpop.xlane.xlu0 %1659  ;;  %v1651_v3 = vpop.xlane.xlu1 %1650 }
 0x3a2   : > { %8353 = vrcp.f32 %v1651_v3 }
 0x3a3   : > { %8355 = vrcp.f32 %v1654_v41 }
 0x3a5   : > { %v1657_v24 = vpop.xlane.xlu0 %1656 }
 0x3a6   : > { %8357 = vrcp.f32 %v1657_v24 }
 0x3a7   : > { %8359 = vrcp.f32 %v1660_v2 }
 0x3a9   : > { %v8240_v31 = vpop.permute.xlu0 %8239 }
 0x3aa   : > { %v8242_v32 = vunpack.i.h.bf16 %v8240_v31  ;;  %v8241_v26 = vunpack.i.l.bf16 %v8240_v31 }
 0x3ab   : > { %v1663_v53 = vpop.xlane.xlu1 %1662 }
 0x3ac   : > { %v8002_v20 = vpack.c.bf16 %v8242_v32, %v8241_v26  ;;  %v1728_v26 = vmul.f32 %v8344_v29, %v10176_v28  ;;  %v8348_v32 = vpop.eup %8347  ;;  %8361 = vrcp.f32 %v1663_v53 }
 0x3ad   : > { %v8350_v0 = vpop.eup %8349  ;;  %v1732_v39 = vmul.f32 %v8348_v32, %v10183_v55 }
 0x3ae   : > { %8003 = vmatprep.subr.bf16.mxu0 %v8002_v20  ;;  %v8352_v61 = vpop.eup %8351  ;;  %v1734_v11 = vmul.f32 %v8350_v0, %v10201_v58 }
 0x3af   : > { %8005 = vmatpush3.bf16.msra.mxu0 %v8002_v20  ;;  %v8354_v41 = vpop.eup %8353  ;;  %v1736_v28 = vmul.f32 %v8352_v61, %v10196_v63  ;;  %v1672_v20 = vpop.xlane.xlu1 %1671 }
 0x3b0   : > { %v8356_v42 = vpop.eup %8355  ;;  %v1738_v24 = vmul.f32 %v8354_v41, %v10214_v4 }
 0x3b1   : > { %v8358_v31 = vpop.eup %8357  ;;  %v1740_v55 = vmul.f32 %v8356_v42, %v10207_v18 }
 0x3b2   : > { %7456 = vmatmul.mubr.msk.f32.vlgmr.msra.gmra.mrb[4].mxu0 %vm926_vm0, %v1724_v60  ;;  %v8360_v2 = vpop.eup %8359  ;;  %v1742_v58 = vmul.f32 %v8358_v31, %v10221_v23 }
 0x3b3   : > { %7458 = vmatprep.mubr.msk.f32.mxu0 %vm926_vm0, %v1726_v38  ;;  %v1744_v63 = vmul.f32 %v8360_v2, %v10211_v9  ;;  %v1669_v3 = vpop.xlane.xlu1 %1668 }
 0x3b4   : > { %8363 = vrcp.f32 %v1669_v3 }
 0x3b6   : > { %7459 = vmatmul.mubr.msk.f32.gmra.mrb[6].mxu0 %vm926_vm0, %v1728_v26  ;;  %v8362_v19 = vpop.eup %8361 }
 0x3b7   : > { %7461 = vmatprep.mubr.msk.f32.mxu0 %vm926_vm0, %v1730_v13  ;;  %v1746_v4 = vmul.f32 %v8362_v19, %v10226_v15  ;;  %v1675_v60 = vpop.xlane.xlu1 %1674 }
 0x3ba   : > { %7462 = vmatmul.mubr.msk.f32.gmra.mrb[8].mxu0 %vm926_vm0, %v1732_v39 }
 0x3bb   : > { %7464 = vmatprep.mubr.msk.f32.mxu0 %vm926_vm0, %v1734_v11  ;;  %v1681_v18 = vpop.xlane.xlu1 %1680 }
 0x3be   : > { %7465 = vmatmul.mubr.msk.f32.gmra.mrb[10].mxu0 %vm926_vm0, %v1736_v28  ;;  %v8364_v26 = vpop.eup %8363 }
 0x3bf   : > { %7467 = vmatprep.mubr.msk.f32.mxu0 %vm926_vm0, %v1738_v24  ;;  %v1687_v29 = vpop.xlane.xlu1 %1686  ;;  %v1750_v39 = vmul.f32 %v8364_v26, %v10235_v37 }
 0x3c2   : > { %7468 = vmatmul.mubr.msk.f32.gmra.mrb[12].mxu0 %vm926_vm0, %v1740_v55 }
 0x3c3   : > { %7470 = vmatprep.mubr.msk.f32.mxu0 %vm926_vm0, %v1742_v58  ;;  %v1693_v36 = vpop.xlane.xlu1 %1692 }
 0x3c6   : > { %7471 = vmatmul.mubr.msk.f32.gmra.mrb[14].mxu0 %vm926_vm0, %v1744_v63 }
 0x3c7   : > { %7473 = vmatprep.mubr.msk.f32.mxu0 %vm926_vm0, %v1746_v4  ;;  %v1699_v32 = vpop.xlane.xlu1 %1698 }
 0x3cb   : > { %v1705_v42 = vpop.xlane.xlu1 %1704 }
 0x3da   : > { %v1666_v38 = vpop.xlane.xlu0 %1665 }
 0x3db   : > { %8365 = vrcp.f32 %v1666_v38 }
 0x3dc   : > { %8367 = vrcp.f32 %v1672_v20 }
 0x3dd   : > { %8369 = vrcp.f32 %v1675_v60 }
 0x3de   : > { %v1678_v23 = vpop.xlane.xlu0 %1677 }
 0x3df   : > { %8371 = vrcp.f32 %v1678_v23 }
 0x3e0   : > { %8373 = vrcp.f32 %v1681_v18 }
 0x3e2   : > { %v1684_v9 = vpop.xlane.xlu0 %1683 }
 0x3e3   : > { %8375 = vrcp.f32 %v1684_v9 }
 0x3e4   : > { %8377 = vrcp.f32 %v1687_v29 }
 0x3e5   : > { %v8366_v15 = vpop.eup %8365 }
 0x3e6   : > { %v1690_v53 = vpop.xlane.xlu0 %1689  ;;  %v1748_v13 = vmul.f32 %v8366_v15, %v10284_v7  ;;  %v8368_v0 = vpop.eup %8367 }
 0x3e7   : > { %v8370_v61 = vpop.eup %8369  ;;  %8379 = vrcp.f32 %v1690_v53  ;;  %v1752_v41 = vmul.f32 %v8368_v0, %v10230_v21  ;;  %v1711_v21 = vpop.xlane.xlu1 %1710 }
 0x3e8   : > { %7474 = vmatmul.mubr.msk.f32.gmra.mrb[16].mxu0 %vm926_vm0, %v1748_v13  ;;  %8381 = vrcp.f32 %v1693_v36  ;;  %v1754_v24 = vmul.f32 %v8370_v61, %v10240_v16 }
 0x3e9   : > { %7476 = vmatprep.mubr.msk.f32.mxu0 %vm926_vm0, %v1750_v39  ;;  %v8372_v28 = vpop.eup %8371 }
 0x3ea   : > { %v1696_v11 = vpop.xlane.xlu0 %1695  ;;  %v8374_v31 = vpop.eup %8373  ;;  %v1756_v7 = vmul.f32 %v8372_v28, %v10289_v46  ;;  %v12455_v28 = vld [vmem:[#allocation13_spill] sm:$0xff] }
 0x3eb   : > { %8383 = vrcp.f32 %v1696_v11  ;;  %v1758_v2 = vmul.f32 %v8374_v31, %v10245_v14  ;;  %v1717_v60 = vpop.xlane.xlu1 %1716 }
 0x3ec   : > { %7477 = vmatmul.mubr.msk.f32.gmra.mrb[18].mxu0 %vm926_vm0, %v1752_v41  ;;  %8385 = vrcp.f32 %v1699_v32 }
 0x3ed   : > { %7479 = vmatprep.mubr.msk.f32.mxu0 %vm926_vm0, %v1754_v24  ;;  %v8376_v55 = vpop.eup %8375  ;;  %v12456_v24 = vld [vmem:[#allocation6_spill] sm:$0xff] }
 0x3ee   : > { %v1702_v37 = vpop.xlane.xlu0 %1701  ;;  %v8378_v20 = vpop.eup %8377  ;;  %v1760_v58 = vmul.f32 %v8376_v55, %v10294_v33 }
 0x3ef   : > { %8387 = vrcp.f32 %v1702_v37  ;;  %v1762_v63 = vmul.f32 %v8378_v20, %v10250_v57  ;;  %v12458_v20 = vld [vmem:[#allocation16_spill] sm:$0xff] }
 0x3f0   : > { %7480 = vmatmul.mubr.msk.f32.gmra.mrb[20].mxu0 %vm926_vm0, %v1756_v7  ;;  %8389 = vrcp.f32 %v1705_v42  ;;  %v12457_v7 = vld [vmem:[#allocation18_spill] sm:$0xff] }
 0x3f1   : > { %7482 = vmatprep.mubr.msk.f32.mxu0 %vm926_vm0, %v1758_v2  ;;  %v8380_v19 = vpop.eup %8379 }
 0x3f2   : > { %v1708_v16 = vpop.xlane.xlu0 %1707  ;;  %v8382_v4 = vpop.eup %8381  ;;  %v1764_v46 = vmul.f32 %v8380_v19, %v10299_v30 }
 0x3f3   : > { %8391 = vrcp.f32 %v1708_v16  ;;  %v1766_v18 = vmul.f32 %v8382_v4, %v10257_v52 }
 0x3f4   : > { %7483 = vmatmul.mubr.msk.f32.gmra.mrb[22].mxu0 %vm926_vm0, %v1760_v58  ;;  %8393 = vrcp.f32 %v1711_v21  ;;  %v12459_v58 = vld [vmem:[#allocation15_spill] sm:$0xff] }
 0x3f5   : > { %7485 = vmatprep.mubr.msk.f32.mxu0 %vm926_vm0, %v1762_v63  ;;  %v8384_v3 = vpop.eup %8383 }
 0x3f6   : > { %v1714_v14 = vpop.xlane.xlu0 %1713  ;;  %v8386_v29 = vpop.eup %8385  ;;  %v1768_v33 = vmul.f32 %v8384_v3, %v10304_v10 }
 0x3f7   : > { %8395 = vrcp.f32 %v1714_v14  ;;  %v1770_v23 = vmul.f32 %v8386_v29, %v10262_v48  ;;  %v12460_v14 = vld [vmem:[#allocation14_spill] sm:$0xff] }
 0x3f8   : > { %7486 = vmatmul.mubr.msk.f32.gmra.mrb[24].mxu0 %vm926_vm0, %v1764_v46  ;;  %8397 = vrcp.f32 %v1717_v60 }
 0x3f9   : > { %7488 = vmatprep.mubr.msk.f32.mxu0 %vm926_vm0, %v1766_v18  ;;  %v8388_v38 = vpop.eup %8387 }
 0x3fa   : > { %v1720_v57 = vpop.xlane.xlu0 %1719  ;;  %v8390_v36 = vpop.eup %8389  ;;  %v1772_v52 = vmul.f32 %v8388_v38, %v10308_v56 }
 0x3fb   : > { %8399 = vrcp.f32 %v1720_v57  ;;  %v1774_v9 = vmul.f32 %v8390_v36, %v10268_v27  ;;  %v12461_v57 = vld [vmem:[#allocation21_spill] sm:$0xff] }
 0x3fc   : > { %7489 = vmatmul.mubr.msk.f32.gmra.mrb[26].mxu0 %vm926_vm0, %v1768_v33 }
 0x3fd   : > { %7491 = vmatprep.mubr.msk.f32.mxu0 %vm926_vm0, %v1770_v23  ;;  %v8392_v30 = vpop.eup %8391  ;;  %v12462_v23 = vld [vmem:[#allocation19_spill] sm:$0xff] }
 0x3fe   : > { %v8394_v26 = vpop.eup %8393  ;;  %v1776_v10 = vmul.f32 %v8392_v30, %v10312_v45  ;;  %v2211_v45 = vld [vmem:[%s11970_s5 + $0x8] sm:$0xff] }
 0x3ff   : > { %v1778_v48 = vmul.f32 %v8394_v26, %v10273_v43  ;;  %v2210_v43 = vld [vmem:[%s11970_s5] sm:$0xff] }
 0x400   : > { %7492 = vmatmul.mubr.msk.f32.gmra.mrb[28].mxu0 %vm926_vm0, %v1772_v52 }
 0x401   : > { %7494 = vmatprep.mubr.msk.f32.mxu0 %vm926_vm0, %v1774_v9  ;;  %v8396_v15 = vpop.eup %8395 }
 0x402   : > { %v8398_v32 = vpop.eup %8397  ;;  %v1780_v56 = vmul.f32 %v8396_v15, %v10316_v5  ;;  %v8006_v5 = vpack.c.bf16 %v2211_v45, %v2210_v43 }
 0x403   : > { %v1782_v27 = vmul.f32 %v8398_v32, %v10278_v44  ;;  %v2212_v44 = vld [vmem:[%s11970_s5 + $0x10] sm:$0xff]  ;;  %v12463_v32 = vld [vmem:[#allocation24_spill] sm:$0xff] }
 0x404   : > { %7495 = vmatmul.mubr.msk.f32.gmra.mrb[30].mxu0 %vm926_vm0, %v1776_v10  ;;  %8007 = vmatprep.subr.bf16.mxu0 %v8006_v5 }
 0x405   : > { %7497 = vmatprep.mubr.msk.f32.mxu0 %vm926_vm0, %v1778_v48  ;;  %v8400_v53 = vpop.eup %8399  ;;  %8009 = vmatpush3.bf16.msra.mxu0 %v8006_v5 }
 0x406   : > { %v1784_v13 = vmul.f32 %v8400_v53, %v10320_v22  ;;  %v2213_v22 = vld [vmem:[%s11970_s5 + $0x18] sm:$0xff] }
 0x407   : > { %v8010_v0 = vpack.c.bf16 %v2213_v22, %v2212_v44 }
 0x408   : > { %7498 = vmatmul.mubr.msk.f32.gmra.mrb[32].mxu0 %vm926_vm0, %v1780_v56 }
 0x409   : > { %7500 = vmatprep.mubr.msk.f32.mxu0 %vm926_vm0, %v1782_v27  ;;  %8011 = vmatprep.subr.bf16.mxu0 %v8010_v0  ;;  %v12464_v27 = vld [vmem:[#allocation23_spill] sm:$0xff] }
 0x40a   : > { %8013 = vmatpush3.bf16.msra.mxu0 %v8010_v0  ;;  %v12465_v0 = vld [vmem:[#allocation27_spill] sm:$0xff] }
 0x40c   : > { %7501 = vmatmul.mubr.msk.f32.gmra.mrb[34].mxu0 %vm926_vm0, %v1784_v13 }
 0x485   : > { %v7457_v39 = vpop.f32.mrb[4].mxu0 }
 0x486   : > { %v1959_v61 = vpop.f32.mrb[5].mxu0  ;;  %v2119_v42 = vmul.f32 %v7457_v39, %v12455_v28 }
 0x487   : > { %v2118_v31 = vmul.f32 %v12456_v24, %v1959_v61 }
 0x488   : > { %v2165_v16 = vsel %vm926_vm0, %v2119_v42, 0.0 }
 0x489   : > { %v7460_v11 = vpop.f32.mrb[6].mxu0  ;;  %v2150_v4 = vsel %vm926_vm0, %v2118_v31, 0.0 }
 0x48a   : > { %v1969_v41 = vpop.f32.mrb[7].mxu0  ;;  %v2121_v19 = vmul.f32 %v7460_v11, %v12459_v58  ;;  %v12466_v11 = vld [vmem:[#allocation25_spill] sm:$0xff] }
 0x48b   : > { %v2120_v46 = vmul.f32 %v12460_v14, %v1969_v41 }
 0x48c   : > { %v2195_v52 = vsel %vm926_vm0, %v2121_v19, 0.0 }
 0x48d   : > { %v7463_v37 = vpop.f32.mrb[8].mxu0  ;;  %v2180_v9 = vsel %vm926_vm0, %v2120_v46, 0.0 }
 0x48e   : > { %v2123_v55 = vmul.f32 %v7463_v37, %v12457_v7  ;;  %v1979_v2 = vpop.f32.mrb[9].mxu0 }
 0x48f   : > { %v2122_v21 = vmul.f32 %v12458_v20, %v1979_v2 }
 0x490   : > { %v2166_v63 = vsel %vm926_vm0, %v2123_v55, 0.0 }
 0x491   : > { %v2167_v3 = vadd.f32 %v2166_v63, %v2165_v16  ;;  %v2151_v60 = vsel %vm926_vm0, %v2122_v21, 0.0  ;;  %v7466_v18 = vpop.f32.mrb[10].mxu0  ;;  %v12467_v21 = vld [vmem:[#allocation32_spill] sm:$0xff]  ;;  %v12468_v63 = vld [vmem:[#allocation30_spill] sm:$0xff] }
 0x492   : > { %v2152_v29 = vadd.f32 %v2151_v60, %v2150_v4  ;;  %v2125_v33 = vmul.f32 %v7466_v18, %v12461_v57  ;;  %v1989_v38 = vpop.f32.mrb[11].mxu0 }
 0x493   : > { %v2124_v36 = vmul.f32 %v12462_v23, %v1989_v38 }
 0x494   : > { %v2196_v30 = vsel %vm926_vm0, %v2125_v33, 0.0  ;;  %v12469_v33 = vld [vmem:[#allocation37_spill] sm:$0xff] }
 0x495   : > { %v2197_v26 = vadd.f32 %v2196_v30, %v2195_v52  ;;  %v2181_v10 = vsel %vm926_vm0, %v2124_v36, 0.0  ;;  %v7469_v15 = vpop.f32.mrb[12].mxu0  ;;  %v12470_v52 = vld [vmem:[#allocation33_spill] sm:$0xff] }
 0x496   : > { %v2182_v48 = vadd.f32 %v2181_v10, %v2180_v9  ;;  %v2127_v56 = vmul.f32 %v7469_v15, %v12463_v32  ;;  %v1999_v53 = vpop.f32.mrb[13].mxu0 }
 0x497   : > { %v2126_v13 = vmul.f32 %v12464_v27, %v1999_v53 }
 0x498   : > { %v2168_v43 = vsel %vm926_vm0, %v2127_v56, 0.0  ;;  %v12471_v56 = vld [vmem:[#allocation42_spill] sm:$0xff] }
 0x499   : > { %v2169_v45 = vadd.f32 %v2168_v43, %v2167_v3  ;;  %v2153_v5 = vsel %vm926_vm0, %v2126_v13, 0.0  ;;  %v7472_v44 = vpop.f32.mrb[14].mxu0  ;;  %v12472_v43 = vld [vmem:[#allocation39_spill] sm:$0xff] }
 0x49a   : > { %v2154_v22 = vadd.f32 %v2153_v5, %v2152_v29  ;;  %v2129_v39 = vmul.f32 %v7472_v44, %v12465_v0  ;;  %v2009_v61 = vpop.f32.mrb[15].mxu0 }
 0x49b   : > { %v2128_v41 = vmul.f32 %v12466_v11, %v2009_v61 }
 0x49c   : > { %v2198_v42 = vsel %vm926_vm0, %v2129_v39, 0.0 }
 0x49d   : > { %v2199_v31 = vadd.f32 %v2198_v42, %v2197_v26  ;;  %v2183_v37 = vsel %vm926_vm0, %v2128_v41, 0.0  ;;  %v12473_v41 = vld [vmem:[#allocation46_spill] sm:$0xff] }
 0x49e   : > { %v2184_v55 = vadd.f32 %v2183_v37, %v2182_v48 }
 0x4bb   : > { %v7475_v2 = vpop.f32.mrb[16].mxu0 }
 0x4bc   : > { %v2131_v16 = vmul.f32 %v7475_v2, %v12467_v21  ;;  %v2019_v19 = vpop.f32.mrb[17].mxu0 }
 0x4bd   : > { %v2130_v4 = vmul.f32 %v12468_v63, %v2019_v19 }
 0x4be   : > { %v2170_v46 = vsel %vm926_vm0, %v2131_v16, 0.0 }
 0x4bf   : > { %v2171_v3 = vadd.f32 %v2170_v46, %v2169_v45  ;;  %v2155_v60 = vsel %vm926_vm0, %v2130_v4, 0.0  ;;  %v7478_v18 = vpop.f32.mrb[18].mxu0 }
 0x4c0   : > { %v2156_v29 = vadd.f32 %v2155_v60, %v2154_v22  ;;  %v2133_v38 = vmul.f32 %v7478_v18, %v12469_v33  ;;  %v2029_v36 = vpop.f32.mrb[19].mxu0  ;;  %v12475_v60 = vld [vmem:[#allocation49_spill] sm:$0xff] }
 0x4c1   : > { %v2132_v30 = vmul.f32 %v12470_v52, %v2029_v36 }
 0x4c2   : > { %v2200_v9 = vsel %vm926_vm0, %v2133_v38, 0.0 }
 0x4c3   : > { %v2201_v26 = vadd.f32 %v2200_v9, %v2199_v31  ;;  %v2185_v10 = vsel %vm926_vm0, %v2132_v30, 0.0  ;;  %v7481_v15 = vpop.f32.mrb[20].mxu0  ;;  %v12474_v31 = vld [vmem:[#allocation43_spill] sm:$0xff] }
 0x4c4   : > { %v2186_v48 = vadd.f32 %v2185_v10, %v2184_v55  ;;  %v2135_v53 = vmul.f32 %v7481_v15, %v12471_v56  ;;  %v2039_v13 = vpop.f32.mrb[21].mxu0 }
 0x4c5   : > { %v2134_v45 = vmul.f32 %v12472_v43, %v2039_v13 }
 0x4c6   : > { %v2172_v5 = vsel %vm926_vm0, %v2135_v53, 0.0  ;;  %v12477_v53 = vld [vmem:[#allocation51_spill] sm:$0xff] }
 0x4c7   : > { %v2173_v44 = vadd.f32 %v2172_v5, %v2171_v3  ;;  %v2157_v22 = vsel %vm926_vm0, %v2134_v45, 0.0  ;;  %v7484_v39 = vpop.f32.mrb[22].mxu0  ;;  %v12476_v3 = vld [vmem:[#allocation47_spill] sm:$0xff] }
 0x4c8   : > { %v2158_v61 = vadd.f32 %v2157_v22, %v2156_v29  ;;  %v2137_v42 = vmul.f32 %v7484_v39, %v12473_v41  ;;  %v2049_v37 = vpop.f32.mrb[23].mxu0 }
 0x4c9   : > { %v2136_v2 = vmul.f32 %v12474_v31, %v2049_v37 }
 0x4ca   : > { %v2202_v16 = vsel %vm926_vm0, %v2137_v42, 0.0 }
 0x4cb   : > { %v2203_v55 = vadd.f32 %v2202_v16, %v2201_v26  ;;  %v2187_v19 = vsel %vm926_vm0, %v2136_v2, 0.0  ;;  %v7487_v4 = vpop.f32.mrb[24].mxu0  ;;  %v12478_v26 = vld [vmem:[#allocation50_spill] sm:$0xff]  ;;  %v12479_v2 = vld [vmem:[#allocation53_spill] sm:$0xff] }
 0x4cc   : > { %v2188_v46 = vadd.f32 %v2187_v19, %v2186_v48  ;;  %v2139_v18 = vmul.f32 %v7487_v4, %v12475_v60  ;;  %v2059_v38 = vpop.f32.mrb[25].mxu0 }
 0x4cd   : > { %v2138_v36 = vmul.f32 %v12476_v3, %v2059_v38 }
 0x4ce   : > { %v2174_v30 = vsel %vm926_vm0, %v2139_v18, 0.0 }
 0x4cf   : > { %v2175_v29 = vadd.f32 %v2174_v30, %v2173_v44  ;;  %v2159_v9 = vsel %vm926_vm0, %v2138_v36, 0.0  ;;  %v7490_v10 = vpop.f32.mrb[26].mxu0  ;;  %v12480_v44 = vld [vmem:[#allocation52_spill] sm:$0xff] }
 0x4d0   : > { %v2160_v15 = vadd.f32 %v2159_v9, %v2158_v61  ;;  %v2141_v13 = vmul.f32 %v7490_v10, %v12477_v53  ;;  %v2069_v45 = vpop.f32.mrb[27].mxu0 }
 0x4d1   : > { %v2140_v5 = vmul.f32 %v12478_v26, %v2069_v45 }
 0x4d2   : > { %v2204_v22 = vsel %vm926_vm0, %v2141_v13, 0.0 }
 0x4d3   : > { %v2205_v48 = vadd.f32 %v2204_v22, %v2203_v55  ;;  %v2189_v39 = vsel %vm926_vm0, %v2140_v5, 0.0  ;;  %v7493_v42 = vpop.f32.mrb[28].mxu0  ;;  %v12481_v55 = vld [vmem:[#allocation54_spill] sm:$0xff] }
 0x4d4   : > { %v2190_v37 = vadd.f32 %v2189_v39, %v2188_v46  ;;  %v2143_v16 = vmul.f32 %v7493_v42, %v12479_v2  ;;  %v2079_v19 = vpop.f32.mrb[29].mxu0  ;;  %v12482_v42 = vld [vmem:[#allocation57_spill] sm:$0xff] }
 0x4d5   : > { %v2142_v4 = vmul.f32 %v12480_v44, %v2079_v19 }
 0x4d6   : > { %v2176_v18 = vsel %vm926_vm0, %v2143_v16, 0.0 }
 0x4d7   : > { %v2177_v61 = vadd.f32 %v2176_v18, %v2175_v29  ;;  %v2161_v38 = vsel %vm926_vm0, %v2142_v4, 0.0  ;;  %v7496_v36 = vpop.f32.mrb[30].mxu0  ;;  %v12483_v29 = vld [vmem:[#allocation56_spill] sm:$0xff] }
 0x4d8   : > { %v2162_v30 = vadd.f32 %v2161_v38, %v2160_v15  ;;  %v2145_v9 = vmul.f32 %v7496_v36, %v9459_v25  ;;  %v2089_v10 = vpop.f32.mrb[31].mxu0 }
 0x4d9   : > { %v2144_v13 = vmul.f32 %v12481_v55, %v2089_v10  ;;  %v12484_v10 = vld [vmem:[#allocation59_spill] sm:$0xff] }
 0x4da   : > { %v2206_v45 = vsel %vm926_vm0, %v2145_v9, 0.0 }
 0x4db   : > { %v2207_v46 = vadd.f32 %v2206_v45, %v2205_v48  ;;  %v2191_v5 = vsel %vm926_vm0, %v2144_v13, 0.0  ;;  %v7499_v22 = vpop.f32.mrb[32].mxu0  ;;  %v12485_v48 = vld [vmem:[#allocation58_spill] sm:$0xff] }
 0x4dc   : > { %v2192_v39 = vadd.f32 %v2191_v5, %v2190_v37  ;;  %v2147_v19 = vmul.f32 %v7499_v22, %v12482_v42  ;;  %v2099_v16 = vpop.f32.mrb[33].mxu0 }
 0x4dd   : > { %v2146_v18 = vmul.f32 %v12483_v29, %v2099_v16 }
 0x4de   : > { %v2178_v4 = vsel %vm926_vm0, %v2147_v19, 0.0  ;;  %v12487_v19 = vld [vmem:[#allocation9_spill] sm:$0xff] }
 0x4df   : > { %v2179_v15 = vadd.f32 %v2178_v4, %v2177_v61  ;;  %v2163_v38 = vsel %vm926_vm0, %v2146_v18, 0.0  ;;  %v7502_v36 = vpop.f32.mrb[34].mxu0  ;;  %v12486_v61 = vld [vmem:[#allocation5_spill] sm:$0xff]  ;;  %v378_v16 = vmul.f32 0.125, %v12487_v19 }
 0x4e0   : > { %v2164_v51 = vadd.f32 %v2163_v38, %v2162_v30  ;;  %v2149_v54 = vmul.f32 %v7502_v36, %v12484_v10  ;;  %v2109_v9 = vpop.f32.mrb[35].mxu0  ;;  %v377_v30 = vmul.f32 0.125, %v12486_v61  ;;  %v12490_v36 = vmov 0.0  }
 0x4e1   : > { %v2148_v45 = vmul.f32 %v12485_v48, %v2109_v9  ;;  %v382_v4 = vfloor.f32 %v378_v16 }
 0x4e2   : > { %v2208_v13 = vsel %vm926_vm0, %v2149_v54, 0.0  ;;  %7511 = vmatprep.mubr.msk.f32.mxu0 %vm926_vm0, %v2164_v51  ;;  %v381_v18 = vfloor.f32 %v377_v30  ;;  %v12488_v54 = vld [vmem:[#allocation62_spill] sm:$0xff]  ;;  %v12489_v51 = vld [vmem:[#allocation11_spill] sm:$0xff] }
 0x4e3   : > { %v2209_v37 = vadd.f32 %v2208_v13, %v2207_v46  ;;  %v2193_v5 = vsel %vm926_vm0, %v2148_v45, 0.0  ;;  %7512 = vmatmul.mubr.msk.f32.vlgmr.msra.gmra.mrb[36].mxu0 %vm926_vm0, %v2179_v15  ;;  %v379_v46 = vmul.f32 0.125, %v12489_v51  ;;  %vm875_vm11 = vcmp.eq.f32.partialorder %v382_v4, %v12488_v54 }
 0x4e4   : > { %v2194_v22 = vadd.f32 %v2193_v5, %v2192_v39  ;;  %v385_v38 = vmul.f32 8.0, %v381_v18  ;;  %vm874_vm10 = vcmp.eq.f32.partialorder %v381_v18, %v12488_v54  ;;  %v12491_v39 = vld [vmem:[#allocation12_spill] sm:$0xff]  ;;  %v6681_v13 = vsel %vm875_vm11, 1.0, %v12490_v36 }
 0x4e5   : > { %v6680_v15 = vsel %vm874_vm10, 1.0, %v12490_v36  ;;  %v380_v9 = vmul.f32 0.125, %v12491_v39  ;;  %v383_v5 = vfloor.f32 %v379_v46 }
 0x4e6   : > { %7514 = vmatprep.mubr.msk.f32.mxu0 %vm926_vm0, %v2194_v22  ;;  %v389_v45 = vsub.f32 %v12486_v61, %v385_v38  ;;  %v10479_v22 = vmul.f32 0.125, %v6681_v13  ;;  %v386_v13 = vmul.f32 8.0, %v382_v4 }
 0x4e7   : > { %7515 = vmatmul.mubr.msk.f32.gmra.mrb[38].mxu0 %vm926_vm0, %v2209_v37  ;;  %v10477_v37 = vmul.f32 0.125, %v6680_v15  ;;  %vm876_vm13 = vcmp.eq.f32.partialorder %v383_v5, %v12488_v54  ;;  %v384_v61 = vfloor.f32 %v380_v9 }
 0x4e8   : > { %12493 = vst [vmem:[#allocation7_spill] sm:$0xff] %v10479_v22  ;;  %vm890_vm12 = vcmp.eq.f32.partialorder %v389_v45, %v9557_v12  ;;  %v6682_v18 = vsel %vm876_vm13, 1.0, %v12490_v36  ;;  %v390_v6 = vsub.f32 %v12487_v19, %v386_v13 }
 0x4e9   : > { %12492 = vst [vmem:[#allocation48_spill] sm:$0xff] %v10477_v37  ;;  %v6684_v30 = vsel %vm890_vm12, 1.0, %v12490_v36  ;;  %v10486_v16 = vpack.c.bf16 %v10479_v22, %v10477_v37  ;;  %v10489_v15 = vmul.f32 0.125, %v6682_v18  ;;  %vm877_vm14 = vcmp.eq.f32.partialorder %v384_v61, %v12488_v54  ;;  %v8681_v22 = vld [vmem:[%s8878_s21 + $0x8] sm:$0xff] }
 0x4ea   : > { %v902_v38 = vmul.f32 0.25, %v6684_v30  ;;  %v6683_v46 = vsel %vm877_vm14, 1.0, %v12490_v36  ;;  %v387_v30 = vmul.f32 8.0, %v383_v5  ;;  %v388_v59 = vmul.f32 8.0, %v384_v61  ;;  %v8683_v5 = vld [vmem:[%s8878_s21 + $0x18] sm:$0xff] }
 0x4eb   : > { %12494 = vst [vmem:[#allocation8_spill] sm:$0xff] %v10489_v15  ;;  %8023 = vmatprep.subr.bf16.mxu0 %v10486_v16  ;;  %v10496_v45 = vmul.f32 0.125, %v6683_v46  ;;  %v6765_v46 = vld [vmem:[%s11971_s6] ss:$0 sm:$0xff]  ;;  %vm891_vm15 = vcmp.eq.f32.partialorder %v390_v6, %v9557_v12 }
 0x4ec   : > { %7525 = vmatprep.mubr.msk.f32.mxu1 %vm926_vm0, %v902_v38  ;;  %8025 = vmatpush3.bf16.msra.mxu0 %v10486_v16  ;;  %v391_v1 = vsub.f32 %v12489_v51, %v387_v30 }
 0x4ed   : > { %12495 = vst [vmem:[#allocation13_spill] sm:$0xff] %v10496_v45  ;;  %v10500_v9 = vpack.c.bf16 %v10496_v45, %v10489_v15  ;;  %v8682_v45 = vld [vmem:[%s8878_s21] sm:$0xff]  ;;  %s367_s21 = scalar_lea.vmem %s11967_s2, %s6647_s23 }
 0x4ee   : > { %vm892_vm1 = vcmp.eq.f32.partialorder %v391_v1, %v9557_v12 }
 0x4ef   : > { %12496 = vst [vmem:[#allocation6_spill] sm:$0xff] %v10500_v9  ;;  %8027 = vmatprep.subr.bf16.mxu0 %v10500_v9  ;;  %v6686_v51 = vsel %vm892_vm1, 1.0, %v12490_v36 }
 0x4f0   : > { %8029 = vmatpush3.bf16.msra.mxu0 %v10500_v9 }
 0x4f1   : > { %8039 = vmatprep.subr.bf16.mxu0 %v10486_v16 }
 0x5b6   : > { %v7513_v18 = vpop.f32.mrb[36].mxu0 }
 0x5b7   : > { %v2312_v17 = vadd.f32 %v8681_v22, %v7513_v18  ;;  %v2292_v62 = vpop.f32.mrb[37].mxu0  ;;  %v392_v22 = vsub.f32 %v12491_v39, %v388_v59 }
 0x5b8   : > { %v2311_v15 = vadd.f32 %v8682_v45, %v2292_v62 }
 0x5b9   : > { %v2323_v34 = vadd.f32 %v6765_v46, %v2312_v17  ;;  %v6685_v17 = vsel %vm891_vm15, 1.0, %v12490_v36  ;;  %vm893_vm3 = vcmp.eq.f32.partialorder %v392_v22, %v9557_v12 }
 0x5ba   : > { %v2322_v50 = vadd.f32 %v6765_v46, %v2311_v15  ;;  %v7516_v4 = vpop.f32.mrb[38].mxu0  ;;  %v6687_v6 = vsel %vm893_vm3, 1.0, %v12490_v36 }
 0x5bb   : > { %v2314_v49 = vadd.f32 %v8683_v5, %v7516_v4  ;;  %v2302_v47 = vpop.f32.mrb[39].mxu0 }
 0x5bc   : > { %v2313_v8 = vadd.f32 %v8684_v35, %v2302_v47  ;;  %v8014_v40 = vpack.c.bf16 %v2323_v34, %v2322_v50  ;;  %v903_v47 = vmul.f32 0.25, %v6685_v17  ;;  %v904_v35 = vmul.f32 0.25, %v6686_v51  ;;  %v10542_v51 = vld [vmem:[%s11968_s3 + $0x20] sm:$0xff] }
 0x5bd   : > { %v2325_v18 = vadd.f32 %v6765_v46, %v2314_v49  ;;  %v905_v49 = vmul.f32 0.25, %v6687_v6 }
 0x5be   : > { %v2324_v62 = vadd.f32 %v6765_v46, %v2313_v8  ;;  %8015 = vmatprep.subr.bf16.mxu1 %v8014_v40 }
 0x5bf   : > { %8017 = vmatpush3.bf16.msra.mxu1 %v8014_v40 }
 0x5c0   : > { %v8018_v19 = vpack.c.bf16 %v2325_v18, %v2324_v62 }
 0x5c2   : > { %8019 = vmatprep.subr.bf16.mxu1 %v8018_v19 }
 0x5c3   : > { %8021 = vmatpush3.bf16.msra.mxu1 %v8018_v19 }
 0x5c6   : > { %7526 = vmatmul.mubr.msk.f32.vlgmr.msra.gmra.mrb[32].mxu1 %vm926_vm0, %v903_v47 }
 0x5c7   : > { %7528 = vmatprep.mubr.msk.f32.mxu1 %vm926_vm0, %v904_v35 }
 0x5ca   : > { %7529 = vmatmul.mubr.msk.f32.gmra.mrb[34].mxu1 %vm926_vm0, %v905_v49 }
 0x5cb   : > { %7553 = vmatprep.mubr.msk.f32.mxu1 %vm926_vm0, %v902_v38 }
 0x699   : > { %v7527_v40 = vpop.f32.mrb[32].mxu1 }
 0x69a   : > { %v2406_v8 = vpop.f32.mrb[33].mxu1 }
 0x69b   : > { %7539 = vmatprep.mubr.msk.f32.mxu0 %vm926_vm0, %v2406_v8 }
 0x69c   : > { %7540 = vmatmul.mubr.msk.f32.vlgmr.msra.gmra.mrb[40].mxu0 %vm926_vm0, %v7527_v40 }
 0x69d   : > { %v7530_v12 = vpop.f32.mrb[34].mxu1  ;;  %8041 = vmatpush3.bf16.msra.mxu0 %v10486_v16 }
 0x69e   : > { %v2416_v1 = vpop.f32.mrb[35].mxu1  ;;  %8043 = vmatprep.subr.bf16.mxu0 %v10500_v9 }
 0x69f   : > { %7542 = vmatprep.mubr.msk.f32.mxu0 %vm926_vm0, %v2416_v1 }
 0x6a0   : > { %7543 = vmatmul.mubr.msk.f32.gmra.mrb[42].mxu0 %vm926_vm0, %v7530_v12 }
 0x6a1   : > { %8045 = vmatpush3.bf16.msra.mxu0 %v10500_v9 }
 0x76f   : > { %v7541_v59 = vpop.f32.mrb[40].mxu0 }
 0x770   : > { %v2523_v39 = vsub.f32 %v2323_v34, %v7541_v59  ;;  %v2503_v61 = vpop.f32.mrb[41].mxu0 }
 0x771   : > { %v2522_v38 = vsub.f32 %v2322_v50, %v2503_v61 }
 0x772   : > { %v2527_v15 = vmul.f32 %v2523_v39, %v2523_v39 }
 0x773   : > { %v2526_v45 = vmul.f32 %v2522_v38, %v2522_v38  ;;  %v7544_v13 = vpop.f32.mrb[42].mxu0 }
 0x774   : > { %v2525_v30 = vsub.f32 %v2325_v18, %v7544_v13  ;;  %v2513_v46 = vpop.f32.mrb[43].mxu0 }
 0x775   : > { %v2524_v4 = vsub.f32 %v2324_v62, %v2513_v46  ;;  %v8030_v5 = vpack.c.bf16 %v2527_v15, %v2526_v45 }
 0x776   : > { %v2529_v22 = vmul.f32 %v2525_v30, %v2525_v30 }
 0x777   : > { %v2528_v17 = vmul.f32 %v2524_v4, %v2524_v4  ;;  %8031 = vmatprep.subr.bf16.mxu1 %v8030_v5 }
 0x778   : > { %8033 = vmatpush3.bf16.msra.mxu1 %v8030_v5  ;;  %v6782_v5 = vld [vmem:[%s11972_s7] ss:$0 sm:$0xff] }
 0x779   : > { %v8034_v19 = vpack.c.bf16 %v2529_v22, %v2528_v17 }
 0x77b   : > { %8035 = vmatprep.subr.bf16.mxu1 %v8034_v19 }
 0x77c   : > { %8037 = vmatpush3.bf16.msra.mxu1 %v8034_v19  ;;  %v6783_v19 = vld [vmem:[%s11973_s8] ss:$0 sm:$0xff] }
 0x77f   : > { %7554 = vmatmul.mubr.msk.f32.vlgmr.msra.gmra.mrb[36].mxu1 %vm926_vm0, %v903_v47  ;;  %v10547_v47 = vld [vmem:[%s11968_s3 + $0x28] sm:$0xff] }
 0x780   : > { %7556 = vmatprep.mubr.msk.f32.mxu1 %vm926_vm0, %v904_v35  ;;  %v10552_v35 = vld [vmem:[%s11968_s3 + $0x30] sm:$0xff]  ;;  %v8046_v6 = vpack.c.bf16 %v10547_v47, %v10542_v51 }
 0x782   : > { %8047 = vmatprep.subr.bf16.mxu1 %v8046_v6 }
 0x783   : > { %7557 = vmatmul.mubr.msk.f32.gmra.mrb[38].mxu1 %vm926_vm0, %v905_v49  ;;  %v10559_v49 = vld [vmem:[%s11968_s3 + $0x38] sm:$0xff] }
 0x784   : > { %v8050_v40 = vpack.c.bf16 %v10559_v49, %v10552_v35  ;;  %8049 = vmatpush3.bf16.msra.mxu1 %v8046_v6 }
 0x786   : > { %8051 = vmatprep.subr.bf16.mxu1 %v8050_v40 }
 0x788   : > { %8053 = vmatpush3.bf16.msra.mxu1 %v8050_v40 }
 0x852   : > { %v7555_v50 = vpop.f32.mrb[36].mxu1 }
 0x853   : > { %v2596_v34 = vpop.f32.mrb[37].mxu1 }
 0x854   : > { %7567 = vmatprep.mubr.msk.f32.mxu0 %vm926_vm0, %v2596_v34 }
 0x855   : > { %7568 = vmatmul.mubr.msk.f32.vlgmr.msra.gmra.mrb[44].mxu0 %vm926_vm0, %v7555_v50 }
 0x856   : > { %v7558_v18 = vpop.f32.mrb[38].mxu1 }
 0x857   : > { %v2606_v62 = vpop.f32.mrb[39].mxu1 }
 0x858   : > { %7570 = vmatprep.mubr.msk.f32.mxu0 %vm926_vm0, %v2606_v62 }
 0x859   : > { %7571 = vmatmul.mubr.msk.f32.gmra.mrb[46].mxu0 %vm926_vm0, %v7558_v18 }
 0x928   : > { %v7569_v8 = vpop.f32.mrb[44].mxu0 }
 0x929   : > { %v2699_v12 = vadd.f32 1e-05, %v7569_v8  ;;  %v2693_v1 = vpop.f32.mrb[45].mxu0 }
 0x92a   : > { %v2694_v59 = vadd.f32 1e-05, %v2693_v1  ;;  %v911_v1 = vld [vmem:[%s363_s16 + $0x8] sm:$0xff] }
 0x92b   : > { %8401 = vrsqrt.f32 %v2699_v12  ;;  %v910_v12 = vld [vmem:[%s363_s16] sm:$0xff] }
 0x92c   : > { %8403 = vrsqrt.f32 %v2694_v59  ;;  %v7572_v61 = vpop.f32.mrb[46].mxu0 }
 0x92d   : > { %v2709_v15 = vadd.f32 1e-05, %v7572_v61  ;;  %v2703_v45 = vpop.f32.mrb[47].mxu0 }
 0x92e   : > { %v2704_v13 = vadd.f32 1e-05, %v2703_v45 }
 0x92f   : > { %8405 = vrsqrt.f32 %v2709_v15 }
 0x930   : > { %8407 = vrsqrt.f32 %v2704_v13  ;;  %v912_v13 = vld [vmem:[%s363_s16 + $0x10] sm:$0xff] }
 0x935   : > { %v8402_v46 = vpop.eup %8401 }
 0x936   : > { %v8404_v22 = vpop.eup %8403  ;;  %v2717_v17 = vmul.f32 %v8402_v46, %v2523_v39 }
 0x937   : > { %v2716_v50 = vmul.f32 %v8404_v22, %v2522_v38  ;;  %v913_v22 = vld [vmem:[%s363_s16 + $0x18] sm:$0xff]  ;;  %s11918_s16 = scalar_lea.hbm %s11974_s9, %s7009_s26 }
 0x938   : > { %v2727_v34 = vmul.f32 %v6782_v5, %v2717_v17 }
 0x939   : > { %v8406_v18 = vpop.eup %8405  ;;  %v2726_v62 = vmul.f32 %v6782_v5, %v2716_v50 }
 0x93a   : > { %v8408_v6 = vpop.eup %8407  ;;  %v2719_v40 = vmul.f32 %v8406_v18, %v2525_v30  ;;  %v10574_v8 = vadd.f32 %v6783_v19, %v2727_v34 }
 0x93b   : > { %v2718_v39 = vmul.f32 %v8408_v6, %v2524_v4  ;;  %v10576_v59 = vadd.f32 %v6783_v19, %v2726_v62 }
 0x93c   : > { %12497 = vst [vmem:[#allocation18_spill] sm:$0xff] %v10574_v8  ;;  %v2729_v61 = vmul.f32 %v6782_v5, %v2719_v40  ;;  %v2748_v38 = vadd.f32 %v10574_v8, %v911_v1 }
 0x93d   : > { %12498 = vst [vmem:[#allocation16_spill] sm:$0xff] %v10576_v59  ;;  %7595 = vmatprep.mubr.msk.f32.mxu0 %vm926_vm0, %v10576_v59  ;;  %v2747_v15 = vadd.f32 %v10576_v59, %v910_v12  ;;  %v2728_v45 = vmul.f32 %v6782_v5, %v2718_v39  ;;  %v10595_v5 = vld [vmem:[%s11969_s4 + $0x1] ss:$0 sm:$0xff] }
 0x93e   : > { %v10582_v46 = vadd.f32 %v6783_v19, %v2729_v61 }
 0x93f   : > { %7581 = vmatprep.mubr.msk.f32.mxu1 %vm926_vm0, %v2747_v15  ;;  %v10585_v30 = vadd.f32 %v6783_v19, %v2728_v45  ;;  %v8253_v15 = vpack.i.bf16 %v10547_v47, %v10542_v51 }
 0x940   : > { %12499 = vst [vmem:[#allocation15_spill] sm:$0xff] %v10582_v46  ;;  %7582 = vmatmul.mubr.msk.f32.vlgmr.msra.gmra.mrb[40].mxu1 %vm926_vm0, %v2748_v38  ;;  %v2750_v17 = vadd.f32 %v10582_v46, %v913_v22  ;;  %v8258_v38 = vpack.i.bf16 %v10559_v49, %v10552_v35 }
 0x941   : > { %12500 = vst [vmem:[#allocation14_spill] sm:$0xff] %v10585_v30  ;;  %v2749_v4 = vadd.f32 %v10585_v30, %v912_v13 }
 0x943   : > { %7584 = vmatprep.mubr.msk.f32.mxu1 %vm926_vm0, %v2749_v4 }
 0x944   : > { %7585 = vmatmul.mubr.msk.f32.gmra.mrb[42].mxu1 %vm926_vm0, %v2750_v17 }
 0xa13   : > { %v7583_v50 = vpop.f32.mrb[40].mxu1 }
 0xa14   : > { %v2841_v19 = vadd.f32 %v7583_v50, %v10595_v5  ;;  %v2835_v34 = vpop.f32.mrb[41].mxu1 }
 0xa15   : > { %v2836_v18 = vadd.f32 %v10595_v5, %v2835_v34 }
 0xa17   : > { %v8243_v62 = vpack.i.bf16 %v2841_v19, %v2836_v18  ;;  %v10599_v6 = vmul.f32 0.5, %v2836_v18  ;;  %v7586_v40 = vpop.f32.mrb[42].mxu1 }
 0xa18   : > { %v2851_v12 = vadd.f32 %v7586_v40, %v10595_v5  ;;  %v2845_v1 = vpop.f32.mrb[43].mxu1 }
 0xa19   : > { %v2846_v39 = vadd.f32 %v10595_v5, %v2845_v1  ;;  %8244 = vrot.lane.b32.xlu1 %v8243_v62, %s8750_s24  ;;  %v2974_v61 = vmul.f32 %v12456_v24, %v10599_v6  ;;  %v2986_v40 = vmul.f32 %v12468_v63, %v10599_v6 }
 0xa1b   : > { %v8248_v45 = vpack.i.bf16 %v2851_v12, %v2846_v39  ;;  %7609 = vmatprep.mubr.msk.f32.mxu1 %vm926_vm0, %v2974_v61 }
 0xa1d   : > { %8254 = vrot.lane.b32.xlu1 %v8253_v15, %s12501_s25  ;;  %8249 = vrot.lane.b32.xlu0 %v8248_v45, %s8750_s24 }
 0xa21   : > { %8259 = vrot.lane.b32.xlu1 %v8258_v38, %s12501_s25  ;;  %v2971_v38 = vmul.f32 0.5, %v2841_v19 }
 0xa8b   : > { %v8245_v13 = vpop.permute.xlu1 %8244 }
 0xa8c   : > { %v8247_v22 = vunpack.i.h.bf16 %v8245_v13  ;;  %v8246_v4 = vunpack.i.l.bf16 %v8245_v13  ;;  %v2972_v13 = vmul.f32 0.5, %v2846_v39  ;;  %v2978_v39 = vmul.f32 %v12458_v20, %v10599_v6 }
 0xa8e   : > { %v8062_v17 = vpack.c.bf16 %v8247_v22, %v8246_v4  ;;  %v2973_v22 = vmul.f32 0.5, %v2851_v12  ;;  %v2975_v4 = vmul.f32 %v12455_v28, %v2971_v38  ;;  %v2979_v12 = vmul.f32 %v12457_v7, %v2971_v38 }
 0xa8f   : > { %v8255_v50 = vpop.permute.xlu1 %8254  ;;  %v8250_v34 = vpop.permute.xlu0 %8249 }
 0xa90   : > { %v8257_v18 = vunpack.i.h.bf16 %v8255_v50  ;;  %v8256_v51 = vunpack.i.l.bf16 %v8255_v50  ;;  %v8252_v47 = vunpack.i.h.bf16 %v8250_v34  ;;  %v8251_v62 = vunpack.i.l.bf16 %v8250_v34  ;;  %8064 = vmatprep.subr.msk.bf16.mxu1 %vm8937_vm2, %v8062_v17 }
 0xa91   : > { %8067 = vmatpush3.bf16.xpose.msk.msra.mxu1 %vm8937_vm2, %v8062_v17  ;;  %v2976_v17 = vmul.f32 %v12460_v14, %v2972_v13  ;;  %v2977_v19 = vmul.f32 %v12459_v58, %v2973_v22  ;;  %v2980_v50 = vmul.f32 %v12462_v23, %v2972_v13  ;;  %v2981_v34 = vmul.f32 %v12461_v57, %v2973_v22 }
 0xa92   : > { %v8068_v1 = vpack.c.bf16 %v8252_v47, %v8251_v62  ;;  %v8054_v35 = vpack.c.bf16 %v8257_v18, %v8256_v51  ;;  %v2982_v18 = vmul.f32 %v12464_v27, %v10599_v6  ;;  %v2983_v51 = vmul.f32 %v12463_v32, %v2971_v38 }
 0xa93   : > { %v8260_v49 = vpop.permute.xlu1 %8259  ;;  %v2984_v47 = vmul.f32 %v12466_v11, %v2972_v13  ;;  %v2985_v62 = vmul.f32 %v12465_v0, %v2973_v22 }
 0xa94   : > { %v8262_v61 = vunpack.i.h.bf16 %v8260_v49  ;;  %v8261_v15 = vunpack.i.l.bf16 %v8260_v49  ;;  %8055 = vmatprep.subr.bf16.mxu0 %v8054_v35  ;;  %8070 = vmatprep.subr.msk.bf16.mxu1 %vm8937_vm2, %v8068_v1  ;;  %v2989_v49 = vmul.f32 %v12469_v33, %v2973_v22 }
 0xa95   : > { %8057 = vmatpush3.bf16.msra.mxu0 %v8054_v35  ;;  %v2988_v35 = vmul.f32 %v12470_v52, %v2972_v13 }
 0xa96   : > { %v8058_v45 = vpack.c.bf16 %v8262_v61, %v8261_v15  ;;  %v2990_v61 = vmul.f32 %v12472_v43, %v10599_v6  ;;  %v2991_v15 = vmul.f32 %v12471_v56, %v2971_v38 }
 0xa98   : > { %8059 = vmatprep.subr.bf16.mxu0 %v8058_v45 }
 0xa99   : > { %8061 = vmatpush3.bf16.msra.mxu0 %v8058_v45  ;;  %8073 = vmatpush3.bf16.xpose.msk.msra.mxu1 %vm8937_vm2, %v8068_v1  ;;  %v2987_v1 = vmul.f32 %v12467_v21, %v2971_v38  ;;  %v2992_v45 = vmul.f32 %v12474_v31, %v2972_v13 }
 0xa9c   : > { %7596 = vmatmul.mubr.msk.f32.vlgmr.msra.gmra.mrb[48].mxu0 %vm926_vm0, %v10574_v8 }
 0xa9d   : > { %7598 = vmatprep.mubr.msk.f32.mxu0 %vm926_vm0, %v10585_v30 }
 0xaa0   : > { %7599 = vmatmul.mubr.msk.f32.gmra.mrb[50].mxu0 %vm926_vm0, %v10582_v46  ;;  %7610 = vmatmul.mubr.msk.f32.vlgmr.msra.gmra.mrb[44].mxu1 %vm926_vm0, %v2975_v4  ;;  %v2993_v4 = vmul.f32 %v12473_v41, %v2973_v22 }
 0xaa1   : > { %7612 = vmatprep.mubr.msk.f32.mxu1 %vm926_vm0, %v2976_v17  ;;  %v2994_v17 = vmul.f32 %v12476_v3, %v10599_v6 }
 0xaa4   : > { %7613 = vmatmul.mubr.msk.f32.gmra.mrb[46].mxu1 %vm926_vm0, %v2977_v19  ;;  %v2995_v19 = vmul.f32 %v12475_v60, %v2971_v38 }
 0xaa5   : > { %7615 = vmatprep.mubr.msk.f32.mxu1 %vm926_vm0, %v2978_v39  ;;  %v2996_v39 = vmul.f32 %v12478_v26, %v2972_v13 }
 0xaa8   : > { %7616 = vmatmul.mubr.msk.f32.gmra.mrb[48].mxu1 %vm926_vm0, %v2979_v12  ;;  %v2997_v12 = vmul.f32 %v12477_v53, %v2973_v22 }
 0xaa9   : > { %7618 = vmatprep.mubr.msk.f32.mxu1 %vm926_vm0, %v2980_v50  ;;  %v2998_v50 = vmul.f32 %v12480_v44, %v10599_v6 }
 0xaac   : > { %7619 = vmatmul.mubr.msk.f32.gmra.mrb[50].mxu1 %vm926_vm0, %v2981_v34  ;;  %v2999_v34 = vmul.f32 %v12479_v2, %v2971_v38 }
 0xaad   : > { %7621 = vmatprep.mubr.msk.f32.mxu1 %vm926_vm0, %v2982_v18  ;;  %v3000_v18 = vmul.f32 %v12481_v55, %v2972_v13 }
 0xab0   : > { %7622 = vmatmul.mubr.msk.f32.gmra.mrb[52].mxu1 %vm926_vm0, %v2983_v51  ;;  %v3001_v51 = vmul.f32 %v9459_v25, %v2973_v22 }
 0xab1   : > { %7624 = vmatprep.mubr.msk.f32.mxu1 %vm926_vm0, %v2984_v47  ;;  %v3002_v47 = vmul.f32 %v12483_v29, %v10599_v6 }
 0xab4   : > { %7625 = vmatmul.mubr.msk.f32.gmra.mrb[54].mxu1 %vm926_vm0, %v2985_v62  ;;  %v3003_v62 = vmul.f32 %v12482_v42, %v2971_v38 }
 0xab5   : > { %7627 = vmatprep.mubr.msk.f32.mxu1 %vm926_vm0, %v2986_v40  ;;  %v3004_v40 = vmul.f32 %v12485_v48, %v2972_v13  ;;  %v12505_v13 = vld [vmem:[#allocation61_spill] sm:$0xff] }
 0xab8   : > { %7628 = vmatmul.mubr.msk.f32.gmra.mrb[56].mxu1 %vm926_vm0, %v2987_v1  ;;  %v3005_v1 = vmul.f32 %v12484_v10, %v2973_v22 }
 0xab9   : > { %7630 = vmatprep.mubr.msk.f32.mxu1 %vm926_vm0, %v2988_v35 }
 0xabc   : > { %7631 = vmatmul.mubr.msk.f32.gmra.mrb[58].mxu1 %vm926_vm0, %v2989_v49  ;;  %v12503_v49 = vld [vmem:[#allocation60_spill] sm:$0xff] }
 0xabd   : > { %7633 = vmatprep.mubr.msk.f32.mxu1 %vm926_vm0, %v2990_v61  ;;  %v12504_v38 = vfloor.f32 %v12503_v49  ;;  %v12506_v61 = vfloor.f32 %v12505_v13  ;;  %v12511_v49 = vld [vmem:[#allocation66_spill] sm:$0xff] }
 0xabf   : > { %vm843_vm2 = vcmp.eq.f32.partialorder %v12504_v38, %v12488_v54  ;;  %vm842_vm4 = vcmp.eq.f32.partialorder %v12506_v61, %v12488_v54  ;;  %v12512_v38 = vfloor.f32 %v12511_v49 }
 0xac0   : > { %7634 = vmatmul.mubr.msk.f32.gmra.mrb[60].mxu1 %vm926_vm0, %v2991_v15 }
 0xac1   : > { %7636 = vmatprep.mubr.msk.f32.mxu1 %vm926_vm0, %v2992_v45  ;;  %vm846_vm7 = vcmp.eq.f32.partialorder %v12512_v38, %v12488_v54 }
 0xac4   : > { %7637 = vmatmul.mubr.msk.f32.gmra.mrb[62].mxu1 %vm926_vm0, %v2993_v4 }
 0xac5   : > { %7639 = vmatprep.mubr.msk.f32.mxu1 %vm926_vm0, %v2994_v17 }
 0xac8   : > { %7640 = vmatmul.mubr.msk.f32.gmra.mrb[64].mxu1 %vm926_vm0, %v2995_v19 }
 0xac9   : > { %7642 = vmatprep.mubr.msk.f32.mxu1 %vm926_vm0, %v2996_v39 }
 0xacc   : > { %7643 = vmatmul.mubr.msk.f32.gmra.mrb[66].mxu1 %vm926_vm0, %v2997_v12 }
 0xacd   : > { %7645 = vmatprep.mubr.msk.f32.mxu1 %vm926_vm0, %v2998_v50  ;;  %v12507_v50 = vld [vmem:[#allocation64_spill] sm:$0xff] }
 0xad0   : > { %7646 = vmatmul.mubr.msk.f32.gmra.mrb[68].mxu1 %vm926_vm0, %v2999_v34  ;;  %v12508_v34 = vfloor.f32 %v12507_v50 }
 0xad1   : > { %7648 = vmatprep.mubr.msk.f32.mxu1 %vm926_vm0, %v3000_v18 }
 0xad2   : > { %vm844_vm5 = vcmp.eq.f32.partialorder %v12508_v34, %v12488_v54 }
 0xad4   : > { %7649 = vmatmul.mubr.msk.f32.gmra.mrb[70].mxu1 %vm926_vm0, %v3001_v51  ;;  %v12509_v51 = vld [vmem:[#allocation63_spill] sm:$0xff] }
 0xad5   : > { %7651 = vmatprep.mubr.msk.f32.mxu1 %vm926_vm0, %v3002_v47  ;;  %v12510_v47 = vfloor.f32 %v12509_v51  ;;  %v12515_v51 = vld [vmem:[#allocation68_spill] sm:$0xff] }
 0xad7   : > { %vm845_vm6 = vcmp.eq.f32.partialorder %v12510_v47, %v12488_v54  ;;  %v12516_v47 = vfloor.f32 %v12515_v51  ;;  %v12519_v51 = vld [vmem:[#allocation71_spill] sm:$0xff] }
 0xad8   : > { %7652 = vmatmul.mubr.msk.f32.gmra.mrb[72].mxu1 %vm926_vm0, %v3003_v62 }
 0xad9   : > { %7654 = vmatprep.mubr.msk.f32.mxu1 %vm926_vm0, %v3004_v40  ;;  %vm848_vm9 = vcmp.eq.f32.partialorder %v12516_v47, %v12488_v54  ;;  %v12521_v47 = vld [vmem:[#allocation70_spill] sm:$0xff] }
 0xadc   : > { %7655 = vmatmul.mubr.msk.f32.gmra.mrb[74].mxu1 %vm926_vm0, %v3005_v1 }
 0xadd   : > { %7735 = vmatprep.mubr.msk.f32.mxu1 %vm926_vm0, %v10477_v37 }
 0xb6f   : > { %v10699_v6 = vpop.f32.mrb[48].mxu0 }
 0xb70   : > { %v10701_v35 = vpop.f32.mrb[49].mxu0 }
 0xb73   : > { %v10709_v15 = vpop.f32.mrb[50].mxu0  ;;  %v7611_v22 = vpop.f32.mrb[44].mxu1 }
 0xb74   : > { %v10711_v45 = vsel %vm843_vm2, %v7611_v22, -1e+30  ;;  %v10713_v4 = vpop.f32.mrb[51].mxu0  ;;  %v3188_v17 = vpop.f32.mrb[45].mxu1  ;;  %v12513_v22 = vld [vmem:[#allocation65_spill] sm:$0xff] }
 0xb75   : > { %v10715_v19 = vsel %vm842_vm4, %v3188_v17, -1e+30  ;;  %v3382_v39 = vsel %vm926_vm0, %v10711_v45, -inf  ;;  %v12514_v17 = vfloor.f32 %v12513_v22 }
 0xb76   : > { %3383 = vmax.xlane.f32.xlu1 %v3382_v39  ;;  %v3379_v12 = vsel %vm926_vm0, %v10715_v19, -inf }
 0xb77   : > { %3380 = vmax.xlane.f32.xlu0 %v3379_v12  ;;  %v7614_v18 = vpop.f32.mrb[46].mxu1  ;;  %vm847_vm8 = vcmp.eq.f32.partialorder %v12514_v17, %v12488_v54 }
 0xb78   : > { %v3198_v62 = vpop.f32.mrb[47].mxu1  ;;  %v10734_v13 = vsel %vm845_vm6, %v7614_v18, -1e+30 }
 0xb79   : > { %v10727_v40 = vsel %vm844_vm5, %v3198_v62, -1e+30  ;;  %v3388_v50 = vsel %vm926_vm0, %v10734_v13, -inf }
 0xb7a   : > { %v3385_v1 = vsel %vm926_vm0, %v10727_v40, -inf }
 0xb7b   : > { %3386 = vmax.xlane.f32.xlu0 %v3385_v1  ;;  %v7617_v61 = vpop.f32.mrb[48].mxu1  ;;  %v12517_v1 = vld [vmem:[#allocation67_spill] sm:$0xff] }
 0xb7c   : > { %v3208_v39 = vpop.f32.mrb[49].mxu1  ;;  %v10748_v18 = vsel %vm847_vm8, %v7617_v61, -1e+30  ;;  %v12518_v49 = vfloor.f32 %v12517_v1  ;;  %v12520_v61 = vfloor.f32 %v12519_v51  ;;  %v12522_v1 = vfloor.f32 %v12521_v47  ;;  %v12523_v51 = vld [vmem:[#allocation73_spill] sm:$0xff] }
 0xb7d   : > { %v10739_v12 = vsel %vm846_vm7, %v3208_v39, -1e+30  ;;  %v3394_v17 = vsel %vm926_vm0, %v10748_v18, -inf }
 0xb7e   : > { %v3391_v34 = vsel %vm926_vm0, %v10739_v12, -inf  ;;  %vm849_vm10 = vcmp.eq.f32.partialorder %v12518_v49, %v12488_v54  ;;  %vm850_vm11 = vcmp.eq.f32.partialorder %v12520_v61, %v12488_v54  ;;  %vm851_vm12 = vcmp.eq.f32.partialorder %v12522_v1, %v12488_v54  ;;  %v12525_v61 = vld [vmem:[#allocation69_spill] sm:$0xff] }
 0xb7f   : > { %3389 = vmax.xlane.f32.xlu0 %v3388_v50  ;;  %3392 = vmax.xlane.f32.xlu1 %v3391_v34  ;;  %v7620_v62 = vpop.f32.mrb[50].mxu1  ;;  %v12526_v47 = vfloor.f32 %v12525_v61 }
 0xb80   : > { %v3218_v38 = vpop.f32.mrb[51].mxu1  ;;  %v10762_v50 = vsel %vm849_vm10, %v7620_v62, -1e+30  ;;  %v12524_v62 = vfloor.f32 %v12523_v51  ;;  %v12527_v51 = vld [vmem:[#allocation75_spill] sm:$0xff] }
 0xb81   : > { %v10753_v22 = vsel %vm848_vm9, %v3218_v38, -1e+30  ;;  %v3400_v36 = vsel %vm926_vm0, %v10762_v50, -inf  ;;  %vm853_vm14 = vcmp.eq.f32.partialorder %v12526_v47, %v12488_v54 }
 0xb82   : > { %v3397_v39 = vsel %vm926_vm0, %v10753_v22, -inf  ;;  %vm852_vm13 = vcmp.eq.f32.partialorder %v12524_v62, %v12488_v54  ;;  %v12529_v62 = vld [vmem:[#allocation72_spill] sm:$0xff] }
 0xb83   : > { %3395 = vmax.xlane.f32.xlu0 %v3394_v17  ;;  %3398 = vmax.xlane.f32.xlu1 %v3397_v39  ;;  %v7623_v34 = vpop.f32.mrb[52].mxu1  ;;  %v12530_v61 = vfloor.f32 %v12529_v62 }
 0xb84   : > { %v3228_v49 = vpop.f32.mrb[53].mxu1  ;;  %v10776_v17 = vsel %vm851_vm12, %v7623_v34, -1e+30  ;;  %v12528_v34 = vfloor.f32 %v12527_v51  ;;  %v12531_v51 = vld [vmem:[#allocation28_spill] sm:$0xff] }
 0xb85   : > { %v10767_v38 = vsel %vm850_vm11, %v3228_v49, -1e+30  ;;  %v3406_v30 = vsel %vm926_vm0, %v10776_v17, -inf  ;;  %vm855_vm1 = vcmp.eq.f32.partialorder %v12530_v61, %v12488_v54 }
 0xb86   : > { %v3403_v37 = vsel %vm926_vm0, %v10767_v38, -inf  ;;  %vm854_vm15 = vcmp.eq.f32.partialorder %v12528_v34, %v12488_v54  ;;  %v12533_v34 = vld [vmem:[#allocation74_spill] sm:$0xff] }
 0xb87   : > { %3401 = vmax.xlane.f32.xlu0 %v3400_v36  ;;  %3404 = vmax.xlane.f32.xlu1 %v3403_v37  ;;  %v7626_v39 = vpop.f32.mrb[54].mxu1  ;;  %v12534_v62 = vfloor.f32 %v12533_v34 }
 0xb88   : > { %v3238_v1 = vpop.f32.mrb[55].mxu1  ;;  %v10790_v36 = vsel %vm853_vm14, %v7626_v39, -1e+30  ;;  %v12532_v39 = vfloor.f32 %v12531_v51  ;;  %v12535_v51 = vld [vmem:[#allocation29_spill] sm:$0xff] }
 0xb89   : > { %v10781_v49 = vsel %vm852_vm13, %v3238_v1, -1e+30  ;;  %v3412_v59 = vsel %vm926_vm0, %v10790_v36, -inf  ;;  %vm857_vm2 = vcmp.eq.f32.partialorder %v12534_v62, %v12488_v54 }
 0xb8a   : > { %v3409_v46 = vsel %vm926_vm0, %v10781_v49, -inf  ;;  %vm856_vm3 = vcmp.eq.f32.partialorder %v12532_v39, %v12488_v54  ;;  %v12537_v39 = vld [vmem:[#allocation76_spill] sm:$0xff] }
 0xb8b   : > { %3407 = vmax.xlane.f32.xlu0 %v3406_v30  ;;  %3410 = vmax.xlane.f32.xlu1 %v3409_v46  ;;  %v7629_v37 = vpop.f32.mrb[56].mxu1  ;;  %v12538_v34 = vfloor.f32 %v12537_v39 }
 0xb8c   : > { %v3248_v47 = vpop.f32.mrb[57].mxu1  ;;  %v10804_v30 = vsel %vm855_vm1, %v7629_v37, -1e+30  ;;  %v12536_v37 = vfloor.f32 %v12535_v51  ;;  %v12539_v51 = vld [vmem:[#allocation38_spill] sm:$0xff] }
 0xb8d   : > { %v10795_v1 = vsel %vm854_vm15, %v3248_v47, -1e+30  ;;  %v3418_v9 = vsel %vm926_vm0, %v10804_v30, -inf  ;;  %vm859_vm5 = vcmp.eq.f32.partialorder %v12538_v34, %v12488_v54 }
 0xb8e   : > { %v3415_v8 = vsel %vm926_vm0, %v10795_v1, -inf  ;;  %vm858_vm4 = vcmp.eq.f32.partialorder %v12536_v37, %v12488_v54  ;;  %v12541_v37 = vld [vmem:[#allocation77_spill] sm:$0xff] }
 0xb8f   : > { %3413 = vmax.xlane.f32.xlu0 %v3412_v59  ;;  %3416 = vmax.xlane.f32.xlu1 %v3415_v8  ;;  %v7632_v46 = vpop.f32.mrb[58].mxu1  ;;  %v12542_v39 = vfloor.f32 %v12541_v37 }
 0xb90   : > { %v3258_v61 = vpop.f32.mrb[59].mxu1  ;;  %v10818_v59 = vsel %vm857_vm2, %v7632_v46, -1e+30  ;;  %v12540_v46 = vfloor.f32 %v12539_v51  ;;  %v12543_v51 = vld [vmem:[#allocation34_spill] sm:$0xff] }
 0xb91   : > { %v10809_v47 = vsel %vm856_vm3, %v3258_v61, -1e+30  ;;  %v3424_v10 = vsel %vm926_vm0, %v10818_v59, -inf  ;;  %vm861_vm7 = vcmp.eq.f32.partialorder %v12542_v39, %v12488_v54 }
 0xb92   : > { %v3421_v48 = vsel %vm926_vm0, %v10809_v47, -inf  ;;  %vm860_vm6 = vcmp.eq.f32.partialorder %v12540_v46, %v12488_v54  ;;  %v12545_v46 = vld [vmem:[#allocation17_spill] sm:$0xff] }
 0xb93   : > { %3419 = vmax.xlane.f32.xlu0 %v3418_v9  ;;  %3422 = vmax.xlane.f32.xlu1 %v3421_v48  ;;  %v7635_v8 = vpop.f32.mrb[60].mxu1  ;;  %v12546_v37 = vfloor.f32 %v12545_v46 }
 0xb94   : > { %v3268_v62 = vpop.f32.mrb[61].mxu1  ;;  %v10832_v9 = vsel %vm859_vm5, %v7635_v8, -1e+30  ;;  %v12544_v8 = vfloor.f32 %v12543_v51  ;;  %v12547_v51 = vld [vmem:[#allocation40_spill] sm:$0xff]  ;;  %vm8753_vm5 = vmmov 0  }
 0xb95   : > { %v10823_v61 = vsel %vm858_vm4, %v3268_v62, -1e+30  ;;  %v3430_v42 = vsel %vm926_vm0, %v10832_v9, -inf  ;;  %vm863_vm9 = vcmp.eq.f32.partialorder %v12546_v37, %v12488_v54 }
 0xb96   : > { %v3427_v29 = vsel %vm926_vm0, %v10823_v61, -inf  ;;  %vm862_vm8 = vcmp.eq.f32.partialorder %v12544_v8, %v12488_v54  ;;  %v12549_v8 = vld [vmem:[#allocation35_spill] sm:$0xff] }
 0xb97   : > { %3425 = vmax.xlane.f32.xlu0 %v3424_v10  ;;  %3428 = vmax.xlane.f32.xlu1 %v3427_v29  ;;  %v7638_v48 = vpop.f32.mrb[62].mxu1  ;;  %v12550_v46 = vfloor.f32 %v12549_v8 }
 0xb98   : > { %v3278_v34 = vpop.f32.mrb[63].mxu1  ;;  %v10846_v10 = vsel %vm861_vm7, %v7638_v48, -1e+30  ;;  %v12548_v48 = vfloor.f32 %v12547_v51  ;;  %v12551_v51 = vld [vmem:[#allocation44_spill] sm:$0xff] }
 0xb99   : > { %v10837_v62 = vsel %vm860_vm6, %v3278_v34, -1e+30  ;;  %v3436_v44 = vsel %vm926_vm0, %v10846_v10, -inf  ;;  %vm865_vm11 = vcmp.eq.f32.partialorder %v12550_v46, %v12488_v54  ;;  %vm5240_vm6 = vcmask 64512  }
 0xb9a   : > { %v3433_v55 = vsel %vm926_vm0, %v10837_v62, -inf  ;;  %vm864_vm10 = vcmp.eq.f32.partialorder %v12548_v48, %v12488_v54  ;;  %v12553_v48 = vld [vmem:[#allocation20_spill] sm:$0xff] }
 0xb9b   : > { %3431 = vmax.xlane.f32.xlu0 %v3430_v42  ;;  %3434 = vmax.xlane.f32.xlu1 %v3433_v55  ;;  %v7641_v29 = vpop.f32.mrb[64].mxu1  ;;  %v12554_v8 = vfloor.f32 %v12553_v48 }
 0xb9c   : > { %v3288_v39 = vpop.f32.mrb[65].mxu1  ;;  %v10860_v42 = vsel %vm863_vm9, %v7641_v29, -1e+30  ;;  %v12552_v29 = vfloor.f32 %v12551_v51  ;;  %v12555_v51 = vld [vmem:[#allocation36_spill] sm:$0xff] }
 0xb9d   : > { %v10851_v34 = vsel %vm862_vm8, %v3288_v39, -1e+30  ;;  %v3442_v26 = vsel %vm926_vm0, %v10860_v42, -inf  ;;  %vm867_vm13 = vcmp.eq.f32.partialorder %v12554_v8, %v12488_v54 }
 0xb9e   : > { %v3439_v25 = vsel %vm926_vm0, %v10851_v34, -inf  ;;  %vm866_vm12 = vcmp.eq.f32.partialorder %v12552_v29, %v12488_v54  ;;  %v12557_v29 = vld [vmem:[#allocation22_spill] sm:$0xff] }
 0xb9f   : > { %3437 = vmax.xlane.f32.xlu0 %v3436_v44  ;;  %3440 = vmax.xlane.f32.xlu1 %v3439_v25  ;;  %v7644_v55 = vpop.f32.mrb[66].mxu1  ;;  %v12558_v48 = vfloor.f32 %v12557_v29 }
 0xba0   : > { %v3298_v37 = vpop.f32.mrb[67].mxu1  ;;  %v10874_v44 = vsel %vm865_vm11, %v7644_v55, -1e+30  ;;  %v12556_v55 = vfloor.f32 %v12555_v51  ;;  %v12559_v51 = vld [vmem:[#allocation41_spill] sm:$0xff] }
 0xba1   : > { %v10865_v39 = vsel %vm864_vm10, %v3298_v37, -1e+30  ;;  %v3448_v3 = vsel %vm926_vm0, %v10874_v44, -inf  ;;  %vm869_vm15 = vcmp.eq.f32.partialorder %v12558_v48, %v12488_v54 }
 0xba2   : > { %v3445_v2 = vsel %vm926_vm0, %v10865_v39, -inf  ;;  %vm868_vm14 = vcmp.eq.f32.partialorder %v12556_v55, %v12488_v54  ;;  %v12561_v55 = vld [vmem:[#allocation26_spill] sm:$0xff] }
 0xba3   : > { %3443 = vmax.xlane.f32.xlu0 %v3442_v26  ;;  %3446 = vmax.xlane.f32.xlu1 %v3445_v2  ;;  %v7647_v25 = vpop.f32.mrb[68].mxu1  ;;  %v12562_v29 = vfloor.f32 %v12561_v55 }
 0xba4   : > { %v3308_v46 = vpop.f32.mrb[69].mxu1  ;;  %v10888_v26 = vsel %vm867_vm13, %v7647_v25, -1e+30  ;;  %v12560_v25 = vfloor.f32 %v12559_v51  ;;  %v12563_v51 = vld [vmem:[#allocation45_spill] sm:$0xff] }
 0xba5   : > { %v10879_v37 = vsel %vm866_vm12, %v3308_v46, -1e+30  ;;  %v3454_v31 = vsel %vm926_vm0, %v10888_v26, -inf  ;;  %vm871_vm3 = vcmp.eq.f32.partialorder %v12562_v29, %v12488_v54 }
 0xba6   : > { %v3451_v53 = vsel %vm926_vm0, %v10879_v37, -inf  ;;  %vm870_vm1 = vcmp.eq.f32.partialorder %v12560_v25, %v12488_v54  ;;  %v12565_v25 = vld [vmem:[#allocation31_spill] sm:$0xff] }
 0xba7   : > { %3449 = vmax.xlane.f32.xlu0 %v3448_v3  ;;  %3452 = vmax.xlane.f32.xlu1 %v3451_v53  ;;  %v7650_v2 = vpop.f32.mrb[70].mxu1  ;;  %v12566_v55 = vfloor.f32 %v12565_v25 }
 0xba8   : > { %v3318_v8 = vpop.f32.mrb[71].mxu1  ;;  %v10902_v3 = vsel %vm869_vm15, %v7650_v2, -1e+30  ;;  %v12564_v2 = vfloor.f32 %v12563_v51 }
 0xba9   : > { %v10893_v46 = vsel %vm868_vm14, %v3318_v8, -1e+30  ;;  %v3460_v43 = vsel %vm926_vm0, %v10902_v3, -inf  ;;  %vm873_vm4 = vcmp.eq.f32.partialorder %v12566_v55, %v12488_v54 }
 0xbaa   : > { %v3457_v60 = vsel %vm926_vm0, %v10893_v46, -inf  ;;  %vm872_vm2 = vcmp.eq.f32.partialorder %v12564_v2, %v12488_v54 }
 0xbab   : > { %3455 = vmax.xlane.f32.xlu0 %v3454_v31  ;;  %3458 = vmax.xlane.f32.xlu1 %v3457_v60  ;;  %v7653_v53 = vpop.f32.mrb[72].mxu1 }
 0xbac   : > { %v3328_v48 = vpop.f32.mrb[73].mxu1  ;;  %v10916_v31 = vsel %vm871_vm3, %v7653_v53, -1e+30 }
 0xbad   : > { %v10907_v8 = vsel %vm870_vm1, %v3328_v48, -1e+30  ;;  %v3466_v52 = vsel %vm926_vm0, %v10916_v31, -inf }
 0xbae   : > { %v3463_v41 = vsel %vm926_vm0, %v10907_v8, -inf }
 0xbaf   : > { %3461 = vmax.xlane.f32.xlu0 %v3460_v43  ;;  %3464 = vmax.xlane.f32.xlu1 %v3463_v41  ;;  %v7656_v60 = vpop.f32.mrb[74].mxu1 }
 0xbb0   : > { %v3338_v29 = vpop.f32.mrb[75].mxu1  ;;  %v10927_v51 = vsel %vm873_vm4, %v7656_v60, -1e+30 }
 0xbb1   : > { %v10921_v48 = vsel %vm872_vm2, %v3338_v29, -1e+30  ;;  %v3472_v43 = vsel %vm926_vm0, %v10927_v51, -inf }
 0xbb2   : > { %v3469_v56 = vsel %vm926_vm0, %v10921_v48, -inf }
 0xbb3   : > { %3467 = vmax.xlane.f32.xlu0 %v3466_v52  ;;  %3470 = vmax.xlane.f32.xlu1 %v3469_v56 }
 0xbb7   : > { %3473 = vmax.xlane.f32.xlu0 %v3472_v43 }
 0xc03   : > { %v3384_v41 = vpop.xlane.xlu1 %3383 }
 0xc04   : > { %v3476_v54 = vsub.f32 %v10711_v45, %v3384_v41  ;;  %v3381_v53 = vpop.xlane.xlu0 %3380 }
 0xc05   : > { %v3475_v2 = vsub.f32 %v10715_v19, %v3381_v53 }
 0xc06   : > { %v3509_v25 = vmul.f32 1.442695, %v3476_v54 }
 0xc07   : > { %v3507_v55 = vmul.f32 1.442695, %v3475_v2 }
 0xc08   : > { %8409 = vpow2.f32 %v3509_v25  ;;  %v3387_v29 = vpop.xlane.xlu0 %3386 }
 0xc09   : > { %8411 = vpow2.f32 %v3507_v55  ;;  %v3477_v60 = vsub.f32 %v10727_v40, %v3387_v29 }
 0xc0b   : > { %v3511_v33 = vmul.f32 1.442695, %v3477_v60 }
 0xc0c   : > { %v3390_v52 = vpop.xlane.xlu0 %3389  ;;  %v3393_v56 = vpop.xlane.xlu1 %3392 }
 0xc0d   : > { %8413 = vpow2.f32 %v3511_v33  ;;  %v3478_v63 = vsub.f32 %v10734_v13, %v3390_v52  ;;  %v3479_v43 = vsub.f32 %v10739_v12, %v3393_v56 }
 0xc0f   : > { %v3513_v21 = vmul.f32 1.442695, %v3478_v63  ;;  %v3515_v45 = vmul.f32 1.442695, %v3479_v43 }
 0xc10   : > { %v3396_v41 = vpop.xlane.xlu0 %3395  ;;  %v3399_v11 = vpop.xlane.xlu1 %3398 }
 0xc11   : > { %8415 = vpow2.f32 %v3513_v21  ;;  %v3480_v19 = vsub.f32 %v10748_v18, %v3396_v41  ;;  %v3481_v54 = vsub.f32 %v10753_v22, %v3399_v11 }
 0xc12   : > { %v10938_v53 = vpop.eup %8409  ;;  %8417 = vpow2.f32 %v3515_v45 }
 0xc13   : > { %v10940_v40 = vpop.eup %8411  ;;  %v3517_v2 = vmul.f32 1.442695, %v3480_v19  ;;  %v3519_v33 = vmul.f32 1.442695, %v3481_v54  ;;  %v3574_v13 = vsel %vm926_vm0, %v10938_v53, 0.0 }
 0xc14   : > { %v3402_v12 = vpop.xlane.xlu0 %3401  ;;  %v3405_v63 = vpop.xlane.xlu1 %3404  ;;  %3575 = vadd.xlane.f32.xlu0 %v3574_v13  ;;  %v3571_v21 = vsel %vm926_vm0, %v10940_v40, 0.0 }
 0xc15   : > { %8419 = vpow2.f32 %v3517_v2  ;;  %v3482_v18 = vsub.f32 %v10762_v50, %v3402_v12  ;;  %3572 = vadd.xlane.f32.xlu1 %v3571_v21  ;;  %v3483_v25 = vsub.f32 %v10767_v38, %v3405_v63 }
 0xc16   : > { %8421 = vpow2.f32 %v3519_v33 }
 0xc17   : > { %v10947_v11 = vpop.eup %8413  ;;  %v3521_v22 = vmul.f32 1.442695, %v3482_v18  ;;  %v3523_v43 = vmul.f32 1.442695, %v3483_v25 }
 0xc18   : > { %v3408_v55 = vpop.xlane.xlu0 %3407  ;;  %v3411_v29 = vpop.xlane.xlu1 %3410  ;;  %v3577_v60 = vsel %vm926_vm0, %v10947_v11, 0.0 }
 0xc19   : > { %8423 = vpow2.f32 %v3521_v22  ;;  %v3484_v52 = vsub.f32 %v10776_v17, %v3408_v55  ;;  %3578 = vadd.xlane.f32.xlu1 %v3577_v60  ;;  %v3485_v33 = vsub.f32 %v10781_v49, %v3411_v29 }
 0xc1b   : > { %v10953_v56 = vpop.eup %8415  ;;  %v3525_v50 = vmul.f32 1.442695, %v3484_v52  ;;  %v3527_v25 = vmul.f32 1.442695, %v3485_v33 }
 0xc1c   : > { %v10955_v45 = vpop.eup %8417  ;;  %v3414_v41 = vpop.xlane.xlu0 %3413  ;;  %v3580_v38 = vsel %vm926_vm0, %v10953_v56, 0.0 }
 0xc1d   : > { %v10957_v19 = vpop.xlane.xlu1 %3416  ;;  %8425 = vpow2.f32 %v3525_v50  ;;  %v3486_v54 = vsub.f32 %v10790_v36, %v3414_v41  ;;  %3581 = vadd.xlane.f32.xlu0 %v3580_v38  ;;  %v3583_v17 = vsel %vm926_vm0, %v10955_v45, 0.0 }
 0xc1e   : > { %3584 = vadd.xlane.f32.xlu1 %v3583_v17  ;;  %8427 = vpow2.f32 %v3523_v43 }
 0xc1f   : > { %v10964_v2 = vpop.eup %8419  ;;  %v3529_v13 = vmul.f32 1.442695, %v3486_v54 }
 0xc20   : > { %v10967_v12 = vpop.eup %8421  ;;  %v3420_v63 = vpop.xlane.xlu0 %3419  ;;  %v3586_v21 = vsel %vm926_vm0, %v10964_v2, 0.0 }
 0xc21   : > { %3587 = vadd.xlane.f32.xlu0 %v3586_v21  ;;  %v3589_v36 = vsel %vm926_vm0, %v10967_v12, 0.0  ;;  %v3423_v18 = vpop.xlane.xlu1 %3422  ;;  %8429 = vpow2.f32 %v3529_v13  ;;  %v3488_v55 = vsub.f32 %v10804_v30, %v3420_v63 }
 0xc22   : > { %3590 = vadd.xlane.f32.xlu1 %v3589_v36  ;;  %8431 = vpow2.f32 %v3527_v25  ;;  %v3489_v30 = vsub.f32 %v10809_v47, %v3423_v18 }
 0xc23   : > { %v10973_v22 = vpop.eup %8423  ;;  %v3533_v52 = vmul.f32 1.442695, %v3488_v55 }
 0xc24   : > { %v3426_v49 = vpop.xlane.xlu0 %3425  ;;  %v3592_v29 = vsel %vm926_vm0, %v10973_v22, 0.0 }
 0xc25   : > { %3593 = vadd.xlane.f32.xlu0 %v3592_v29  ;;  %v3490_v43 = vsub.f32 %v10818_v59, %v3426_v49  ;;  %v3429_v50 = vpop.xlane.xlu1 %3428  ;;  %8433 = vpow2.f32 %v3533_v52  ;;  %v3535_v59 = vmul.f32 1.442695, %v3489_v30 }
 0xc26   : > { %v3491_v47 = vsub.f32 %v10823_v61, %v3429_v50 }
 0xc27   : > { %v10978_v60 = vpop.eup %8425  ;;  %v3537_v17 = vmul.f32 1.442695, %v3490_v43 }
 0xc28   : > { %v3598_v41 = vsel %vm926_vm0, %v10978_v60, 0.0  ;;  %v10983_v38 = vpop.eup %8427  ;;  %v3432_v54 = vpop.xlane.xlu0 %3431  ;;  %v3539_v43 = vmul.f32 1.442695, %v3491_v47 }
 0xc29   : > { %3599 = vadd.xlane.f32.xlu0 %v3598_v41  ;;  %v3595_v33 = vsel %vm926_vm0, %v10983_v38, 0.0  ;;  %v3435_v63 = vpop.xlane.xlu1 %3434  ;;  %8435 = vpow2.f32 %v3537_v17  ;;  %v3492_v21 = vsub.f32 %v10832_v9, %v3432_v54 }
 0xc2a   : > { %8437 = vpow2.f32 %v3535_v59 }
 0xc2b   : > { %v10988_v13 = vpop.eup %8429  ;;  %v3541_v18 = vmul.f32 1.442695, %v3492_v21 }
 0xc2c   : > { %v3438_v36 = vpop.xlane.xlu0 %3437  ;;  %v3604_v25 = vsel %vm926_vm0, %v10988_v13, 0.0  ;;  %v10993_v55 = vpop.eup %8431 }
 0xc2d   : > { %3596 = vadd.xlane.f32.xlu0 %v3595_v33  ;;  %v3441_v49 = vpop.xlane.xlu1 %3440  ;;  %v3601_v29 = vsel %vm926_vm0, %v10993_v55, 0.0  ;;  %8439 = vpow2.f32 %v3541_v18  ;;  %v3494_v41 = vsub.f32 %v10846_v10, %v3438_v36 }
 0xc2e   : > { %8441 = vpow2.f32 %v3539_v43  ;;  %v3495_v10 = vsub.f32 %v10851_v34, %v3441_v49 }
 0xc2f   : > { %v11000_v52 = vpop.eup %8433  ;;  %v3545_v30 = vmul.f32 1.442695, %v3494_v41 }
 0xc30   : > { %v3444_v9 = vpop.xlane.xlu0 %3443  ;;  %v3610_v54 = vsel %vm926_vm0, %v11000_v52, 0.0  ;;  %v3547_v18 = vmul.f32 1.442695, %v3495_v10 }
 0xc31   : > { %3605 = vadd.xlane.f32.xlu0 %v3604_v25  ;;  %v3447_v50 = vpop.xlane.xlu1 %3446  ;;  %8443 = vpow2.f32 %v3545_v30 }
 0xc32   : > { %v3497_v49 = vsub.f32 %v10865_v39, %v3447_v50 }
 0xc33   : > { %2870 = vrot.lane.b32.xlu1 %v10595_v5, %s12501_s25  ;;  %v11005_v61 = vpop.eup %8435  ;;  %v3493_v5 = vsub.f32 %v10837_v62, %v3435_v63  ;;  %v3487_v62 = vsub.f32 %v10795_v1, %v10957_v19 }
 0xc34   : > { %v3450_v17 = vpop.xlane.xlu0 %3449  ;;  %v3616_v33 = vsel %vm926_vm0, %v11005_v61, 0.0  ;;  %v11010_v59 = vpop.eup %8437 }
 0xc35   : > { %3602 = vadd.xlane.f32.xlu0 %v3601_v29  ;;  %v3543_v21 = vmul.f32 1.442695, %v3493_v5  ;;  %v3453_v36 = vpop.xlane.xlu1 %3452  ;;  %v3613_v25 = vsel %vm926_vm0, %v11010_v59, 0.0  ;;  %v3496_v29 = vsub.f32 %v10860_v42, %v3444_v9  ;;  %v3531_v34 = vmul.f32 1.442695, %v3487_v62 }
 0xc36   : > { %v3498_v1 = vsub.f32 %v10874_v44, %v3450_v17  ;;  %v3551_v42 = vmul.f32 1.442695, %v3497_v49  ;;  %v3499_v9 = vsub.f32 %v10879_v37, %v3453_v36 }
 0xc37   : > { %v11015_v47 = vpop.eup %8439  ;;  %8445 = vpow2.f32 %v3543_v21  ;;  %v3549_v5 = vmul.f32 1.442695, %v3496_v29 }
 0xc38   : > { %v3456_v63 = vpop.xlane.xlu0 %3455  ;;  %v3622_v43 = vsel %vm926_vm0, %v11015_v47, 0.0  ;;  %v11022_v41 = vpop.eup %8441  ;;  %8447 = vpow2.f32 %v3547_v18  ;;  %v3553_v21 = vmul.f32 1.442695, %v3498_v1  ;;  %v3555_v17 = vmul.f32 1.442695, %v3499_v9 }
 0xc39   : > { %3611 = vadd.xlane.f32.xlu0 %v3610_v54  ;;  %v3459_v54 = vpop.xlane.xlu1 %3458  ;;  %v3619_v30 = vsel %vm926_vm0, %v11022_v41, 0.0  ;;  %8449 = vpow2.f32 %v3531_v34  ;;  %v3500_v39 = vsub.f32 %v10888_v26, %v3456_v63 }
 0xc3a   : > { %8451 = vpow2.f32 %v3549_v5 }
 0xc3b   : > { %8453 = vpow2.f32 %v3551_v42  ;;  %v3557_v18 = vmul.f32 1.442695, %v3500_v39 }
 0xc3c   : > { %v3462_v19 = vpop.xlane.xlu0 %3461  ;;  %8455 = vpow2.f32 %v3553_v21 }
 0xc3d   : > { %3617 = vadd.xlane.f32.xlu0 %v3616_v33  ;;  %v11028_v33 = vpop.eup %8443  ;;  %v3465_v50 = vpop.xlane.xlu1 %3464  ;;  %v3502_v37 = vsub.f32 %v10902_v3, %v3462_v19  ;;  %8457 = vpow2.f32 %v3555_v17 }
 0xc3e   : > { %v3628_v10 = vsel %vm926_vm0, %v11028_v33, 0.0  ;;  %v3503_v29 = vsub.f32 %v10907_v8, %v3465_v50  ;;  %8459 = vpow2.f32 %v3557_v18 }
 0xc40   : > { %v3468_v62 = vpop.xlane.xlu0 %3467  ;;  %v3563_v1 = vmul.f32 1.442695, %v3503_v29 }
 0xc41   : > { %3614 = vadd.xlane.f32.xlu0 %v3613_v25  ;;  %v11034_v44 = vpop.eup %8445  ;;  %v3501_v25 = vsub.f32 %v10893_v46, %v3459_v54  ;;  %v3561_v46 = vmul.f32 1.442695, %v3502_v37  ;;  %v3504_v49 = vsub.f32 %v10916_v31, %v3468_v62 }
 0xc42   : > { %v3625_v36 = vsel %vm926_vm0, %v11034_v44, 0.0  ;;  %v11040_v26 = vpop.eup %8447 }
 0xc43   : > { %v3559_v63 = vmul.f32 1.442695, %v3501_v25  ;;  %v11043_v34 = vpop.eup %8449  ;;  %v3631_v3 = vsel %vm926_vm0, %v11040_v26, 0.0  ;;  %v3565_v42 = vmul.f32 1.442695, %v3504_v49 }
 0xc44   : > { %v3474_v54 = vpop.xlane.xlu0 %3473  ;;  %v11048_v5 = vpop.eup %8451  ;;  %v3607_v8 = vsel %vm926_vm0, %v11043_v34, 0.0 }
 0xc45   : > { %3623 = vadd.xlane.f32.xlu0 %v3622_v43  ;;  %v3471_v43 = vpop.xlane.xlu1 %3470  ;;  %8461 = vpow2.f32 %v3559_v63  ;;  %v3506_v31 = vsub.f32 %v10927_v51, %v3474_v54  ;;  %v3634_v9 = vsel %vm926_vm0, %v11048_v5, 0.0 }
 0xc46   : > { %v3505_v19 = vsub.f32 %v10921_v48, %v3471_v43  ;;  %8463 = vpow2.f32 %v3561_v46 }
 0xc47   : > { %8465 = vpow2.f32 %v3563_v1 }
 0xc48   : > { %v3567_v39 = vmul.f32 1.442695, %v3505_v19  ;;  %8467 = vpow2.f32 %v3565_v42 }
 0xc49   : > { %3620 = vadd.xlane.f32.xlu0 %v3619_v30  ;;  %v11053_v30 = vpop.eup %8453 }
 0xc4a   : > { %v11058_v21 = vpop.eup %8455  ;;  %v3637_v48 = vsel %vm926_vm0, %v11053_v30, 0.0  ;;  %8469 = vpow2.f32 %v3567_v39 }
 0xc4b   : > { %v11062_v50 = vpop.eup %8457  ;;  %v3640_v51 = vsel %vm926_vm0, %v11058_v21, 0.0 }
 0xc4c   : > { %v11066_v17 = vpop.eup %8459  ;;  %v3643_v25 = vsel %vm926_vm0, %v11062_v50, 0.0 }
 0xc4d   : > { %3629 = vadd.xlane.f32.xlu0 %v3628_v10  ;;  %v3569_v10 = vmul.f32 1.442695, %v3506_v31  ;;  %v3646_v18 = vsel %vm926_vm0, %v11066_v17, 0.0 }
 0xc4f   : > { %v11070_v62 = vpop.eup %8461  ;;  %8471 = vpow2.f32 %v3569_v10 }
 0xc50   : > { %v11074_v37 = vpop.eup %8463 }
 0xc51   : > { %3626 = vadd.xlane.f32.xlu0 %v3625_v36  ;;  %v3649_v36 = vsel %vm926_vm0, %v11070_v62, 0.0  ;;  %v11078_v63 = vpop.eup %8465  ;;  %v3652_v29 = vsel %vm926_vm0, %v11074_v37, 0.0 }
 0xc52   : > { %v11082_v43 = vpop.eup %8467  ;;  %v3655_v46 = vsel %vm926_vm0, %v11078_v63, 0.0 }
 0xc53   : > { %v3658_v54 = vsel %vm926_vm0, %v11082_v43, 0.0 }
 0xc54   : > { %v11086_v49 = vpop.eup %8469 }
 0xc55   : > { %3632 = vadd.xlane.f32.xlu0 %v3631_v3  ;;  %v3661_v1 = vsel %vm926_vm0, %v11086_v49, 0.0 }
 0xc57   : > { %3608 = vadd.xlane.f32.xlu1 %v3607_v8 }
 0xc59   : > { %3635 = vadd.xlane.f32.xlu0 %v3634_v9  ;;  %v11090_v3 = vpop.eup %8471 }
 0xc5a   : > { %v3664_v19 = vsel %vm926_vm0, %v11090_v3, 0.0 }
 0xc5b   : > { %3638 = vadd.xlane.f32.xlu1 %v3637_v48 }
 0xc5d   : > { %3641 = vadd.xlane.f32.xlu0 %v3640_v51 }
 0xc5f   : > { %3644 = vadd.xlane.f32.xlu1 %v3643_v25 }
 0xc61   : > { %3647 = vadd.xlane.f32.xlu0 %v3646_v18 }
 0xc63   : > { %3650 = vadd.xlane.f32.xlu1 %v3649_v36 }
 0xc65   : > { %3653 = vadd.xlane.f32.xlu0 %v3652_v29 }
 0xc67   : > { %3656 = vadd.xlane.f32.xlu1 %v3655_v46 }
 0xc69   : > { %3659 = vadd.xlane.f32.xlu0 %v3658_v54 }
 0xc6b   : > { %3662 = vadd.xlane.f32.xlu1 %v3661_v1 }
 0xc6d   : > { %3665 = vadd.xlane.f32.xlu0 %v3664_v19 }
 0xca1   : > { %v3576_v42 = vpop.xlane.xlu0 %3575 }
 0xca2   : > { %v3573_v8 = vpop.xlane.xlu1 %3572 }
 0xca3   : > { %8473 = vrcp.f32 %v3573_v8 }
 0xca4   : > { %8475 = vrcp.f32 %v3576_v42 }
 0xca6   : > { %v3579_v31 = vpop.xlane.xlu1 %3578 }
 0xca7   : > { %8477 = vrcp.f32 %v3579_v31 }
 0xcaa   : > { %v3582_v9 = vpop.xlane.xlu0 %3581 }
 0xcab   : > { %v3585_v39 = vpop.xlane.xlu1 %3584  ;;  %8479 = vrcp.f32 %v3582_v9 }
 0xcac   : > { %8481 = vrcp.f32 %v3585_v39 }
 0xcad   : > { %v8474_v48 = vpop.eup %8473 }
 0xcae   : > { %v3588_v10 = vpop.xlane.xlu0 %3587  ;;  %v3668_v51 = vmul.f32 %v8474_v48, %v10940_v40  ;;  %v8476_v31 = vpop.eup %8475 }
 0xcaf   : > { %v3591_v25 = vpop.xlane.xlu1 %3590  ;;  %8483 = vrcp.f32 %v3588_v10 }
 0xcb0   : > { %7665 = vmatprep.mubr.msk.f32.mxu0 %vm926_vm0, %v3668_v51  ;;  %8485 = vrcp.f32 %v3591_v25 }
 0xcb1   : > { %v8478_v48 = vpop.eup %8477 }
 0xcb2   : > { %v3594_v18 = vpop.xlane.xlu0 %3593 }
 0xcb3   : > { %v2871_v36 = vpop.permute.xlu1 %2870  ;;  %8487 = vrcp.f32 %v3594_v18 }
 0xcb4   : > { %v2952_v29 = vadd.f32 %v10701_v35, %v2871_v36  ;;  %v2957_v46 = vadd.f32 %v10699_v6, %v2871_v36  ;;  %v2962_v54 = vadd.f32 %v10713_v4, %v2871_v36  ;;  %v2967_v1 = vadd.f32 %v10709_v15, %v2871_v36 }
 0xcb5   : > { %v3670_v6 = vmul.f32 %v8476_v31, %v10938_v53  ;;  %v8480_v15 = vpop.eup %8479  ;;  %v3672_v4 = vmul.f32 %v8478_v48, %v10947_v11 }
 0xcb6   : > { %v3600_v19 = vpop.xlane.xlu0 %3599  ;;  %v8074_v8 = vpack.c.bf16 %v2957_v46, %v2952_v29  ;;  %v8078_v40 = vpack.c.bf16 %v2967_v1, %v2962_v54  ;;  %v8482_v9 = vpop.eup %8481  ;;  %v3674_v10 = vmul.f32 %v8480_v15, %v10953_v56 }
 0xcb7   : > { %v3676_v25 = vmul.f32 %v8482_v9, %v10955_v45 }
 0xcb8   : > { %8075 = vmatprep.subr.bf16.mxu0 %v8074_v8 }
 0xcb9   : > { %8077 = vmatpush3.bf16.msra.mxu0 %v8074_v8  ;;  %v8484_v51 = vpop.eup %8483 }
 0xcba   : > { %8079 = vmatprep.subr.bf16.mxu0 %v8078_v40  ;;  %v3597_v42 = vpop.xlane.xlu0 %3596  ;;  %v8486_v18 = vpop.eup %8485  ;;  %v3678_v11 = vmul.f32 %v8484_v51, %v10964_v2 }
 0xcbb   : > { %8489 = vrcp.f32 %v3597_v42  ;;  %v3680_v29 = vmul.f32 %v8486_v18, %v10967_v12 }
 0xcbc   : > { %8491 = vrcp.f32 %v3600_v19 }
 0xcbd   : > { %8081 = vmatpush3.bf16.msra.mxu0 %v8078_v40  ;;  %v8488_v36 = vpop.eup %8487 }
 0xcbe   : > { %v3606_v35 = vpop.xlane.xlu0 %3605  ;;  %v3682_v45 = vmul.f32 %v8488_v36, %v10973_v22 }
 0xcc0   : > { %7666 = vmatmul.mubr.msk.f32.vlgmr.msra.gmra.mrb[52].mxu0 %vm926_vm0, %v3670_v6 }
 0xcc1   : > { %7668 = vmatprep.mubr.msk.f32.mxu0 %vm926_vm0, %v3672_v4 }
 0xcc2   : > { %v3603_v39 = vpop.xlane.xlu0 %3602 }
 0xcc3   : > { %8493 = vrcp.f32 %v3603_v39 }
 0xcc4   : > { %7669 = vmatmul.mubr.msk.f32.gmra.mrb[54].mxu0 %vm926_vm0, %v3674_v10  ;;  %8495 = vrcp.f32 %v3606_v35 }
 0xcc5   : > { %7671 = vmatprep.mubr.msk.f32.mxu0 %vm926_vm0, %v3676_v25  ;;  %v8490_v46 = vpop.eup %8489 }
 0xcc6   : > { %v3612_v53 = vpop.xlane.xlu0 %3611  ;;  %v8492_v54 = vpop.eup %8491  ;;  %v3684_v1 = vmul.f32 %v8490_v46, %v10983_v38 }
 0xcc7   : > { %v3686_v8 = vmul.f32 %v8492_v54, %v10978_v60  ;;  %8497 = vrcp.f32 %v3612_v53 }
 0xcc8   : > { %7672 = vmatmul.mubr.msk.f32.gmra.mrb[56].mxu0 %vm926_vm0, %v3678_v11 }
 0xcc9   : > { %7674 = vmatprep.mubr.msk.f32.mxu0 %vm926_vm0, %v3680_v29 }
 0xcca   : > { %v3618_v56 = vpop.xlane.xlu0 %3617 }
 0xccc   : > { %7675 = vmatmul.mubr.msk.f32.gmra.mrb[58].mxu0 %vm926_vm0, %v3682_v45 }
 0xccd   : > { %v8494_v19 = vpop.eup %8493  ;;  %7677 = vmatprep.mubr.msk.f32.mxu0 %vm926_vm0, %v3684_v1 }
 0xcce   : > { %v3615_v2 = vpop.xlane.xlu0 %3614  ;;  %v3688_v12 = vmul.f32 %v8494_v19, %v10993_v55  ;;  %v8496_v40 = vpop.eup %8495 }
 0xccf   : > { %v3690_v22 = vmul.f32 %v8496_v40, %v10988_v13  ;;  %8499 = vrcp.f32 %v3615_v2 }
 0xcd0   : > { %7678 = vmatmul.mubr.msk.f32.gmra.mrb[60].mxu0 %vm926_vm0, %v3686_v8 }
 0xcd1   : > { %7680 = vmatprep.mubr.msk.f32.mxu0 %vm926_vm0, %v3688_v12  ;;  %v8498_v15 = vpop.eup %8497 }
 0xcd2   : > { %v3624_v42 = vpop.xlane.xlu0 %3623  ;;  %v3694_v51 = vmul.f32 %v8498_v15, %v11000_v52 }
 0xcd4   : > { %7681 = vmatmul.mubr.msk.f32.gmra.mrb[62].mxu0 %vm926_vm0, %v3690_v22 }
 0xcd6   : > { %v3621_v38 = vpop.xlane.xlu0 %3620 }
 0xcd9   : > { %v8500_v9 = vpop.eup %8499 }
 0xcda   : > { %v3630_v31 = vpop.xlane.xlu0 %3629  ;;  %v3696_v18 = vmul.f32 %v8500_v9, %v11010_v59 }
 0xcde   : > { %v3627_v48 = vpop.xlane.xlu0 %3626 }
 0xce2   : > { %v3633_v6 = vpop.xlane.xlu0 %3632 }
 0xce4   : > { %v3609_v35 = vpop.xlane.xlu1 %3608 }
 0xce5   : > { %8501 = vrcp.f32 %v3609_v35 }
 0xce6   : > { %v3636_v60 = vpop.xlane.xlu0 %3635  ;;  %8503 = vrcp.f32 %v3618_v56 }
 0xce7   : > { %8505 = vrcp.f32 %v3621_v38 }
 0xce8   : > { %v3639_v55 = vpop.xlane.xlu1 %3638  ;;  %8507 = vrcp.f32 %v3624_v42 }
 0xce9   : > { %8509 = vrcp.f32 %v3627_v48 }
 0xcea   : > { %v3642_v4 = vpop.xlane.xlu0 %3641  ;;  %8511 = vrcp.f32 %v3630_v31 }
 0xceb   : > { %8513 = vrcp.f32 %v3633_v6 }
 0xcec   : > { %v3645_v39 = vpop.xlane.xlu1 %3644  ;;  %8515 = vrcp.f32 %v3636_v60 }
 0xced   : > { %8517 = vrcp.f32 %v3639_v55 }
 0xcee   : > { %v3648_v11 = vpop.xlane.xlu0 %3647  ;;  %8519 = vrcp.f32 %v3642_v4 }
 0xcef   : > { %v8502_v13 = vpop.eup %8501  ;;  %8521 = vrcp.f32 %v3645_v39 }
 0xcf0   : > { %v3692_v10 = vmul.f32 %v8502_v13, %v11043_v34  ;;  %v8504_v25 = vpop.eup %8503  ;;  %v3651_v34 = vpop.xlane.xlu1 %3650  ;;  %8523 = vrcp.f32 %v3648_v11 }
 0xcf1   : > { %v8506_v53 = vpop.eup %8505  ;;  %v3698_v36 = vmul.f32 %v8504_v25, %v11005_v61  ;;  %8525 = vrcp.f32 %v3651_v34 }
 0xcf2   : > { %7683 = vmatprep.mubr.msk.f32.mxu0 %vm926_vm0, %v3692_v10  ;;  %v8508_v29 = vpop.eup %8507  ;;  %v3700_v46 = vmul.f32 %v8506_v53, %v11022_v41  ;;  %v3654_v59 = vpop.xlane.xlu0 %3653 }
 0xcf3   : > { %7684 = vmatmul.mubr.msk.f32.gmra.mrb[64].mxu0 %vm926_vm0, %v3694_v51  ;;  %v8510_v52 = vpop.eup %8509  ;;  %v3702_v56 = vmul.f32 %v8508_v29, %v11015_v47  ;;  %8527 = vrcp.f32 %v3654_v59 }
 0xcf4   : > { %7686 = vmatprep.mubr.msk.f32.mxu0 %vm926_vm0, %v3696_v18  ;;  %v8512_v45 = vpop.eup %8511  ;;  %v3704_v54 = vmul.f32 %v8510_v52, %v11034_v44  ;;  %v3657_v61 = vpop.xlane.xlu1 %3656 }
 0xcf5   : > { %v8514_v1 = vpop.eup %8513  ;;  %v3706_v41 = vmul.f32 %v8512_v45, %v11028_v33  ;;  %8529 = vrcp.f32 %v3657_v61 }
 0xcf6   : > { %v8516_v19 = vpop.eup %8515  ;;  %v3708_v2 = vmul.f32 %v8514_v1, %v11040_v26  ;;  %v3660_v12 = vpop.xlane.xlu0 %3659 }
 0xcf7   : > { %7687 = vmatmul.mubr.msk.f32.gmra.mrb[66].mxu0 %vm926_vm0, %v3698_v36  ;;  %v8518_v8 = vpop.eup %8517  ;;  %v3710_v47 = vmul.f32 %v8516_v19, %v11048_v5  ;;  %8531 = vrcp.f32 %v3660_v12 }
 0xcf8   : > { %7689 = vmatprep.mubr.msk.f32.mxu0 %vm926_vm0, %v3700_v46  ;;  %v8520_v44 = vpop.eup %8519  ;;  %v3663_v40 = vpop.xlane.xlu1 %3662  ;;  %v3712_v42 = vmul.f32 %v8518_v8, %v11053_v30 }
 0xcf9   : > { %v8522_v22 = vpop.eup %8521  ;;  %8533 = vrcp.f32 %v3663_v40  ;;  %v3714_v26 = vmul.f32 %v8520_v44, %v11058_v21 }
 0xcfa   : > { %v3666_v33 = vpop.xlane.xlu0 %3665  ;;  %v8524_v38 = vpop.eup %8523  ;;  %v3716_v31 = vmul.f32 %v8522_v22, %v11062_v50 }
 0xcfb   : > { %7690 = vmatmul.mubr.msk.f32.gmra.mrb[68].mxu0 %vm926_vm0, %v3702_v56  ;;  %v8526_v48 = vpop.eup %8525  ;;  %8535 = vrcp.f32 %v3666_v33  ;;  %v3718_v5 = vmul.f32 %v8524_v38, %v11066_v17 }
 0xcfc   : > { %7692 = vmatprep.mubr.msk.f32.mxu0 %vm926_vm0, %v3704_v54  ;;  %v3720_v6 = vmul.f32 %v8526_v48, %v11070_v62 }
 0xcfd   : > { %v8528_v30 = vpop.eup %8527 }
 0xcfe   : > { %v3722_v21 = vmul.f32 %v8528_v30, %v11074_v37  ;;  %v6866_v37 = vld [vmem:[%s11970_s5 + $0x20] sm:$0xff] }
 0xcff   : > { %7693 = vmatmul.mubr.msk.f32.gmra.mrb[70].mxu0 %vm926_vm0, %v3706_v41  ;;  %v8530_v35 = vpop.eup %8529 }
 0xd00   : > { %7695 = vmatprep.mubr.msk.f32.mxu0 %vm926_vm0, %v3708_v2  ;;  %v3724_v50 = vmul.f32 %v8530_v35, %v11078_v63  ;;  %v6867_v63 = vld [vmem:[%s11970_s5 + $0x28] sm:$0xff] }
 0xd01   : > { %v8532_v60 = vpop.eup %8531 }
 0xd02   : > { %v3726_v17 = vmul.f32 %v8532_v60, %v11082_v43  ;;  %v8082_v43 = vpack.c.bf16 %v6867_v63, %v6866_v37  ;;  %v12567_v60 = vld [vmem:[#allocation25_spill] sm:$0xff]  ;;  %v12568_v37 = vld [vmem:[#allocation32_spill] sm:$0xff] }
 0xd03   : > { %7696 = vmatmul.mubr.msk.f32.gmra.mrb[72].mxu0 %vm926_vm0, %v3710_v47  ;;  %v8534_v55 = vpop.eup %8533 }
 0xd04   : > { %7698 = vmatprep.mubr.msk.f32.mxu0 %vm926_vm0, %v3712_v42  ;;  %v3728_v62 = vmul.f32 %v8534_v55, %v11086_v49  ;;  %8083 = vmatprep.subr.bf16.mxu0 %v8082_v43  ;;  %v6868_v49 = vld [vmem:[%s11970_s5 + $0x30] sm:$0xff] }
 0xd05   : > { %v8536_v15 = vpop.eup %8535  ;;  %8085 = vmatpush3.bf16.msra.mxu0 %v8082_v43 }
 0xd06   : > { %v3730_v4 = vmul.f32 %v8536_v15, %v11090_v3  ;;  %v6869_v3 = vld [vmem:[%s11970_s5 + $0x38] sm:$0xff] }
 0xd07   : > { %7699 = vmatmul.mubr.msk.f32.gmra.mrb[74].mxu0 %vm926_vm0, %v3714_v26  ;;  %v8086_v9 = vpack.c.bf16 %v6869_v3, %v6868_v49  ;;  %v12569_v49 = vld [vmem:[#allocation30_spill] sm:$0xff] }
 0xd08   : > { %7701 = vmatprep.mubr.msk.f32.mxu0 %vm926_vm0, %v3716_v31 }
 0xd09   : > { %8087 = vmatprep.subr.bf16.mxu0 %v8086_v9 }
 0xd0a   : > { %8089 = vmatpush3.bf16.msra.mxu0 %v8086_v9 }
 0xd0b   : > { %7702 = vmatmul.mubr.msk.f32.gmra.mrb[76].mxu0 %vm926_vm0, %v3718_v5  ;;  %8099 = vmatprep.subr.bf16.mxu0 %v10486_v16 }
 0xd0c   : > { %7704 = vmatprep.mubr.msk.f32.mxu0 %vm926_vm0, %v3720_v6 }
 0xd0f   : > { %7705 = vmatmul.mubr.msk.f32.gmra.mrb[78].mxu0 %vm926_vm0, %v3722_v21 }
 0xd10   : > { %7707 = vmatprep.mubr.msk.f32.mxu0 %vm926_vm0, %v3724_v50 }
 0xd13   : > { %7708 = vmatmul.mubr.msk.f32.gmra.mrb[80].mxu0 %vm926_vm0, %v3726_v17 }
 0xd14   : > { %7710 = vmatprep.mubr.msk.f32.mxu0 %vm926_vm0, %v3728_v62 }
 0xd17   : > { %7711 = vmatmul.mubr.msk.f32.gmra.mrb[82].mxu0 %vm926_vm0, %v3730_v4 }
 0xd93   : > { %v7667_v13 = vpop.f32.mrb[52].mxu0 }
 0xd94   : > { %v3893_v39 = vpop.f32.mrb[53].mxu0  ;;  %v4053_v25 = vmul.f32 %v7667_v13, %v12455_v28 }
 0xd95   : > { %v4052_v18 = vmul.f32 %v12456_v24, %v3893_v39 }
 0xd96   : > { %v4099_v34 = vsel %vm926_vm0, %v4053_v25, 0.0  ;;  %v12570_v25 = vld [vmem:[#allocation37_spill] sm:$0xff] }
 0xd97   : > { %v7670_v10 = vpop.f32.mrb[54].mxu0  ;;  %v4084_v59 = vsel %vm926_vm0, %v4052_v18, 0.0 }
 0xd98   : > { %v3903_v51 = vpop.f32.mrb[55].mxu0  ;;  %v4055_v46 = vmul.f32 %v7670_v10, %v12459_v58 }
 0xd99   : > { %v4054_v56 = vmul.f32 %v12460_v14, %v3903_v51 }
 0xd9a   : > { %v4129_v8 = vsel %vm926_vm0, %v4055_v46, 0.0 }
 0xd9b   : > { %v7673_v53 = vpop.f32.mrb[56].mxu0  ;;  %v4114_v47 = vsel %vm926_vm0, %v4054_v56, 0.0  ;;  %v12572_v56 = vld [vmem:[#allocation42_spill] sm:$0xff] }
 0xd9c   : > { %v4057_v11 = vmul.f32 %v7673_v53, %v12457_v7  ;;  %v3913_v36 = vpop.f32.mrb[57].mxu0 }
 0xd9d   : > { %v4056_v29 = vmul.f32 %v12458_v20, %v3913_v36 }
 0xd9e   : > { %v4100_v52 = vsel %vm926_vm0, %v4057_v11, 0.0  ;;  %v12571_v11 = vld [vmem:[#allocation33_spill] sm:$0xff] }
 0xd9f   : > { %v4101_v45 = vadd.f32 %v4100_v52, %v4099_v34  ;;  %v4085_v54 = vsel %vm926_vm0, %v4056_v29, 0.0  ;;  %v7676_v1 = vpop.f32.mrb[58].mxu0 }
 0xda0   : > { %v4086_v61 = vadd.f32 %v4085_v54, %v4084_v59  ;;  %v4059_v41 = vmul.f32 %v7676_v1, %v12461_v57  ;;  %v3923_v19 = vpop.f32.mrb[59].mxu0  ;;  %v12573_v1 = vld [vmem:[#allocation39_spill] sm:$0xff] }
 0xda1   : > { %v4058_v2 = vmul.f32 %v12462_v23, %v3923_v19 }
 0xda2   : > { %v4130_v12 = vsel %vm926_vm0, %v4059_v41, 0.0 }
 0xda3   : > { %v4131_v44 = vadd.f32 %v4130_v12, %v4129_v8  ;;  %v4115_v40 = vsel %vm926_vm0, %v4058_v2, 0.0  ;;  %v7679_v42 = vpop.f32.mrb[60].mxu0 }
 0xda4   : > { %v4116_v22 = vadd.f32 %v4115_v40, %v4114_v47  ;;  %v4061_v33 = vmul.f32 %v7679_v42, %v12463_v32  ;;  %v3933_v26 = vpop.f32.mrb[61].mxu0  ;;  %v12574_v47 = vld [vmem:[#allocation46_spill] sm:$0xff]  ;;  %v12575_v42 = vld [vmem:[#allocation43_spill] sm:$0xff] }
 0xda5   : > { %v4060_v38 = vmul.f32 %v12464_v27, %v3933_v26 }
 0xda6   : > { %v4102_v31 = vsel %vm926_vm0, %v4061_v33, 0.0 }
 0xda7   : > { %v4103_v48 = vadd.f32 %v4102_v31, %v4101_v45  ;;  %v4087_v5 = vsel %vm926_vm0, %v4060_v38, 0.0  ;;  %v7682_v30 = vpop.f32.mrb[62].mxu0 }
 0xda8   : > { %v4088_v6 = vadd.f32 %v4087_v5, %v4086_v61  ;;  %v4063_v35 = vmul.f32 %v7682_v30, %v12465_v0  ;;  %v3943_v21 = vpop.f32.mrb[63].mxu0  ;;  %v12576_v5 = vld [vmem:[#allocation49_spill] sm:$0xff] }
 0xda9   : > { %v4062_v50 = vmul.f32 %v12567_v60, %v3943_v21 }
 0xdaa   : > { %v4132_v55 = vsel %vm926_vm0, %v4063_v35, 0.0  ;;  %v12577_v35 = vld [vmem:[#allocation47_spill] sm:$0xff] }
 0xdab   : > { %v4133_v17 = vadd.f32 %v4132_v55, %v4131_v44  ;;  %v4117_v15 = vsel %vm926_vm0, %v4062_v50, 0.0 }
 0xdac   : > { %v4118_v62 = vadd.f32 %v4117_v15, %v4116_v22 }
 0xdc6   : > { %v7685_v4 = vpop.f32.mrb[64].mxu0 }
 0xdc7   : > { %v4065_v63 = vmul.f32 %v7685_v4, %v12568_v37  ;;  %v3953_v43 = vpop.f32.mrb[65].mxu0  ;;  %v12578_v4 = vld [vmem:[#allocation51_spill] sm:$0xff] }
 0xdc8   : > { %v4064_v3 = vmul.f32 %v12569_v49, %v3953_v43 }
 0xdc9   : > { %v4104_v9 = vsel %vm926_vm0, %v4065_v63, 0.0 }
 0xdca   : > { %v4105_v13 = vadd.f32 %v4104_v9, %v4103_v48  ;;  %v4089_v39 = vsel %vm926_vm0, %v4064_v3, 0.0  ;;  %v7688_v10 = vpop.f32.mrb[66].mxu0  ;;  %v12579_v3 = vld [vmem:[#allocation50_spill] sm:$0xff] }
 0xdcb   : > { %v4090_v51 = vadd.f32 %v4089_v39, %v4088_v6  ;;  %v4067_v18 = vmul.f32 %v7688_v10, %v12570_v25  ;;  %v3963_v53 = vpop.f32.mrb[67].mxu0 }
 0xdcc   : > { %v4066_v36 = vmul.f32 %v12571_v11, %v3963_v53  ;;  %v12580_v53 = vld [vmem:[#allocation53_spill] sm:$0xff] }
 0xdcd   : > { %v4134_v29 = vsel %vm926_vm0, %v4067_v18, 0.0 }
 0xdce   : > { %v4135_v34 = vadd.f32 %v4134_v29, %v4133_v17  ;;  %v4119_v46 = vsel %vm926_vm0, %v4066_v36, 0.0  ;;  %v7691_v52 = vpop.f32.mrb[68].mxu0 }
 0xdcf   : > { %v4120_v59 = vadd.f32 %v4119_v46, %v4118_v62  ;;  %v4069_v45 = vmul.f32 %v7691_v52, %v12572_v56  ;;  %v3973_v54 = vpop.f32.mrb[69].mxu0 }
 0xdd0   : > { %v4068_v61 = vmul.f32 %v12573_v1, %v3973_v54 }
 0xdd1   : > { %v4106_v41 = vsel %vm926_vm0, %v4069_v45, 0.0 }
 0xdd2   : > { %v4107_v19 = vadd.f32 %v4106_v41, %v4105_v13  ;;  %v4091_v2 = vsel %vm926_vm0, %v4068_v61, 0.0  ;;  %v7694_v8 = vpop.f32.mrb[70].mxu0  ;;  %v12582_v41 = vld [vmem:[#allocation55_spill] sm:$0xff] }
 0xdd3   : > { %v4092_v12 = vadd.f32 %v4091_v2, %v4090_v51  ;;  %v4071_v44 = vmul.f32 %v7694_v8, %v12574_v47  ;;  %v3983_v40 = vpop.f32.mrb[71].mxu0  ;;  %v12583_v8 = vld [vmem:[#allocation54_spill] sm:$0xff] }
 0xdd4   : > { %v4070_v22 = vmul.f32 %v12575_v42, %v3983_v40 }
 0xdd5   : > { %v4136_v33 = vsel %vm926_vm0, %v4071_v44, 0.0 }
 0xdd6   : > { %v4137_v26 = vadd.f32 %v4136_v33, %v4135_v34  ;;  %v4121_v38 = vsel %vm926_vm0, %v4070_v22, 0.0  ;;  %v7697_v31 = vpop.f32.mrb[72].mxu0  ;;  %v12581_v34 = vld [vmem:[#allocation52_spill] sm:$0xff] }
 0xdd7   : > { %v4122_v48 = vadd.f32 %v4121_v38, %v4120_v59  ;;  %v4073_v30 = vmul.f32 %v7697_v31, %v12576_v5  ;;  %v3993_v6 = vpop.f32.mrb[73].mxu0  ;;  %v12584_v38 = vld [vmem:[#allocation57_spill] sm:$0xff] }
 0xdd8   : > { %v4072_v21 = vmul.f32 %v12577_v35, %v3993_v6 }
 0xdd9   : > { %v4108_v50 = vsel %vm926_vm0, %v4073_v30, 0.0  ;;  %v12585_v30 = vld [vmem:[#allocation56_spill] sm:$0xff] }
 0xdda   : > { %v4109_v55 = vadd.f32 %v4108_v50, %v4107_v19  ;;  %v4093_v17 = vsel %vm926_vm0, %v4072_v21, 0.0  ;;  %v7700_v15 = vpop.f32.mrb[74].mxu0 }
 0xddb   : > { %v4094_v62 = vadd.f32 %v4093_v17, %v4092_v12  ;;  %v4075_v63 = vmul.f32 %v7700_v15, %v12578_v4  ;;  %v4003_v43 = vpop.f32.mrb[75].mxu0 }
 0xddc   : > { %v4074_v9 = vmul.f32 %v12579_v3, %v4003_v43 }
 0xddd   : > { %v4138_v13 = vsel %vm926_vm0, %v4075_v63, 0.0 }
 0xdde   : > { %v4139_v39 = vadd.f32 %v4138_v13, %v4137_v26  ;;  %v4123_v10 = vsel %vm926_vm0, %v4074_v9, 0.0  ;;  %v7703_v51 = vpop.f32.mrb[76].mxu0  ;;  %v12587_v9 = vld [vmem:[#allocation58_spill] sm:$0xff] }
 0xddf   : > { %v4124_v18 = vadd.f32 %v4123_v10, %v4122_v48  ;;  %v4077_v36 = vmul.f32 %v7703_v51, %v12580_v53  ;;  %v4013_v29 = vpop.f32.mrb[77].mxu0 }
 0xde0   : > { %v4076_v46 = vmul.f32 %v12581_v34, %v4013_v29 }
 0xde1   : > { %v4110_v52 = vsel %vm926_vm0, %v4077_v36, 0.0  ;;  %v12588_v36 = vld [vmem:[#allocation6_spill] sm:$0xff] }
 0xde2   : > { %v4111_v59 = vadd.f32 %v4110_v52, %v4109_v55  ;;  %v4095_v45 = vsel %vm926_vm0, %v4076_v46, 0.0  ;;  %v7706_v54 = vpop.f32.mrb[78].mxu0  ;;  %v6875_v46 = vld [vmem:[%s11971_s6 + $0x1] ss:$0 sm:$0xff]  ;;  %v12589_v52 = vld [vmem:[#allocation18_spill] sm:$0xff] }
 0xde3   : > { %v4096_v61 = vadd.f32 %v4095_v45, %v4094_v62  ;;  %v4079_v19 = vmul.f32 %v7706_v54, %v12582_v41  ;;  %v4023_v2 = vpop.f32.mrb[79].mxu0  ;;  %v12586_v62 = vld [vmem:[#allocation59_spill] sm:$0xff]  ;;  %v12590_v54 = vld [vmem:[#allocation16_spill] sm:$0xff] }
 0xde4   : > { %v4078_v12 = vmul.f32 %v12583_v8, %v4023_v2 }
 0xde5   : > { %v4140_v44 = vsel %vm926_vm0, %v4079_v19, 0.0 }
 0xde6   : > { %v4141_v40 = vadd.f32 %v4140_v44, %v4139_v39  ;;  %v4125_v22 = vsel %vm926_vm0, %v4078_v12, 0.0  ;;  %v7709_v33 = vpop.f32.mrb[80].mxu0  ;;  %v12591_v44 = vld [vmem:[#allocation15_spill] sm:$0xff] }
 0xde7   : > { %v4126_v26 = vadd.f32 %v4125_v22, %v4124_v18  ;;  %v4081_v31 = vmul.f32 %v7709_v33, %v12584_v38  ;;  %v4033_v48 = vpop.f32.mrb[81].mxu0  ;;  %v12592_v33 = vld [vmem:[#allocation14_spill] sm:$0xff] }
 0xde8   : > { %v4080_v6 = vmul.f32 %v12585_v30, %v4033_v48 }
 0xde9   : > { %v4112_v21 = vsel %vm926_vm0, %v4081_v31, 0.0 }
 0xdea   : > { %v4113_v50 = vadd.f32 %v4112_v21, %v4111_v59  ;;  %v4097_v55 = vsel %vm926_vm0, %v4080_v6, 0.0  ;;  %v7712_v17 = vpop.f32.mrb[82].mxu0 }
 0xdeb   : > { %v4098_v15 = vadd.f32 %v4097_v55, %v4096_v61  ;;  %v4083_v63 = vmul.f32 %v7712_v17, %v12586_v62  ;;  %v4043_v43 = vpop.f32.mrb[83].mxu0  ;;  %v12594_v55 = vld [vmem:[#allocation8_spill] sm:$0xff]  ;;  %v12595_v17 = vld [vmem:[#allocation13_spill] sm:$0xff] }
 0xdec   : > { %v4082_v13 = vmul.f32 %v12587_v9, %v4043_v43 }
 0xded   : > { %v4142_v39 = vsel %vm926_vm0, %v4083_v63, 0.0  ;;  %7721 = vmatprep.mubr.msk.f32.mxu0 %vm926_vm0, %v4098_v15  ;;  %v12596_v15 = vld [vmem:[#allocation48_spill] sm:$0xff] }
 0xdee   : > { %v4143_v10 = vadd.f32 %v4142_v39, %v4141_v40  ;;  %v4127_v51 = vsel %vm926_vm0, %v4082_v13, 0.0  ;;  %7722 = vmatmul.mubr.msk.f32.vlgmr.msra.gmra.mrb[84].mxu0 %vm926_vm0, %v4113_v50  ;;  %v12593_v50 = vld [vmem:[#allocation7_spill] sm:$0xff] }
 0xdef   : > { %v4128_v18 = vadd.f32 %v4127_v51, %v4126_v26  ;;  %8101 = vmatpush3.bf16.msra.mxu0 %v10486_v16 }
 0xdf0   : > { %8103 = vmatprep.subr.bf16.mxu0 %v12588_v36 }
 0xdf1   : > { %7724 = vmatprep.mubr.msk.f32.mxu0 %vm926_vm0, %v4128_v18 }
 0xdf2   : > { %7725 = vmatmul.mubr.msk.f32.gmra.mrb[86].mxu0 %vm926_vm0, %v4143_v10 }
 0xdf3   : > { %8105 = vmatpush3.bf16.msra.mxu0 %v12588_v36 }
 0xdf4   : > { %8115 = vmatprep.subr.bf16.mxu0 %v10486_v16 }
 0xec1   : > { %v7723_v29 = vpop.f32.mrb[84].mxu0 }
 0xec2   : > { %v4247_v59 = vadd.f32 %v7723_v29, %v12589_v52  ;;  %v4227_v45 = vpop.f32.mrb[85].mxu0 }
 0xec3   : > { %v4246_v61 = vadd.f32 %v4227_v45, %v12590_v54 }
 0xec4   : > { %v4259_v19 = vadd.f32 %v6875_v46, %v4247_v59 }
 0xec5   : > { %v4258_v2 = vadd.f32 %v6875_v46, %v4246_v61  ;;  %v7726_v12 = vpop.f32.mrb[86].mxu0 }
 0xec6   : > { %v4249_v40 = vadd.f32 %v7726_v12, %v12591_v44  ;;  %v4237_v22 = vpop.f32.mrb[87].mxu0 }
 0xec7   : > { %v4248_v26 = vadd.f32 %v4237_v22, %v12592_v33  ;;  %v8090_v31 = vpack.c.bf16 %v4259_v19, %v4258_v2  ;;  %v6897_v22 = vld [vmem:[%s11968_s3 + $0x48] sm:$0xff]  ;;  %v6898_v33 = vld [vmem:[%s11968_s3 + $0x50] sm:$0xff] }
 0xec8   : > { %v4261_v48 = vadd.f32 %v6875_v46, %v4249_v40  ;;  %v6896_v40 = vld [vmem:[%s11968_s3 + $0x40] sm:$0xff] }
 0xec9   : > { %v4260_v6 = vadd.f32 %v6875_v46, %v4248_v26  ;;  %8091 = vmatprep.subr.bf16.mxu1 %v8090_v31  ;;  %v8263_v26 = vpack.i.bf16 %v6897_v22, %v6896_v40 }
 0xeca   : > { %8093 = vmatpush3.bf16.msra.mxu1 %v8090_v31  ;;  %v6899_v31 = vld [vmem:[%s11968_s3 + $0x58] sm:$0xff] }
 0xecb   : > { %v8094_v21 = vpack.c.bf16 %v4261_v48, %v4260_v6  ;;  %8264 = vrot.lane.b32.xlu1 %v8263_v26, %s8750_s24 }
 0xecd   : > { %8095 = vmatprep.subr.bf16.mxu1 %v8094_v21 }
 0xece   : > { %8097 = vmatpush3.bf16.msra.mxu1 %v8094_v21 }
 0xed1   : > { %7736 = vmatmul.mubr.msk.f32.vlgmr.msra.gmra.mrb[76].mxu1 %vm926_vm0, %v12593_v50 }
 0xed2   : > { %7738 = vmatprep.mubr.msk.f32.mxu1 %vm926_vm0, %v12594_v55 }
 0xed5   : > { %7739 = vmatmul.mubr.msk.f32.gmra.mrb[78].mxu1 %vm926_vm0, %v12595_v17 }
 0xed6   : > { %7763 = vmatprep.mubr.msk.f32.mxu1 %vm926_vm0, %v12596_v15  ;;  %v8122_v15 = vpack.c.bf16 %v6897_v22, %v6896_v40 }
 0xfa4   : > { %v7737_v63 = vpop.f32.mrb[76].mxu1 }
 0xfa5   : > { %v4344_v43 = vpop.f32.mrb[77].mxu1 }
 0xfa6   : > { %7749 = vmatprep.mubr.msk.f32.mxu0 %vm926_vm0, %v4344_v43  ;;  %v8126_v43 = vpack.c.bf16 %v6899_v31, %v6898_v33 }
 0xfa7   : > { %7750 = vmatmul.mubr.msk.f32.vlgmr.msra.gmra.mrb[88].mxu0 %vm926_vm0, %v7737_v63 }
 0xfa8   : > { %v7740_v13 = vpop.f32.mrb[78].mxu1  ;;  %8117 = vmatpush3.bf16.msra.mxu0 %v10486_v16 }
 0xfa9   : > { %v4354_v39 = vpop.f32.mrb[79].mxu1  ;;  %8119 = vmatprep.subr.bf16.mxu0 %v12588_v36 }
 0xfaa   : > { %7752 = vmatprep.mubr.msk.f32.mxu0 %vm926_vm0, %v4354_v39 }
 0xfab   : > { %7753 = vmatmul.mubr.msk.f32.gmra.mrb[90].mxu0 %vm926_vm0, %v7740_v13 }
 0xfac   : > { %8121 = vmatpush3.bf16.msra.mxu0 %v12588_v36 }
0x107a   : > { %v7751_v10 = vpop.f32.mrb[88].mxu0 }
0x107b   : > { %v11271_v51 = vsub.f32 %v4259_v19, %v7751_v10  ;;  %v4441_v18 = vpop.f32.mrb[89].mxu0 }
0x107c   : > { %v11273_v29 = vsub.f32 %v4258_v2, %v4441_v18 }
0x107d   : > { %v4465_v46 = vmul.f32 %v11271_v51, %v11271_v51 }
0x107e   : > { %v4464_v52 = vmul.f32 %v11273_v29, %v11273_v29  ;;  %v7754_v59 = vpop.f32.mrb[90].mxu0 }
0x107f   : > { %v11279_v45 = vsub.f32 %v4261_v48, %v7754_v59  ;;  %v4451_v54 = vpop.f32.mrb[91].mxu0  ;;  %v8268_v48 = vpack.i.bf16 %v6899_v31, %v6898_v33 }
0x1080   : > { %v11281_v61 = vsub.f32 %v4260_v6, %v4451_v54  ;;  %v8106_v12 = vpack.c.bf16 %v4465_v46, %v4464_v52  ;;  %v8752_v46 = vmov 0.0|0.0   ;;  %v12597_v54 = vmov 0.0  }
0x1081   : > { %v4467_v19 = vmul.f32 %v11279_v45, %v11279_v45  ;;  %8269 = vrot.lane.b32.xlu0 %v8268_v48, %s8750_s24  ;;  %8130 = vmatprep.subr.bf16.mxu0 %v8752_v46 }
0x1082   : > { %v4466_v2 = vmul.f32 %v11281_v61, %v11281_v61  ;;  %8107 = vmatprep.subr.bf16.mxu1 %v8106_v12 }
0x1083   : > { %8109 = vmatpush3.bf16.msra.mxu1 %v8106_v12  ;;  %v914_v12 = vld [vmem:[%s367_s21] sm:$0xff]  ;;  %s353_s21 = scalar_lea.vmem [#allocation2], %s6642_s14 }
0x1084   : > { %v8110_v44 = vpack.c.bf16 %v4467_v19, %v4466_v2  ;;  %v6901_v19 = vld [vmem:[%s11969_s4 + $0x2] ss:$0 sm:$0xff]  ;;  %s6552_s27 = sshll.u32 %s353_s21, 4  ;;  %s11920_s27 = int_to_ptr.vmem [resolvable:$true] %s6552_s27 }
0x1085   : > { %4804 = vrot.lane.b32.xlu1 %v6901_v19, %s8750_s24  ;;  %s8685_s22 = scalar_lea.vmem %s11920_s27, 512 }
0x1086   : > { %8111 = vmatprep.subr.bf16.mxu1 %v8110_v44  ;;  %p8686_p11 = scmp.ne.s32.totalorder %s11920_s27, %s8685_s22 }
0x1087   : > { %8113 = vmatpush3.bf16.msra.mxu1 %v8110_v44 }
0x1088   : > { %8123 = vmatprep.subr.bf16.mxu1 %v8122_v15  ;;  %p8687_p12 = pnand %p8686_p11, %p8846_p5 }
0x108a   : > { %7764 = vmatmul.mubr.msk.f32.vlgmr.msra.gmra.mrb[80].mxu1 %vm926_vm0, %v12593_v50  ;;  %p8688_p13 = pneg %p8687_p12 }
0x108b   : > { %7766 = vmatprep.mubr.msk.f32.mxu1 %vm926_vm0, %v12594_v55  ;;  %8125 = vmatpush3.bf16.msra.mxu1 %v8122_v15  ;;  %v6895_v15 = vld [vmem:[%s11973_s8 + $0x1] ss:$0 sm:$0xff] }
0x108c   : > { %8127 = vmatprep.subr.bf16.mxu1 %v8126_v43 }
0x108e   : > { %7767 = vmatmul.mubr.msk.f32.gmra.mrb[82].mxu1 %vm926_vm0, %v12595_v17  ;;  %v8265_v17 = vpop.permute.xlu1 %8264 }
0x108f   : > { %v8267_v13 = vunpack.i.h.bf16 %v8265_v17  ;;  %v8266_v39 = vunpack.i.l.bf16 %v8265_v17  ;;  %8129 = vmatpush3.bf16.msra.mxu1 %v8126_v43 }
0x1091   : > { %v8131_v52 = vpack.c.bf16 %v8267_v13, %v8266_v39 }
0x10f3   : > { %v8270_v63 = vpop.permute.xlu0 %8269 }
0x10f4   : > { %v8272_v10 = vunpack.i.h.bf16 %v8270_v63  ;;  %v8271_v18 = vunpack.i.l.bf16 %v8270_v63 }
0x10f6   : > { %v8134_v59 = vpack.c.bf16 %v8272_v10, %v8271_v18 }
0x115d   : > { %v7765_v6 = vpop.f32.mrb[80].mxu1 }
0x115e   : > { %v4534_v21 = vpop.f32.mrb[81].mxu1 }
0x115f   : > { %7777 = vmatprep.mubr.msk.f32.mxu0 %vm926_vm0, %v4534_v21  ;;  %v6894_v21 = vld [vmem:[%s11972_s7 + $0x1] ss:$0 sm:$0xff] }
0x1160   : > { %7778 = vmatmul.mubr.msk.f32.vlgmr.msra.gmra.mrb[92].mxu0 %vm926_vm0, %v7765_v6 }
0x1161   : > { %v7768_v50 = vpop.f32.mrb[82].mxu1  ;;  %8132 = vmatpush3.bf16.msra.mxu0 %v8131_v52 }
0x1162   : > { %v4544_v55 = vpop.f32.mrb[83].mxu1  ;;  %8133 = vmatprep.subr.bf16.mxu0 %v8752_v46 }
0x1163   : > { %7780 = vmatprep.mubr.msk.f32.mxu0 %vm926_vm0, %v4544_v55 }
0x1164   : > { %7781 = vmatmul.mubr.msk.f32.gmra.mrb[94].mxu0 %vm926_vm0, %v7768_v50 }
0x1165   : > { %8135 = vmatpush3.bf16.msra.mxu0 %v8134_v59  ;;  %7805 = vmatprep.mubr.msk.f32.mxu0 %vm8753_vm5, %v12597_v54 }
0x1168   : > { %7806 = vmatmul.mubr.msk.f32.vlgmr.msra.gmra.mrb[96].mxu0 %vm926_vm0, %v914_v12 }
0x1233   : > { %v7779_v2 = vpop.f32.mrb[92].mxu0 }
0x1234   : > { %v4637_v44 = vadd.f32 1e-05, %v7779_v2  ;;  %v4631_v40 = vpop.f32.mrb[93].mxu0 }
0x1235   : > { %v4632_v22 = vadd.f32 1e-05, %v4631_v40 }
0x1236   : > { %8537 = vrsqrt.f32 %v4637_v44 }
0x1237   : > { %8539 = vrsqrt.f32 %v4632_v22  ;;  %v7782_v33 = vpop.f32.mrb[94].mxu0 }
0x1238   : > { %v4647_v26 = vadd.f32 1e-05, %v7782_v33  ;;  %v4641_v31 = vpop.f32.mrb[95].mxu0 }
0x1239   : > { %v4642_v48 = vadd.f32 1e-05, %v4641_v31 }
0x123a   : > { %8541 = vrsqrt.f32 %v4647_v26 }
0x123b   : > { %8543 = vrsqrt.f32 %v4642_v48 }
0x1240   : > { %v8538_v6 = vpop.eup %8537 }
0x1241   : > { %v8540_v50 = vpop.eup %8539  ;;  %v4655_v55 = vmul.f32 %v8538_v6, %v11271_v51 }
0x1242   : > { %v4654_v17 = vmul.f32 %v8540_v50, %v11273_v29 }
0x1243   : > { %v4665_v63 = vmul.f32 %v6894_v21, %v4655_v55 }
0x1244   : > { %v8542_v43 = vpop.eup %8541  ;;  %v4664_v13 = vmul.f32 %v6894_v21, %v4654_v17 }
0x1245   : > { %v8544_v39 = vpop.eup %8543  ;;  %v4657_v10 = vmul.f32 %v8542_v43, %v11279_v45  ;;  %v11333_v52 = vadd.f32 %v6895_v15, %v4665_v63  ;;  %v4805_v45 = vpop.permute.xlu1 %4804 }
0x1246   : > { %v11330_v18 = vadd.f32 %v6895_v15, %v4664_v13  ;;  %v4656_v46 = vmul.f32 %v8544_v39, %v11281_v61  ;;  %v4876_v61 = vpop.f32.mrb[96].mxu0 }
0x1247   : > { %12599 = vst [vmem:[#allocation19_spill] sm:$0xff] %v11333_v52  ;;  %v4667_v59 = vmul.f32 %v6894_v21, %v4657_v10  ;;  %v11347_v12 = vadd.f32 %v4876_v61, %v4805_v45  ;;  %v7807_v2 = vpop.f32.mrb[97].mxu0 }
0x1248   : > { %12598 = vst [vmem:[#allocation21_spill] sm:$0xff] %v11330_v18  ;;  %7791 = vmatprep.mubr.msk.f32.mxu1 %vm926_vm0, %v11330_v18  ;;  %v4666_v51 = vmul.f32 %v6894_v21, %v4656_v46 }
0x1249   : > { %7792 = vmatmul.mubr.msk.f32.vlgmr.msra.gmra.mrb[84].mxu1 %vm926_vm0, %v11333_v52  ;;  %v11341_v54 = vadd.f32 %v6895_v15, %v4667_v59  ;;  %7808 = vmatprep.subr.msk.mxu1 %vm926_vm0, %v11347_v12 }
0x124a   : > { %v11339_v29 = vadd.f32 %v6895_v15, %v4666_v51  ;;  %7809 = vmatpush3.xpose.msk.msra.mxu1 %vm926_vm0, %v11347_v12 }
0x124b   : > { %12601 = vst [vmem:[#allocation23_spill] sm:$0xff] %v11341_v54 }
0x124c   : > { %12600 = vst [vmem:[#allocation24_spill] sm:$0xff] %v11339_v29  ;;  %7794 = vmatprep.mubr.msk.f32.mxu1 %vm926_vm0, %v11339_v29 }
0x124d   : > { %7795 = vmatmul.mubr.msk.f32.gmra.mrb[86].mxu1 %vm926_vm0, %v11341_v54 }
0x131c   : > { %v7793_v44 = vpop.f32.mrb[84].mxu1 }
0x131d   : > { %v4775_v40 = vadd.f32 %v7793_v44, %v6901_v19  ;;  %v4769_v22 = vpop.f32.mrb[85].mxu1 }
0x131e   : > { %v4770_v33 = vadd.f32 %v6901_v19, %v4769_v22 }
0x131f   : > { %v11353_v26 = vmul.f32 0.5, %v4775_v40 }
0x1320   : > { %v4880_v31 = vmul.f32 0.5, %v4770_v33  ;;  %v7796_v48 = vpop.f32.mrb[86].mxu1 }
0x1321   : > { %v4785_v6 = vadd.f32 %v7796_v48, %v6901_v19  ;;  %v4779_v21 = vpop.f32.mrb[87].mxu1  ;;  %v4885_v15 = vmul.f32 %v12455_v28, %v11353_v26  ;;  %v4889_v39 = vmul.f32 %v12457_v7, %v11353_v26  ;;  %v4893_v51 = vmul.f32 %v12463_v32, %v11353_v26 }
0x1322   : > { %v4780_v50 = vadd.f32 %v6901_v19, %v4779_v21  ;;  %v4884_v55 = vmul.f32 %v12456_v24, %v4880_v31  ;;  %v4888_v19 = vmul.f32 %v12458_v20, %v4880_v31  ;;  %v4892_v59 = vmul.f32 %v12464_v27, %v4880_v31 }
0x1323   : > { %v11356_v17 = vmul.f32 0.5, %v4785_v6  ;;  %v4896_v2 = vmul.f32 %v12569_v49, %v4880_v31  ;;  %v4897_v44 = vmul.f32 %v12568_v37, %v11353_v26  ;;  %v4900_v33 = vmul.f32 %v12573_v1, %v4880_v31 }
0x1324   : > { %v4882_v63 = vmul.f32 0.5, %v4780_v50  ;;  %7810 = vmatprep.mubr.msk.f32.mxu1 %vm926_vm0, %v4884_v55  ;;  %v4901_v48 = vmul.f32 %v12572_v56, %v11353_v26  ;;  %v4904_v50 = vmul.f32 %v12577_v35, %v4880_v31  ;;  %v4905_v55 = vmul.f32 %v12576_v5, %v11353_v26 }
0x1325   : > { %7811 = vmatmul.mubr.msk.f32.vlgmr.msra.gmra.mrb[88].mxu1 %vm926_vm0, %v4885_v15  ;;  %v4887_v13 = vmul.f32 %v12459_v58, %v11356_v17  ;;  %v4891_v46 = vmul.f32 %v12461_v57, %v11356_v17  ;;  %v4895_v61 = vmul.f32 %v12465_v0, %v11356_v17  ;;  %v4899_v22 = vmul.f32 %v12570_v25, %v11356_v17 }
0x1326   : > { %v4886_v43 = vmul.f32 %v12460_v14, %v4882_v63  ;;  %v4890_v10 = vmul.f32 %v12462_v23, %v4882_v63  ;;  %v4894_v45 = vmul.f32 %v12567_v60, %v4882_v63  ;;  %v4898_v40 = vmul.f32 %v12571_v11, %v4882_v63 }
0x1327   : > { %v4902_v6 = vmul.f32 %v12575_v42, %v4882_v63  ;;  %v4903_v21 = vmul.f32 %v12574_v47, %v11356_v17  ;;  %v4906_v15 = vmul.f32 %v12579_v3, %v4882_v63 }
0x1328   : > { %7813 = vmatprep.mubr.msk.f32.mxu1 %vm926_vm0, %v4886_v43  ;;  %v4907_v43 = vmul.f32 %v12578_v4, %v11356_v17 }
0x1329   : > { %7814 = vmatmul.mubr.msk.f32.gmra.mrb[90].mxu1 %vm926_vm0, %v4887_v13  ;;  %v4908_v13 = vmul.f32 %v12581_v34, %v4880_v31 }
0x132a   : > { %7816 = vmatprep.mubr.msk.f32.mxu1 %vm926_vm0, %v4888_v19  ;;  %v4909_v19 = vmul.f32 %v12580_v53, %v11353_v26 }
0x132d   : > { %7817 = vmatmul.mubr.msk.f32.gmra.mrb[92].mxu1 %vm926_vm0, %v4889_v39  ;;  %v4910_v39 = vmul.f32 %v12583_v8, %v4882_v63 }
0x132e   : > { %7819 = vmatprep.mubr.msk.f32.mxu1 %vm926_vm0, %v4890_v10  ;;  %v4911_v10 = vmul.f32 %v12582_v41, %v11356_v17 }
0x1331   : > { %7820 = vmatmul.mubr.msk.f32.gmra.mrb[94].mxu1 %vm926_vm0, %v4891_v46  ;;  %v4912_v46 = vmul.f32 %v12585_v30, %v4880_v31 }
0x1332   : > { %7822 = vmatprep.mubr.msk.f32.mxu1 %vm926_vm0, %v4892_v59  ;;  %v4913_v59 = vmul.f32 %v12584_v38, %v11353_v26 }
0x1335   : > { %7823 = vmatmul.mubr.msk.f32.gmra.mrb[96].mxu1 %vm926_vm0, %v4893_v51  ;;  %v4914_v51 = vmul.f32 %v12587_v9, %v4882_v63 }
0x1336   : > { %7825 = vmatprep.mubr.msk.f32.mxu1 %vm926_vm0, %v4894_v45  ;;  %v4915_v45 = vmul.f32 %v12586_v62, %v11356_v17 }
0x1339   : > { %7826 = vmatmul.mubr.msk.f32.gmra.mrb[98].mxu1 %vm926_vm0, %v4895_v61 }
0x133a   : > { %7828 = vmatprep.mubr.msk.f32.mxu1 %vm926_vm0, %v4896_v2 }
0x133d   : > { %7829 = vmatmul.mubr.msk.f32.gmra.mrb[100].mxu1 %vm926_vm0, %v4897_v44 }
0x133e   : > { %7831 = vmatprep.mubr.msk.f32.mxu1 %vm926_vm0, %v4898_v40 }
0x1341   : > { %7832 = vmatmul.mubr.msk.f32.gmra.mrb[102].mxu1 %vm926_vm0, %v4899_v22 }
0x1342   : > { %7834 = vmatprep.mubr.msk.f32.mxu1 %vm926_vm0, %v4900_v33 }
0x1345   : > { %7835 = vmatmul.mubr.msk.f32.gmra.mrb[104].mxu1 %vm926_vm0, %v4901_v48 }
0x1346   : > { %7837 = vmatprep.mubr.msk.f32.mxu1 %vm926_vm0, %v4902_v6 }
0x1349   : > { %7838 = vmatmul.mubr.msk.f32.gmra.mrb[106].mxu1 %vm926_vm0, %v4903_v21 }
0x134a   : > { %7840 = vmatprep.mubr.msk.f32.mxu1 %vm926_vm0, %v4904_v50 }
0x134d   : > { %7841 = vmatmul.mubr.msk.f32.gmra.mrb[108].mxu1 %vm926_vm0, %v4905_v55 }
0x134e   : > { %7843 = vmatprep.mubr.msk.f32.mxu1 %vm926_vm0, %v4906_v15 }
0x1351   : > { %7844 = vmatmul.mubr.msk.f32.gmra.mrb[110].mxu1 %vm926_vm0, %v4907_v43 }
0x1352   : > { %7846 = vmatprep.mubr.msk.f32.mxu1 %vm926_vm0, %v4908_v13 }
0x1355   : > { %7847 = vmatmul.mubr.msk.f32.gmra.mrb[112].mxu1 %vm926_vm0, %v4909_v19 }
0x1356   : > { %7849 = vmatprep.mubr.msk.f32.mxu1 %vm926_vm0, %v4910_v39 }
0x1359   : > { %7850 = vmatmul.mubr.msk.f32.gmra.mrb[114].mxu1 %vm926_vm0, %v4911_v10 }
0x135a   : > { %7852 = vmatprep.mubr.msk.f32.mxu1 %vm926_vm0, %v4912_v46 }
0x135d   : > { %7853 = vmatmul.mubr.msk.f32.gmra.mrb[116].mxu1 %vm926_vm0, %v4913_v59 }
0x135e   : > { %7855 = vmatprep.mubr.msk.f32.mxu1 %vm926_vm0, %v4914_v51 }
0x1361   : > { %7856 = vmatmul.mubr.msk.f32.gmra.mrb[118].mxu1 %vm926_vm0, %v4915_v45 }
0x13f8   : > { %v11437_v31 = vpop.f32.mrb[88].mxu1 }
0x13f9   : > { %v11439_v61 = vpop.f32.mrb[89].mxu1  ;;  %v5244_v2 = vsel %vm5240_vm6, %v11437_v31, -inf }
0x13fa   : > { %5245 = vmax.xlane.f32.xlu0 %v5244_v2  ;;  %v5241_v26 = vsel %vm5240_vm6, %v11439_v61, -inf }
0x13fb   : > { %5242 = vmax.xlane.f32.xlu1 %v5241_v26 }
0x13fc   : > { %v11445_v63 = vpop.f32.mrb[90].mxu1 }
0x13fd   : > { %v11447_v44 = vpop.f32.mrb[91].mxu1  ;;  %v5250_v17 = vsel %vm5240_vm6, %v11445_v63, -inf }
0x13fe   : > { %v5247_v40 = vsel %vm5240_vm6, %v11447_v44, -inf }
0x13ff   : > { %5251 = vmax.xlane.f32.xlu1 %v5250_v17  ;;  %5248 = vmax.xlane.f32.xlu0 %v5247_v40 }
0x1400   : > { %v11453_v22 = vpop.f32.mrb[92].mxu1 }
0x1401   : > { %v11455_v33 = vpop.f32.mrb[93].mxu1  ;;  %v5256_v48 = vsel %vm5240_vm6, %v11453_v22, -inf }
0x1402   : > { %v5253_v6 = vsel %vm5240_vm6, %v11455_v33, -inf }
0x1403   : > { %5257 = vmax.xlane.f32.xlu1 %v5256_v48  ;;  %5254 = vmax.xlane.f32.xlu0 %v5253_v6 }
0x1404   : > { %v11461_v21 = vpop.f32.mrb[94].mxu1 }
0x1405   : > { %v11463_v50 = vpop.f32.mrb[95].mxu1  ;;  %v5262_v55 = vsel %vm5240_vm6, %v11461_v21, -inf }
0x1406   : > { %v5259_v15 = vsel %vm5240_vm6, %v11463_v50, -inf }
0x1407   : > { %5263 = vmax.xlane.f32.xlu1 %v5262_v55  ;;  %5260 = vmax.xlane.f32.xlu0 %v5259_v15 }
0x1408   : > { %v11469_v43 = vpop.f32.mrb[96].mxu1 }
0x1409   : > { %v11471_v13 = vpop.f32.mrb[97].mxu1  ;;  %v5268_v19 = vsel %vm5240_vm6, %v11469_v43, -inf }
0x140a   : > { %v5265_v39 = vsel %vm5240_vm6, %v11471_v13, -inf }
0x140b   : > { %5269 = vmax.xlane.f32.xlu1 %v5268_v19  ;;  %5266 = vmax.xlane.f32.xlu0 %v5265_v39 }
0x140c   : > { %v11477_v10 = vpop.f32.mrb[98].mxu1 }
0x140d   : > { %v11479_v46 = vpop.f32.mrb[99].mxu1  ;;  %v5274_v59 = vsel %vm5240_vm6, %v11477_v10, -inf }
0x140e   : > { %v5271_v51 = vsel %vm5240_vm6, %v11479_v46, -inf }
0x140f   : > { %5275 = vmax.xlane.f32.xlu1 %v5274_v59  ;;  %5272 = vmax.xlane.f32.xlu0 %v5271_v51 }
0x1410   : > { %v11485_v45 = vpop.f32.mrb[100].mxu1 }
0x1411   : > { %v11487_v2 = vpop.f32.mrb[101].mxu1  ;;  %v5280_v26 = vsel %vm5240_vm6, %v11485_v45, -inf }
0x1412   : > { %v5277_v17 = vsel %vm5240_vm6, %v11487_v2, -inf }
0x1413   : > { %5281 = vmax.xlane.f32.xlu1 %v5280_v26  ;;  %5278 = vmax.xlane.f32.xlu0 %v5277_v17 }
0x1414   : > { %v11493_v40 = vpop.f32.mrb[102].mxu1 }
0x1415   : > { %v11495_v48 = vpop.f32.mrb[103].mxu1  ;;  %v5286_v6 = vsel %vm5240_vm6, %v11493_v40, -inf }
0x1416   : > { %v5283_v55 = vsel %vm5240_vm6, %v11495_v48, -inf }
0x1417   : > { %5287 = vmax.xlane.f32.xlu1 %v5286_v6  ;;  %5284 = vmax.xlane.f32.xlu0 %v5283_v55 }
0x1418   : > { %v11501_v15 = vpop.f32.mrb[104].mxu1 }
0x1419   : > { %v11503_v19 = vpop.f32.mrb[105].mxu1  ;;  %v5292_v39 = vsel %vm5240_vm6, %v11501_v15, -inf }
0x141a   : > { %v5289_v59 = vsel %vm5240_vm6, %v11503_v19, -inf }
0x141b   : > { %5293 = vmax.xlane.f32.xlu1 %v5292_v39  ;;  %5290 = vmax.xlane.f32.xlu0 %v5289_v59 }
0x141c   : > { %v11509_v51 = vpop.f32.mrb[106].mxu1 }
0x141d   : > { %v11511_v26 = vpop.f32.mrb[107].mxu1  ;;  %v5298_v17 = vsel %vm5240_vm6, %v11509_v51, -inf }
0x141e   : > { %v5295_v6 = vsel %vm5240_vm6, %v11511_v26, -inf }
0x141f   : > { %5299 = vmax.xlane.f32.xlu1 %v5298_v17  ;;  %5296 = vmax.xlane.f32.xlu0 %v5295_v6 }
0x1420   : > { %v11517_v55 = vpop.f32.mrb[108].mxu1 }
0x1421   : > { %v11519_v29 = vpop.f32.mrb[109].mxu1  ;;  %v5304_v39 = vsel %vm5240_vm6, %v11517_v55, -inf }
0x1422   : > { %v5301_v59 = vsel %vm5240_vm6, %v11519_v29, -inf }
0x1423   : > { %5305 = vmax.xlane.f32.xlu1 %v5304_v39  ;;  %5302 = vmax.xlane.f32.xlu0 %v5301_v59 }
0x1424   : > { %v11525_v54 = vpop.f32.mrb[110].mxu1 }
0x1425   : > { %v11527_v18 = vpop.f32.mrb[111].mxu1  ;;  %v5310_v17 = vsel %vm5240_vm6, %v11525_v54, -inf }
0x1426   : > { %v5307_v6 = vsel %vm5240_vm6, %v11527_v18, -inf }
0x1427   : > { %5311 = vmax.xlane.f32.xlu1 %v5310_v17  ;;  %5308 = vmax.xlane.f32.xlu0 %v5307_v6 }
0x1428   : > { %v11533_v52 = vpop.f32.mrb[112].mxu1 }
0x1429   : > { %v11535_v36 = vpop.f32.mrb[113].mxu1  ;;  %v5316_v39 = vsel %vm5240_vm6, %v11533_v52, -inf }
0x142a   : > { %v5313_v59 = vsel %vm5240_vm6, %v11535_v36, -inf }
0x142b   : > { %5317 = vmax.xlane.f32.xlu1 %v5316_v39  ;;  %5314 = vmax.xlane.f32.xlu0 %v5313_v59 }
0x142c   : > { %v11541_v9 = vpop.f32.mrb[114].mxu1 }
0x142d   : > { %v11543_v62 = vpop.f32.mrb[115].mxu1  ;;  %v5322_v17 = vsel %vm5240_vm6, %v11541_v9, -inf }
0x142e   : > { %v5319_v6 = vsel %vm5240_vm6, %v11543_v62, -inf }
0x142f   : > { %5323 = vmax.xlane.f32.xlu1 %v5322_v17  ;;  %5320 = vmax.xlane.f32.xlu0 %v5319_v6 }
0x1430   : > { %v11549_v30 = vpop.f32.mrb[116].mxu1 }
0x1431   : > { %v11551_v38 = vpop.f32.mrb[117].mxu1  ;;  %v5328_v39 = vsel %vm5240_vm6, %v11549_v30, -inf }
0x1432   : > { %v5325_v59 = vsel %vm5240_vm6, %v11551_v38, -inf }
0x1433   : > { %5329 = vmax.xlane.f32.xlu1 %v5328_v39  ;;  %5326 = vmax.xlane.f32.xlu0 %v5325_v59 }
0x1434   : > { %v11557_v8 = vpop.f32.mrb[118].mxu1 }
0x1435   : > { %v11559_v41 = vpop.f32.mrb[119].mxu1  ;;  %v5334_v17 = vsel %vm5240_vm6, %v11557_v8, -inf }
0x1436   : > { %v5331_v6 = vsel %vm5240_vm6, %v11559_v41, -inf }
0x1437   : > { %5335 = vmax.xlane.f32.xlu1 %v5334_v17  ;;  %5332 = vmax.xlane.f32.xlu0 %v5331_v6 }
0x1487   : > { %v5246_v34 = vpop.xlane.xlu0 %5245 }
0x1488   : > { %v5338_v53 = vsub.f32 %v11437_v31, %v5246_v34  ;;  %v5243_v3 = vpop.xlane.xlu1 %5242 }
0x1489   : > { %v5337_v4 = vsub.f32 %v11439_v61, %v5243_v3 }
0x148a   : > { %v5371_v39 = vmul.f32 1.442695, %v5338_v53 }
0x148b   : > { %v5369_v59 = vmul.f32 1.442695, %v5337_v4 }
0x148c   : > { %8545 = vpow2.f32 %v5371_v39  ;;  %v5252_v35 = vpop.xlane.xlu1 %5251  ;;  %v5249_v5 = vpop.xlane.xlu0 %5248 }
0x148d   : > { %8547 = vpow2.f32 %v5369_v59  ;;  %v5340_v42 = vsub.f32 %v11445_v63, %v5252_v35  ;;  %v5339_v47 = vsub.f32 %v11447_v44, %v5249_v5 }
0x148f   : > { %v5375_v1 = vmul.f32 1.442695, %v5340_v42  ;;  %v5373_v56 = vmul.f32 1.442695, %v5339_v47 }
0x1490   : > { %v5258_v17 = vpop.xlane.xlu1 %5257  ;;  %v5255_v6 = vpop.xlane.xlu0 %5254 }
0x1491   : > { %8549 = vpow2.f32 %v5375_v1  ;;  %v5342_v34 = vsub.f32 %v11453_v22, %v5258_v17  ;;  %v5341_v31 = vsub.f32 %v11455_v33, %v5255_v6 }
0x1492   : > { %8551 = vpow2.f32 %v5373_v56 }
0x1493   : > { %v5379_v3 = vmul.f32 1.442695, %v5342_v34  ;;  %v5377_v4 = vmul.f32 1.442695, %v5341_v31 }
0x1494   : > { %v5264_v53 = vpop.xlane.xlu1 %5263  ;;  %v5261_v61 = vpop.xlane.xlu0 %5260 }
0x1495   : > { %8553 = vpow2.f32 %v5379_v3  ;;  %v5344_v39 = vsub.f32 %v11461_v21, %v5264_v53  ;;  %v5343_v35 = vsub.f32 %v11463_v50, %v5261_v61 }
0x1496   : > { %v11573_v5 = vpop.eup %8545  ;;  %8555 = vpow2.f32 %v5377_v4 }
0x1497   : > { %v11575_v47 = vpop.eup %8547  ;;  %v5383_v1 = vmul.f32 1.442695, %v5344_v39  ;;  %v5381_v42 = vmul.f32 1.442695, %v5343_v35  ;;  %v5436_v63 = vsel %vm5240_vm6, %v11573_v5, 0.0 }
0x1498   : > { %v5270_v56 = vpop.xlane.xlu1 %5269  ;;  %v5267_v44 = vpop.xlane.xlu0 %5266  ;;  %5437 = vadd.xlane.f32.xlu1 %v5436_v63  ;;  %v5433_v22 = vsel %vm5240_vm6, %v11575_v47, 0.0 }
0x1499   : > { %8557 = vpow2.f32 %v5383_v1  ;;  %v5346_v33 = vsub.f32 %v11469_v43, %v5270_v56  ;;  %v5345_v21 = vsub.f32 %v11471_v13, %v5267_v44  ;;  %5434 = vadd.xlane.f32.xlu0 %v5433_v22 }
0x149a   : > { %8559 = vpow2.f32 %v5381_v42 }
0x149b   : > { %v11583_v50 = vpop.eup %8549  ;;  %v5387_v59 = vmul.f32 1.442695, %v5346_v33  ;;  %v5385_v17 = vmul.f32 1.442695, %v5345_v21 }
0x149c   : > { %v11585_v6 = vpop.eup %8551  ;;  %v5276_v34 = vpop.xlane.xlu1 %5275  ;;  %v5442_v3 = vsel %vm5240_vm6, %v11583_v50, 0.0 }
0x149d   : > { %v5273_v31 = vpop.xlane.xlu0 %5272  ;;  %8561 = vpow2.f32 %v5387_v59  ;;  %v5348_v4 = vsub.f32 %v11477_v10, %v5276_v34  ;;  %5443 = vadd.xlane.f32.xlu1 %v5442_v3  ;;  %v5439_v13 = vsel %vm5240_vm6, %v11585_v6, 0.0 }
0x149e   : > { %v5347_v43 = vsub.f32 %v11479_v46, %v5273_v31  ;;  %8563 = vpow2.f32 %v5385_v17  ;;  %5440 = vadd.xlane.f32.xlu0 %v5439_v13 }
0x149f   : > { %v11593_v53 = vpop.eup %8553  ;;  %v5391_v61 = vmul.f32 1.442695, %v5348_v4 }
0x14a0   : > { %v5389_v39 = vmul.f32 1.442695, %v5347_v43  ;;  %v11595_v35 = vpop.eup %8555  ;;  %v5282_v1 = vpop.xlane.xlu1 %5281  ;;  %v5448_v63 = vsel %vm5240_vm6, %v11593_v53, 0.0 }
0x14a1   : > { %v5279_v42 = vpop.xlane.xlu0 %5278  ;;  %8565 = vpow2.f32 %v5391_v61  ;;  %v5350_v10 = vsub.f32 %v11485_v45, %v5282_v1  ;;  %5449 = vadd.xlane.f32.xlu1 %v5448_v63  ;;  %v5445_v56 = vsel %vm5240_vm6, %v11595_v35, 0.0 }
0x14a2   : > { %v5349_v46 = vsub.f32 %v11487_v2, %v5279_v42  ;;  %8567 = vpow2.f32 %v5389_v39  ;;  %5446 = vadd.xlane.f32.xlu0 %v5445_v56 }
0x14a3   : > { %v11603_v44 = vpop.eup %8557  ;;  %v5395_v22 = vmul.f32 1.442695, %v5350_v10 }
0x14a4   : > { %v5393_v33 = vmul.f32 1.442695, %v5349_v46  ;;  %v11605_v21 = vpop.eup %8559  ;;  %v5288_v59 = vpop.xlane.xlu1 %5287  ;;  %v5454_v34 = vsel %vm5240_vm6, %v11603_v44, 0.0 }
0x14a5   : > { %v5285_v17 = vpop.xlane.xlu0 %5284  ;;  %8569 = vpow2.f32 %v5395_v22  ;;  %v5352_v45 = vsub.f32 %v11493_v40, %v5288_v59  ;;  %5455 = vadd.xlane.f32.xlu1 %v5454_v34  ;;  %v5451_v31 = vsel %vm5240_vm6, %v11605_v21, 0.0 }
0x14a6   : > { %v5351_v2 = vsub.f32 %v11495_v48, %v5285_v17  ;;  %8571 = vpow2.f32 %v5393_v33  ;;  %5452 = vadd.xlane.f32.xlu0 %v5451_v31 }
0x14a7   : > { %v11613_v3 = vpop.eup %8561  ;;  %v5399_v4 = vmul.f32 1.442695, %v5352_v45 }
0x14a8   : > { %v5397_v43 = vmul.f32 1.442695, %v5351_v2  ;;  %v11615_v13 = vpop.eup %8563  ;;  %v5294_v61 = vpop.xlane.xlu1 %5293  ;;  %v5460_v1 = vsel %vm5240_vm6, %v11613_v3, 0.0 }
0x14a9   : > { %v5291_v39 = vpop.xlane.xlu0 %5290  ;;  %8573 = vpow2.f32 %v5399_v4  ;;  %v5354_v40 = vsub.f32 %v11501_v15, %v5294_v61  ;;  %5461 = vadd.xlane.f32.xlu1 %v5460_v1  ;;  %v5457_v48 = vsel %vm5240_vm6, %v11615_v13, 0.0 }
0x14aa   : > { %5458 = vadd.xlane.f32.xlu0 %v5457_v48  ;;  %8575 = vpow2.f32 %v5397_v43  ;;  %v5353_v10 = vsub.f32 %v11503_v19, %v5291_v39 }
0x14ab   : > { %v11622_v42 = vpop.eup %8565  ;;  %v5403_v63 = vmul.f32 1.442695, %v5354_v40 }
0x14ac   : > { %v11625_v46 = vpop.eup %8567  ;;  %v11627_v56 = vpop.xlane.xlu1 %5299  ;;  %v5466_v33 = vsel %vm5240_vm6, %v11622_v42, 0.0  ;;  %v5401_v17 = vmul.f32 1.442695, %v5353_v10 }
0x14ad   : > { %v5297_v22 = vpop.xlane.xlu0 %5296  ;;  %5467 = vadd.xlane.f32.xlu1 %v5466_v33  ;;  %v5463_v15 = vsel %vm5240_vm6, %v11625_v46, 0.0  ;;  %8577 = vpow2.f32 %v5403_v63 }
0x14ae   : > { %5464 = vadd.xlane.f32.xlu0 %v5463_v15  ;;  %v5355_v34 = vsub.f32 %v11511_v26, %v5297_v22  ;;  %8579 = vpow2.f32 %v5401_v17 }
0x14af   : > { %v11633_v59 = vpop.eup %8569 }
0x14b0   : > { %v11636_v19 = vpop.eup %8571  ;;  %v5306_v45 = vpop.xlane.xlu1 %5305  ;;  %v5472_v2 = vsel %vm5240_vm6, %v11633_v59, 0.0  ;;  %v5405_v43 = vmul.f32 1.442695, %v5355_v34 }
0x14b1   : > { %5473 = vadd.xlane.f32.xlu1 %v5472_v2  ;;  %v5469_v31 = vsel %vm5240_vm6, %v11636_v19, 0.0  ;;  %v5358_v61 = vsub.f32 %v11517_v55, %v5306_v45  ;;  %v5303_v39 = vpop.xlane.xlu0 %5302 }
0x14b2   : > { %5470 = vadd.xlane.f32.xlu0 %v5469_v31  ;;  %8581 = vpow2.f32 %v5405_v43  ;;  %v5357_v48 = vsub.f32 %v11519_v29, %v5303_v39 }
0x14b3   : > { %v11642_v4 = vpop.eup %8573  ;;  %v5411_v40 = vmul.f32 1.442695, %v5358_v61 }
0x14b4   : > { %v5478_v26 = vsel %vm5240_vm6, %v11642_v4, 0.0  ;;  %v11647_v1 = vpop.eup %8575  ;;  %v5312_v63 = vpop.xlane.xlu1 %5311  ;;  %v5409_v55 = vmul.f32 1.442695, %v5357_v48 }
0x14b5   : > { %5479 = vadd.xlane.f32.xlu1 %v5478_v26  ;;  %v5475_v10 = vsel %vm5240_vm6, %v11647_v1, 0.0  ;;  %8583 = vpow2.f32 %v5411_v40  ;;  %v5360_v33 = vsub.f32 %v11525_v54, %v5312_v63  ;;  %v5309_v15 = vpop.xlane.xlu0 %5308 }
0x14b6   : > { %8585 = vpow2.f32 %v5409_v55  ;;  %v5359_v45 = vsub.f32 %v11527_v18, %v5309_v15 }
0x14b7   : > { %v11652_v22 = vpop.eup %8577  ;;  %v5415_v29 = vmul.f32 1.442695, %v5360_v33 }
0x14b8   : > { %v5484_v17 = vsel %vm5240_vm6, %v11652_v22, 0.0  ;;  %v11657_v34 = vpop.eup %8579  ;;  %v5318_v2 = vpop.xlane.xlu1 %5317  ;;  %v5413_v54 = vmul.f32 1.442695, %v5359_v45 }
0x14b9   : > { %5476 = vadd.xlane.f32.xlu1 %v5475_v10  ;;  %v5481_v31 = vsel %vm5240_vm6, %v11657_v34, 0.0  ;;  %v5315_v61 = vpop.xlane.xlu0 %5314  ;;  %8587 = vpow2.f32 %v5415_v29  ;;  %v5362_v39 = vsub.f32 %v11533_v52, %v5318_v2 }
0x14ba   : > { %8589 = vpow2.f32 %v5413_v54  ;;  %v5361_v48 = vsub.f32 %v11535_v36, %v5315_v61 }
0x14bb   : > { %v5419_v18 = vmul.f32 1.442695, %v5362_v39 }
0x14bc   : > { %v11662_v43 = vpop.eup %8581  ;;  %v5324_v63 = vpop.xlane.xlu1 %5323  ;;  %v5417_v52 = vmul.f32 1.442695, %v5361_v48 }
0x14bd   : > { %5485 = vadd.xlane.f32.xlu1 %v5484_v17  ;;  %v5487_v26 = vsel %vm5240_vm6, %v11662_v43, 0.0  ;;  %v5321_v10 = vpop.xlane.xlu0 %5320  ;;  %8591 = vpow2.f32 %v5419_v18 }
0x14be   : > { %v5363_v15 = vsub.f32 %v11543_v62, %v5321_v10  ;;  %8593 = vpow2.f32 %v5417_v52  ;;  %v5356_v62 = vsub.f32 %v11509_v51, %v11627_v56 }
0x14bf   : > { %v11667_v40 = vpop.eup %8583 }
0x14c0   : > { %v5496_v55 = vsel %vm5240_vm6, %v11667_v40, 0.0  ;;  %v11674_v33 = vpop.eup %8585  ;;  %v5330_v36 = vpop.xlane.xlu1 %5329  ;;  %v5421_v45 = vmul.f32 1.442695, %v5363_v15  ;;  %v5407_v48 = vmul.f32 1.442695, %v5356_v62 }
0x14c1   : > { %5482 = vadd.xlane.f32.xlu1 %v5481_v31  ;;  %v5493_v17 = vsel %vm5240_vm6, %v11674_v33, 0.0  ;;  %v5327_v2 = vpop.xlane.xlu0 %5326  ;;  %v5366_v39 = vsub.f32 %v11549_v30, %v5330_v36 }
0x14c2   : > { %8595 = vpow2.f32 %v5421_v45 }
0x14c3   : > { %v11679_v29 = vpop.eup %8587 }
0x14c4   : > { %v5502_v31 = vsel %vm5240_vm6, %v11679_v29, 0.0  ;;  %v11684_v61 = vpop.eup %8589 }
0x14c5   : > { %5488 = vadd.xlane.f32.xlu1 %v5487_v26  ;;  %v5336_v26 = vpop.xlane.xlu1 %5335  ;;  %v5499_v18 = vsel %vm5240_vm6, %v11684_v61, 0.0  ;;  %v5333_v10 = vpop.xlane.xlu0 %5332 }
0x14c6   : > { %v5368_v51 = vsub.f32 %v11557_v8, %v5336_v26  ;;  %v5367_v15 = vsub.f32 %v11559_v41, %v5333_v10 }
0x14c8   : > { %5593 = vrot.lane.b32.xlu0 %v11347_v12, %s8750_s24  ;;  %v5364_v12 = vsub.f32 %v11541_v9, %v5324_v63  ;;  %v11691_v9 = vpop.eup %8591  ;;  %v5365_v63 = vsub.f32 %v11551_v38, %v5327_v2  ;;  %s8755_s24 = smov [#allocation2]  }
0x14c9   : > { %5497 = vadd.xlane.f32.xlu1 %v5496_v55  ;;  %v5427_v55 = vmul.f32 1.442695, %v5366_v39  ;;  %v5508_v56 = vsel %vm5240_vm6, %v11691_v9, 0.0  ;;  %v11697_v52 = vpop.eup %8593  ;;  %s8689_s14 = sshll.u32 %s8755_s24, 4  ;;  %s8690_s14 = int_to_ptr.vmem [resolvable:$false] %s8689_s14 }
0x14ca   : > { %v5423_v54 = vmul.f32 1.442695, %v5364_v12  ;;  %v5425_v30 = vmul.f32 1.442695, %v5365_v63  ;;  %v5505_v38 = vsel %vm5240_vm6, %v11697_v52, 0.0  ;;  %s8691_s23 = scalar_lea.vmem %s8690_s14, 1024  ;;  %p8692_p0 = scmp.lt.s32.totalorder %s11920_s27, %s8690_s14 }
0x14cb   : > { %v5429_v12 = vmul.f32 1.442695, %v5367_v15  ;;  %p8693_p1 = scmp.lt.s32.totalorder %s8691_s23, %s8685_s22 }
0x14cc   : > { %8597 = vpow2.f32 %v5423_v54  ;;  %v11702_v36 = vpop.eup %8595 }
0x14cd   : > { %5494 = vadd.xlane.f32.xlu1 %v5493_v17  ;;  %8599 = vpow2.f32 %v5407_v48  ;;  %v5431_v17 = vmul.f32 1.442695, %v5368_v51  ;;  %v5511_v8 = vsel %vm5240_vm6, %v11702_v36, 0.0  ;;  %p8694_p2 = por %p8693_p1, %p8692_p0 }
0x14ce   : > { %8601 = vpow2.f32 %v5427_v55 }
0x14cf   : > { %8603 = vpow2.f32 %v5425_v30  ;;  %p8695_p3 = pnand %p8694_p2, %p8688_p13 }
0x14d0   : > { %8605 = vpow2.f32 %v5431_v17 }
0x14d1   : > { %5503 = vadd.xlane.f32.xlu1 %v5502_v31  ;;  %8607 = vpow2.f32 %v5429_v12 }
0x14d5   : > { %5500 = vadd.xlane.f32.xlu1 %v5499_v18 }
0x14d6   : > { %v11706_v45 = vpop.eup %8597 }
0x14d7   : > { %v11708_v41 = vpop.eup %8599  ;;  %v5514_v2 = vsel %vm5240_vm6, %v11706_v45, 0.0 }
0x14d8   : > { %v11712_v31 = vpop.eup %8601  ;;  %v5490_v62 = vsel %vm5240_vm6, %v11708_v41, 0.0 }
0x14d9   : > { %5509 = vadd.xlane.f32.xlu1 %v5508_v56  ;;  %v11716_v54 = vpop.eup %8603  ;;  %v5520_v39 = vsel %vm5240_vm6, %v11712_v31, 0.0 }
0x14da   : > { %v11720_v26 = vpop.eup %8605  ;;  %v5517_v18 = vsel %vm5240_vm6, %v11716_v54, 0.0 }
0x14db   : > { %v11724_v48 = vpop.eup %8607  ;;  %v5526_v63 = vsel %vm5240_vm6, %v11720_v26, 0.0 }
0x14dc   : > { %v5523_v10 = vsel %vm5240_vm6, %v11724_v48, 0.0 }
0x14dd   : > { %5506 = vadd.xlane.f32.xlu1 %v5505_v38 }
0x14e1   : > { %5512 = vadd.xlane.f32.xlu1 %v5511_v8 }
0x14e5   : > { %5515 = vadd.xlane.f32.xlu1 %v5514_v2 }
0x14e7   : > { %5491 = vadd.xlane.f32.xlu0 %v5490_v62 }
0x14e9   : > { %5521 = vadd.xlane.f32.xlu1 %v5520_v39 }
0x14eb   : > { %5518 = vadd.xlane.f32.xlu0 %v5517_v18 }
0x14ed   : > { %5527 = vadd.xlane.f32.xlu1 %v5526_v63 }
0x14ef   : > { %5524 = vadd.xlane.f32.xlu0 %v5523_v10 }
0x1525   : > { %v5438_v55 = vpop.xlane.xlu1 %5437 }
0x1526   : > { %v5435_v51 = vpop.xlane.xlu0 %5434 }
0x1527   : > { %8609 = vrcp.f32 %v5435_v51 }
0x1528   : > { %8611 = vrcp.f32 %v5438_v55 }
0x152a   : > { %v5444_v56 = vpop.xlane.xlu1 %5443 }
0x152b   : > { %v5441_v30 = vpop.xlane.xlu0 %5440 }
0x152c   : > { %8613 = vrcp.f32 %v5441_v30 }
0x152d   : > { %8615 = vrcp.f32 %v5444_v56 }
0x152e   : > { %v5450_v15 = vpop.xlane.xlu1 %5449 }
0x152f   : > { %v5447_v17 = vpop.xlane.xlu0 %5446 }
0x1530   : > { %8617 = vrcp.f32 %v5447_v17 }
0x1531   : > { %v8610_v38 = vpop.eup %8609  ;;  %8619 = vrcp.f32 %v5450_v15 }
0x1532   : > { %v5456_v12 = vpop.xlane.xlu1 %5455  ;;  %v5530_v8 = vmul.f32 %v8610_v38, %v11575_v47  ;;  %v8612_v11 = vpop.eup %8611 }
0x1533   : > { %v5453_v2 = vpop.xlane.xlu0 %5452  ;;  %v5532_v38 = vmul.f32 %v8612_v11, %v11573_v5 }
0x1534   : > { %7860 = vmatprep.mubr.msk.f32.mxu0 %vm5240_vm6, %v5530_v8  ;;  %8621 = vrcp.f32 %v5453_v2 }
0x1535   : > { %8623 = vrcp.f32 %v5456_v12 }
0x1536   : > { %v5462_v62 = vpop.xlane.xlu1 %5461  ;;  %v8614_v25 = vpop.eup %8613 }
0x1537   : > { %v5459_v39 = vpop.xlane.xlu0 %5458  ;;  %v8616_v55 = vpop.eup %8615  ;;  %v5534_v30 = vmul.f32 %v8614_v25, %v11585_v6 }
0x1538   : > { %8625 = vrcp.f32 %v5459_v39  ;;  %v5536_v15 = vmul.f32 %v8616_v55, %v11583_v50 }
0x1539   : > { %8627 = vrcp.f32 %v5462_v62 }
0x153a   : > { %v5468_v18 = vpop.xlane.xlu1 %5467  ;;  %v8618_v56 = vpop.eup %8617 }
0x153b   : > { %v5465_v63 = vpop.xlane.xlu0 %5464  ;;  %v8620_v12 = vpop.eup %8619  ;;  %v5538_v8 = vmul.f32 %v8618_v56, %v11595_v35 }
0x153c   : > { %8629 = vrcp.f32 %v5465_v63  ;;  %v5540_v25 = vmul.f32 %v8620_v12, %v11593_v53 }
0x153d   : > { %8631 = vrcp.f32 %v5468_v18 }
0x153e   : > { %v5474_v10 = vpop.xlane.xlu1 %5473  ;;  %v8622_v11 = vpop.eup %8621 }
0x153f   : > { %v5471_v51 = vpop.xlane.xlu0 %5470  ;;  %v8624_v6 = vpop.eup %8623  ;;  %v5542_v2 = vmul.f32 %v8622_v11, %v11605_v21 }
0x1540   : > { %8633 = vrcp.f32 %v5471_v51  ;;  %v5544_v35 = vmul.f32 %v8624_v6, %v11603_v44 }
0x1541   : > { %8635 = vrcp.f32 %v5474_v10 }
0x1542   : > { %v5480_v49 = vpop.xlane.xlu1 %5479  ;;  %v8626_v62 = vpop.eup %8625 }
0x1543   : > { %v5594_v47 = vpop.permute.xlu0 %5593  ;;  %v8628_v39 = vpop.eup %8627  ;;  %v5546_v18 = vmul.f32 %v8626_v62, %v11615_v13 }
0x1544   : > { %7858 = vmatprep.subr.mxu0 %v5594_v47  ;;  %v5548_v21 = vmul.f32 %v8628_v39, %v11613_v3 }
0x1545   : > { %7859 = vmatpush3.msra.mxu0 %v5594_v47 }
0x1546   : > { %7861 = vmatmul.mubr.msk.f32.vlgmr.msra.gmra.mrb[98].mxu0 %vm5240_vm6, %v5532_v38  ;;  %v5477_v17 = vpop.xlane.xlu1 %5476  ;;  %v8630_v63 = vpop.eup %8629 }
0x1547   : > { %7863 = vmatprep.mubr.msk.f32.mxu0 %vm5240_vm6, %v5534_v30  ;;  %8637 = vrcp.f32 %v5477_v17  ;;  %v8632_v51 = vpop.eup %8631  ;;  %v5550_v10 = vmul.f32 %v8630_v63, %v11625_v46 }
0x1548   : > { %8639 = vrcp.f32 %v5480_v49  ;;  %v5552_v13 = vmul.f32 %v8632_v51, %v11622_v42 }
0x154a   : > { %7864 = vmatmul.mubr.msk.f32.gmra.mrb[100].mxu0 %vm5240_vm6, %v5536_v15  ;;  %v5486_v5 = vpop.xlane.xlu1 %5485  ;;  %v8634_v47 = vpop.eup %8633 }
0x154b   : > { %7866 = vmatprep.mubr.msk.f32.mxu0 %vm5240_vm6, %v5538_v8  ;;  %v8636_v38 = vpop.eup %8635  ;;  %v5554_v49 = vmul.f32 %v8634_v47, %v11636_v19 }
0x154c   : > { %v5556_v46 = vmul.f32 %v8636_v38, %v11633_v59 }
0x154e   : > { %7867 = vmatmul.mubr.msk.f32.gmra.mrb[102].mxu0 %vm5240_vm6, %v5540_v25  ;;  %v5483_v50 = vpop.xlane.xlu1 %5482 }
0x154f   : > { %7869 = vmatprep.mubr.msk.f32.mxu0 %vm5240_vm6, %v5542_v2  ;;  %8641 = vrcp.f32 %v5483_v50 }
0x1550   : > { %8643 = vrcp.f32 %v5486_v5 }
0x1551   : > { %v8638_v55 = vpop.eup %8637 }
0x1552   : > { %7870 = vmatmul.mubr.msk.f32.gmra.mrb[104].mxu0 %vm5240_vm6, %v5544_v35  ;;  %v5489_v53 = vpop.xlane.xlu1 %5488  ;;  %v8640_v30 = vpop.eup %8639  ;;  %v5558_v56 = vmul.f32 %v8638_v55, %v11647_v1 }
0x1553   : > { %7872 = vmatprep.mubr.msk.f32.mxu0 %vm5240_vm6, %v5546_v18  ;;  %8645 = vrcp.f32 %v5489_v53  ;;  %v5560_v42 = vmul.f32 %v8640_v30, %v11642_v4 }
0x1556   : > { %7873 = vmatmul.mubr.msk.f32.gmra.mrb[106].mxu0 %vm5240_vm6, %v5548_v21  ;;  %v5498_v44 = vpop.xlane.xlu1 %5497 }
0x1557   : > { %7875 = vmatprep.mubr.msk.f32.mxu0 %vm5240_vm6, %v5550_v10 }
0x1559   : > { %v8642_v17 = vpop.eup %8641 }
0x155a   : > { %7876 = vmatmul.mubr.msk.f32.gmra.mrb[108].mxu0 %vm5240_vm6, %v5552_v13  ;;  %v5495_v3 = vpop.xlane.xlu1 %5494  ;;  %v8644_v19 = vpop.eup %8643  ;;  %v5562_v12 = vmul.f32 %v8642_v17, %v11657_v34 }
0x155b   : > { %7878 = vmatprep.mubr.msk.f32.mxu0 %vm5240_vm6, %v5554_v49  ;;  %v5564_v11 = vmul.f32 %v8644_v19, %v11652_v22  ;;  %8647 = vrcp.f32 %v5495_v3 }
0x155d   : > { %v8646_v8 = vpop.eup %8645 }
0x155e   : > { %7879 = vmatmul.mubr.msk.f32.gmra.mrb[110].mxu0 %vm5240_vm6, %v5556_v46  ;;  %v5504_v15 = vpop.xlane.xlu1 %5503  ;;  %v5566_v1 = vmul.f32 %v8646_v8, %v11662_v43 }
0x155f   : > { %7881 = vmatprep.mubr.msk.f32.mxu0 %vm5240_vm6, %v5558_v56 }
0x1562   : > { %7882 = vmatmul.mubr.msk.f32.gmra.mrb[112].mxu0 %vm5240_vm6, %v5560_v42  ;;  %v5501_v59 = vpop.xlane.xlu1 %5500 }
0x1563   : > { %7884 = vmatprep.mubr.msk.f32.mxu0 %vm5240_vm6, %v5562_v12 }
0x1565   : > { %v8648_v2 = vpop.eup %8647 }
0x1566   : > { %7885 = vmatmul.mubr.msk.f32.gmra.mrb[114].mxu0 %vm5240_vm6, %v5564_v11  ;;  %v5510_v5 = vpop.xlane.xlu1 %5509  ;;  %v5570_v35 = vmul.f32 %v8648_v2, %v11674_v33 }
0x1567   : > { %7887 = vmatprep.mubr.msk.f32.mxu0 %vm5240_vm6, %v5566_v1 }
0x156a   : > { %v5507_v25 = vpop.xlane.xlu1 %5506 }
0x156e   : > { %v5513_v34 = vpop.xlane.xlu1 %5512 }
0x1572   : > { %v5516_v6 = vpop.xlane.xlu1 %5515 }
0x1574   : > { %v5492_v4 = vpop.xlane.xlu0 %5491 }
0x1575   : > { %8649 = vrcp.f32 %v5492_v4 }
0x1576   : > { %8651 = vrcp.f32 %v5498_v44  ;;  %v5522_v18 = vpop.xlane.xlu1 %5521 }
0x1577   : > { %8653 = vrcp.f32 %v5501_v59 }
0x1578   : > { %8655 = vrcp.f32 %v5504_v15  ;;  %v5519_v22 = vpop.xlane.xlu0 %5518 }
0x1579   : > { %8657 = vrcp.f32 %v5507_v25 }
0x157a   : > { %8659 = vrcp.f32 %v5510_v5  ;;  %v5528_v33 = vpop.xlane.xlu1 %5527 }
0x157b   : > { %8661 = vrcp.f32 %v5513_v34 }
0x157c   : > { %8663 = vrcp.f32 %v5516_v6  ;;  %v5525_v21 = vpop.xlane.xlu0 %5524 }
0x157d   : > { %8665 = vrcp.f32 %v5519_v22 }
0x157e   : > { %8667 = vrcp.f32 %v5522_v18 }
0x157f   : > { %v8650_v62 = vpop.eup %8649  ;;  %8669 = vrcp.f32 %v5525_v21 }
0x1580   : > { %v5568_v43 = vmul.f32 %v8650_v62, %v11708_v41  ;;  %v8652_v50 = vpop.eup %8651  ;;  %8671 = vrcp.f32 %v5528_v33 }
0x1581   : > { %v8654_v39 = vpop.eup %8653  ;;  %v5572_v63 = vmul.f32 %v8652_v50, %v11667_v40 }
0x1582   : > { %7888 = vmatmul.mubr.msk.f32.gmra.mrb[116].mxu0 %vm5240_vm6, %v5568_v43  ;;  %v8656_v53 = vpop.eup %8655  ;;  %v5574_v51 = vmul.f32 %v8654_v39, %v11684_v61 }
0x1583   : > { %7890 = vmatprep.mubr.msk.f32.mxu0 %vm5240_vm6, %v5570_v35  ;;  %v8658_v10 = vpop.eup %8657  ;;  %v5576_v41 = vmul.f32 %v8656_v53, %v11679_v29 }
0x1584   : > { %v8660_v47 = vpop.eup %8659  ;;  %v5578_v44 = vmul.f32 %v8658_v10, %v11697_v52 }
0x1585   : > { %v8662_v13 = vpop.eup %8661  ;;  %v5580_v40 = vmul.f32 %v8660_v47, %v11691_v9 }
0x1586   : > { %7891 = vmatmul.mubr.msk.f32.gmra.mrb[118].mxu0 %vm5240_vm6, %v5572_v63  ;;  %v8664_v61 = vpop.eup %8663  ;;  %v5582_v38 = vmul.f32 %v8662_v13, %v11702_v36 }
0x1587   : > { %7893 = vmatprep.mubr.msk.f32.mxu0 %vm5240_vm6, %v5574_v51  ;;  %v8666_v49 = vpop.eup %8665  ;;  %v5584_v29 = vmul.f32 %v8664_v61, %v11706_v45  ;;  %v6972_v45 = vld [vmem:[%s11970_s5 + $0x40] sm:$0xff] }
0x1588   : > { %v8668_v55 = vpop.eup %8667  ;;  %v5586_v52 = vmul.f32 %v8666_v49, %v11716_v54  ;;  %v6973_v54 = vld [vmem:[%s11970_s5 + $0x48] sm:$0xff] }
0x1589   : > { %v8670_v3 = vpop.eup %8669  ;;  %v5588_v9 = vmul.f32 %v8668_v55, %v11712_v31  ;;  %v8136_v31 = vpack.c.bf16 %v6973_v54, %v6972_v45  ;;  %v12602_v55 = vld [vmem:[#allocation30_spill] sm:$0xff]  ;;  %v12604_v54 = vld [vmem:[#allocation33_spill] sm:$0xff] }
0x158a   : > { %7894 = vmatmul.mubr.msk.f32.gmra.mrb[120].mxu0 %vm5240_vm6, %v5576_v41  ;;  %v8672_v46 = vpop.eup %8671  ;;  %v5590_v36 = vmul.f32 %v8670_v3, %v11724_v48  ;;  %v6974_v48 = vld [vmem:[%s11970_s5 + $0x50] sm:$0xff] }
0x158b   : > { %7896 = vmatprep.mubr.msk.f32.mxu0 %vm5240_vm6, %v5578_v44  ;;  %v5592_v30 = vmul.f32 %v8672_v46, %v11720_v26  ;;  %8137 = vmatprep.subr.bf16.mxu1 %v8136_v31  ;;  %v6975_v26 = vld [vmem:[%s11970_s5 + $0x58] sm:$0xff] }
0x158c   : > { %8139 = vmatpush3.bf16.msra.mxu1 %v8136_v31  ;;  %v8140_v56 = vpack.c.bf16 %v6975_v26, %v6974_v48 }
0x158e   : > { %7897 = vmatmul.mubr.msk.f32.gmra.mrb[122].mxu0 %vm5240_vm6, %v5580_v40  ;;  %8141 = vmatprep.subr.bf16.mxu1 %v8140_v56 }
0x158f   : > { %7899 = vmatprep.mubr.msk.f32.mxu0 %vm5240_vm6, %v5582_v38 }
0x1590   : > { %8143 = vmatpush3.bf16.msra.mxu1 %v8140_v56 }
0x1591   : > { %8153 = vmatprep.subr.bf16.mxu1 %v10486_v16 }
0x1592   : > { %7900 = vmatmul.mubr.msk.f32.gmra.mrb[124].mxu0 %vm5240_vm6, %v5584_v29 }
0x1593   : > { %7902 = vmatprep.mubr.msk.f32.mxu0 %vm5240_vm6, %v5586_v52 }
0x1596   : > { %7903 = vmatmul.mubr.msk.f32.gmra.mrb[126].mxu0 %vm5240_vm6, %v5588_v9 }
0x1597   : > { %7905 = vmatprep.mubr.msk.f32.mxu0 %vm5240_vm6, %v5590_v36 }
0x159a   : > { %7906 = vmatmul.mubr.msk.f32.gmra.mrb[128].mxu0 %vm5240_vm6, %v5592_v30 }
0x1619   : > { %v7862_v17 = vpop.f32.mrb[98].mxu0 }
0x161a   : > { %v5758_v15 = vpop.f32.mrb[99].mxu0  ;;  %v5918_v12 = vmul.f32 %v7862_v17, %v12455_v28 }
0x161b   : > { %v5917_v8 = vmul.f32 %v12456_v24, %v5758_v15  ;;  %v12605_v15 = vld [vmem:[#allocation42_spill] sm:$0xff] }
0x161c   : > { %v5964_v25 = vsel %vm926_vm0, %v5918_v12, 0.0  ;;  %v12606_v12 = vld [vmem:[#allocation39_spill] sm:$0xff] }
0x161d   : > { %v7865_v42 = vpop.f32.mrb[100].mxu0  ;;  %v5949_v6 = vsel %vm926_vm0, %v5917_v8, 0.0 }
0x161e   : > { %v5768_v19 = vpop.f32.mrb[101].mxu0  ;;  %v5920_v4 = vmul.f32 %v7865_v42, %v12459_v58 }
0x161f   : > { %v5919_v2 = vmul.f32 %v12460_v14, %v5768_v19 }
0x1620   : > { %v5994_v50 = vsel %vm926_vm0, %v5920_v4, 0.0  ;;  %v12607_v4 = vld [vmem:[#allocation46_spill] sm:$0xff] }
0x1621   : > { %v7868_v59 = vpop.f32.mrb[102].mxu0  ;;  %v5979_v35 = vsel %vm926_vm0, %v5919_v2, 0.0  ;;  %v12608_v2 = vld [vmem:[#allocation43_spill] sm:$0xff] }
0x1622   : > { %v5922_v11 = vmul.f32 %v7868_v59, %v12457_v7  ;;  %v5778_v1 = vpop.f32.mrb[103].mxu0 }
0x1623   : > { %v5921_v5 = vmul.f32 %v12458_v20, %v5778_v1 }
0x1624   : > { %v5965_v34 = vsel %vm926_vm0, %v5922_v11, 0.0 }
0x1625   : > { %v5966_v62 = vadd.f32 %v5965_v34, %v5964_v25  ;;  %v5950_v28 = vsel %vm926_vm0, %v5921_v5, 0.0  ;;  %v7871_v24 = vpop.f32.mrb[104].mxu0 }
0x1626   : > { %v5951_v22 = vadd.f32 %v5950_v28, %v5949_v6  ;;  %v5924_v7 = vmul.f32 %v7871_v24, %v12461_v57  ;;  %v5788_v43 = vpop.f32.mrb[105].mxu0 }
0x1627   : > { %v5923_v20 = vmul.f32 %v12462_v23, %v5788_v43 }
0x1628   : > { %v5995_v58 = vsel %vm926_vm0, %v5924_v7, 0.0 }
0x1629   : > { %v5996_v39 = vadd.f32 %v5995_v58, %v5994_v50  ;;  %v5980_v18 = vsel %vm926_vm0, %v5923_v20, 0.0  ;;  %v7874_v14 = vpop.f32.mrb[106].mxu0  ;;  %v12609_v20 = vld [vmem:[#allocation49_spill] sm:$0xff] }
0x162a   : > { %v5981_v63 = vadd.f32 %v5980_v18, %v5979_v35  ;;  %v5926_v53 = vmul.f32 %v7874_v14, %v12463_v32  ;;  %v5798_v21 = vpop.f32.mrb[107].mxu0  ;;  %v12610_v35 = vld [vmem:[#allocation47_spill] sm:$0xff] }
0x162b   : > { %v5925_v51 = vmul.f32 %v12464_v27, %v5798_v21 }
0x162c   : > { %v5967_v57 = vsel %vm926_vm0, %v5926_v53, 0.0 }
0x162d   : > { %v5968_v10 = vadd.f32 %v5967_v57, %v5966_v62  ;;  %v5952_v23 = vsel %vm926_vm0, %v5925_v51, 0.0  ;;  %v7877_v33 = vpop.f32.mrb[108].mxu0  ;;  %v12611_v51 = vld [vmem:[#allocation51_spill] sm:$0xff] }
0x162e   : > { %v5953_v41 = vadd.f32 %v5952_v23, %v5951_v22  ;;  %v5928_v47 = vmul.f32 %v7877_v33, %v12465_v0  ;;  %v5808_v44 = vpop.f32.mrb[109].mxu0  ;;  %v12612_v23 = vld [vmem:[#allocation50_spill] sm:$0xff] }
0x162f   : > { %v5927_v13 = vmul.f32 %v12567_v60, %v5808_v44  ;;  %v12603_v60 = vld [vmem:[#allocation37_spill] sm:$0xff] }
0x1630   : > { %v5997_v40 = vsel %vm926_vm0, %v5928_v47, 0.0 }
0x1631   : > { %v5998_v61 = vadd.f32 %v5997_v40, %v5996_v39  ;;  %v5982_v32 = vsel %vm926_vm0, %v5927_v13, 0.0  ;;  %v7880_v38 = vpop.f32.mrb[110].mxu0 }
0x1632   : > { %v5983_v49 = vadd.f32 %v5982_v32, %v5981_v63  ;;  %v5930_v27 = vmul.f32 %v7880_v38, %v12568_v37  ;;  %v5818_v29 = vpop.f32.mrb[111].mxu0 }
0x1633   : > { %v5929_v52 = vmul.f32 %v12602_v55, %v5818_v29 }
0x1634   : > { %v5969_v3 = vsel %vm926_vm0, %v5930_v27, 0.0 }
0x1635   : > { %v5970_v9 = vadd.f32 %v5969_v3, %v5968_v10  ;;  %v5954_v0 = vsel %vm926_vm0, %v5929_v52, 0.0  ;;  %v7883_v46 = vpop.f32.mrb[112].mxu0 }
0x1636   : > { %v5955_v36 = vadd.f32 %v5954_v0, %v5953_v41  ;;  %v5932_v30 = vmul.f32 %v7883_v46, %v12603_v60  ;;  %v5828_v45 = vpop.f32.mrb[113].mxu0  ;;  %v12615_v0 = vld [vmem:[#allocation55_spill] sm:$0xff]  ;;  %v12616_v60 = vld [vmem:[#allocation54_spill] sm:$0xff] }
0x1637   : > { %v5931_v31 = vmul.f32 %v12604_v54, %v5828_v45 }
0x1638   : > { %v5999_v48 = vsel %vm926_vm0, %v5932_v30, 0.0 }
0x1639   : > { %v6000_v26 = vadd.f32 %v5999_v48, %v5998_v61  ;;  %v5984_v37 = vsel %vm926_vm0, %v5931_v31, 0.0  ;;  %v7886_v56 = vpop.f32.mrb[114].mxu0  ;;  %v12613_v61 = vld [vmem:[#allocation53_spill] sm:$0xff] }
0x163a   : > { %v5985_v17 = vadd.f32 %v5984_v37, %v5983_v49  ;;  %v5934_v42 = vmul.f32 %v7886_v56, %v12605_v15  ;;  %v5838_v19 = vpop.f32.mrb[115].mxu0  ;;  %v12614_v49 = vld [vmem:[#allocation52_spill] sm:$0xff]  ;;  %v12617_v37 = vld [vmem:[#allocation57_spill] sm:$0xff] }
0x163b   : > { %v5933_v8 = vmul.f32 %v12606_v12, %v5838_v19  ;;  %v12618_v15 = vld [vmem:[#allocation56_spill] sm:$0xff] }
0x163c   : > { %v5971_v59 = vsel %vm926_vm0, %v5934_v42, 0.0 }
0x163d   : > { %v5972_v11 = vadd.f32 %v5971_v59, %v5970_v9  ;;  %v5956_v1 = vsel %vm926_vm0, %v5933_v8, 0.0 }
0x163e   : > { %v5957_v5 = vadd.f32 %v5956_v1, %v5955_v36  ;;  %v12619_v1 = vld [vmem:[#allocation59_spill] sm:$0xff] }
0x1655   : > { %v7889_v25 = vpop.f32.mrb[116].mxu0 }
0x1656   : > { %v5936_v34 = vmul.f32 %v7889_v25, %v12607_v4  ;;  %v5848_v6 = vpop.f32.mrb[117].mxu0  ;;  %v12620_v4 = vld [vmem:[#allocation58_spill] sm:$0xff] }
0x1657   : > { %v5935_v62 = vmul.f32 %v12608_v2, %v5848_v6 }
0x1658   : > { %v6001_v28 = vsel %vm926_vm0, %v5936_v34, 0.0 }
0x1659   : > { %v6002_v24 = vadd.f32 %v6001_v28, %v6000_v26  ;;  %v5986_v22 = vsel %vm926_vm0, %v5935_v62, 0.0  ;;  %v7892_v7 = vpop.f32.mrb[118].mxu0 }
0x165a   : > { %v5987_v43 = vadd.f32 %v5986_v22, %v5985_v17  ;;  %v5938_v50 = vmul.f32 %v7892_v7, %v12609_v20  ;;  %v5858_v58 = vpop.f32.mrb[119].mxu0  ;;  %v8754_v22 = vmov 0.03125   ;;  %v12622_v20 = vld [vmem:[#allocation19_spill] sm:$0xff] }
0x165b   : > { %v5937_v39 = vmul.f32 %v12610_v35, %v5858_v58  ;;  %7930 = vmatprep.mubr.msk.f32.mxu0 %vm926_vm0, %v8754_v22  ;;  %v12623_v35 = vld [vmem:[#allocation21_spill] sm:$0xff] }
0x165c   : > { %v5973_v18 = vsel %vm926_vm0, %v5938_v50, 0.0 }
0x165d   : > { %v5974_v14 = vadd.f32 %v5973_v18, %v5972_v11  ;;  %v5958_v63 = vsel %vm926_vm0, %v5937_v39, 0.0  ;;  %v7895_v53 = vpop.f32.mrb[120].mxu0 }
0x165e   : > { %v5959_v21 = vadd.f32 %v5958_v63, %v5957_v5  ;;  %v5940_v57 = vmul.f32 %v7895_v53, %v12611_v51  ;;  %v5868_v10 = vpop.f32.mrb[121].mxu0  ;;  %v12624_v53 = vld [vmem:[#allocation23_spill] sm:$0xff] }
0x165f   : > { %v5939_v33 = vmul.f32 %v12612_v23, %v5868_v10 }
0x1660   : > { %v6003_v41 = vsel %vm926_vm0, %v5940_v57, 0.0  ;;  %v12625_v57 = vld [vmem:[#allocation24_spill] sm:$0xff] }
0x1661   : > { %v6004_v47 = vadd.f32 %v6003_v41, %v6002_v24  ;;  %v5988_v44 = vsel %vm926_vm0, %v5939_v33, 0.0  ;;  %v7898_v13 = vpop.f32.mrb[122].mxu0  ;;  %v12621_v24 = vld [vmem:[#allocation6_spill] sm:$0xff] }
0x1662   : > { %v5989_v40 = vadd.f32 %v5988_v44, %v5987_v43  ;;  %v5942_v32 = vmul.f32 %v7898_v13, %v12613_v61  ;;  %v5878_v38 = vpop.f32.mrb[123].mxu0  ;;  %v6981_v43 = vld [vmem:[%s11971_s6 + $0x2] ss:$0 sm:$0xff] }
0x1663   : > { %v5941_v27 = vmul.f32 %v12614_v49, %v5878_v38 }
0x1664   : > { %v5975_v29 = vsel %vm926_vm0, %v5942_v32, 0.0 }
0x1665   : > { %v5976_v55 = vadd.f32 %v5975_v29, %v5974_v14  ;;  %v5960_v52 = vsel %vm926_vm0, %v5941_v27, 0.0  ;;  %v7901_v3 = vpop.f32.mrb[124].mxu0 }
0x1666   : > { %v5961_v9 = vadd.f32 %v5960_v52, %v5959_v21  ;;  %v5944_v46 = vmul.f32 %v7901_v3, %v12615_v0  ;;  %v5888_v36 = vpop.f32.mrb[125].mxu0 }
0x1667   : > { %v5943_v30 = vmul.f32 %v12616_v60, %v5888_v36 }
0x1668   : > { %v6005_v45 = vsel %vm926_vm0, %v5944_v46, 0.0 }
0x1669   : > { %v6006_v54 = vadd.f32 %v6005_v45, %v6004_v47  ;;  %v5990_v31 = vsel %vm926_vm0, %v5943_v30, 0.0  ;;  %v7904_v48 = vpop.f32.mrb[126].mxu0 }
0x166a   : > { %v5991_v26 = vadd.f32 %v5990_v31, %v5989_v40  ;;  %v5946_v56 = vmul.f32 %v7904_v48, %v12617_v37  ;;  %v5898_v17 = vpop.f32.mrb[127].mxu0 }
0x166b   : > { %v5945_v42 = vmul.f32 %v12618_v15, %v5898_v17 }
0x166c   : > { %v5977_v19 = vsel %vm926_vm0, %v5946_v56, 0.0 }
0x166d   : > { %v5978_v12 = vadd.f32 %v5977_v19, %v5976_v55  ;;  %v5962_v8 = vsel %vm926_vm0, %v5945_v42, 0.0  ;;  %v7907_v59 = vpop.f32.mrb[128].mxu0 }
0x166e   : > { %v5963_v11 = vadd.f32 %v5962_v8, %v5961_v9  ;;  %v5948_v5 = vmul.f32 %v7907_v59, %v12619_v1  ;;  %v5908_v25 = vpop.f32.mrb[129].mxu0  ;;  %v7000_v8 = vld [vmem:[%s11972_s7 + $0x2] ss:$0 sm:$0xff] }
0x166f   : > { %v5947_v34 = vmul.f32 %v12620_v4, %v5908_v25  ;;  %v7001_v1 = vld [vmem:[%s11973_s8 + $0x2] ss:$0 sm:$0xff] }
0x1670   : > { %v6007_v6 = vsel %vm926_vm0, %v5948_v5, 0.0  ;;  %7916 = vmatprep.mubr.msk.f32.mxu1 %vm926_vm0, %v5963_v11 }
0x1671   : > { %v6008_v2 = vadd.f32 %v6007_v6, %v6006_v54  ;;  %v5992_v62 = vsel %vm926_vm0, %v5947_v34, 0.0  ;;  %7917 = vmatmul.mubr.msk.f32.vlgmr.msra.gmra.mrb[120].mxu1 %vm926_vm0, %v5978_v12 }
0x1672   : > { %v5993_v28 = vadd.f32 %v5992_v62, %v5991_v26  ;;  %8155 = vmatpush3.bf16.msra.mxu1 %v10486_v16 }
0x1673   : > { %8157 = vmatprep.subr.bf16.mxu1 %v12621_v24 }
0x1674   : > { %7919 = vmatprep.mubr.msk.f32.mxu1 %vm926_vm0, %v5993_v28 }
0x1675   : > { %7920 = vmatmul.mubr.msk.f32.gmra.mrb[122].mxu1 %vm926_vm0, %v6008_v2 }
0x1676   : > { %8159 = vmatpush3.bf16.msra.mxu1 %v12621_v24 }
0x1677   : > { %8169 = vmatprep.subr.bf16.mxu1 %v10486_v16 }
0x1744   : > { %v7918_v7 = vpop.f32.mrb[120].mxu1 }
0x1745   : > { %v6112_v50 = vadd.f32 %v7918_v7, %v12622_v20  ;;  %v6092_v58 = vpop.f32.mrb[121].mxu1 }
0x1746   : > { %v6111_v39 = vadd.f32 %v6092_v58, %v12623_v35 }
0x1747   : > { %v6124_v18 = vadd.f32 %v6981_v43, %v6112_v50 }
0x1748   : > { %v6123_v14 = vadd.f32 %v6981_v43, %v6111_v39  ;;  %v7921_v63 = vpop.f32.mrb[122].mxu1 }
0x1749   : > { %v6114_v21 = vadd.f32 %v7921_v63, %v12624_v53  ;;  %v6102_v51 = vpop.f32.mrb[123].mxu1 }
0x174a   : > { %v6113_v10 = vadd.f32 %v6102_v51, %v12625_v57  ;;  %v8144_v23 = vpack.c.bf16 %v6124_v18, %v6123_v14 }
0x174b   : > { %v6126_v33 = vadd.f32 %v6981_v43, %v6114_v21 }
0x174c   : > { %v6125_v41 = vadd.f32 %v6981_v43, %v6113_v10  ;;  %8145 = vmatprep.subr.bf16.mxu0 %v8144_v23 }
0x174d   : > { %8147 = vmatpush3.bf16.msra.mxu0 %v8144_v23 }
0x174e   : > { %v8148_v47 = vpack.c.bf16 %v6126_v33, %v6125_v41 }
0x1750   : > { %8149 = vmatprep.subr.bf16.mxu0 %v8148_v47 }
0x1751   : > { %8151 = vmatpush3.bf16.msra.mxu0 %v8148_v47 }
0x1754   : > { %7931 = vmatmul.mubr.msk.f32.vlgmr.msra.gmra.mrb[130].mxu0 %vm926_vm0, %v8754_v22 }
0x1755   : > { %7933 = vmatprep.mubr.msk.f32.mxu0 %vm926_vm0, %v8754_v22 }
0x1758   : > { %7934 = vmatmul.mubr.msk.f32.gmra.mrb[132].mxu0 %vm926_vm0, %v8754_v22 }
0x1759   : > { %7958 = vmatprep.mubr.msk.f32.mxu0 %vm926_vm0, %v8754_v22 }
0x1827   : > { %v7932_v44 = vpop.f32.mrb[130].mxu0 }
0x1828   : > { %v6200_v13 = vpop.f32.mrb[131].mxu0 }
0x1829   : > { %7944 = vmatprep.mubr.msk.f32.mxu1 %vm926_vm0, %v6200_v13 }
0x182a   : > { %7945 = vmatmul.mubr.msk.f32.vlgmr.msra.gmra.mrb[124].mxu1 %vm926_vm0, %v7932_v44 }
0x182b   : > { %v7935_v40 = vpop.f32.mrb[132].mxu0  ;;  %8171 = vmatpush3.bf16.msra.mxu1 %v10486_v16 }
0x182c   : > { %v6210_v61 = vpop.f32.mrb[133].mxu0  ;;  %8173 = vmatprep.subr.bf16.mxu1 %v12621_v24 }
0x182d   : > { %7947 = vmatprep.mubr.msk.f32.mxu1 %vm926_vm0, %v6210_v61 }
0x182e   : > { %7948 = vmatmul.mubr.msk.f32.gmra.mrb[126].mxu1 %vm926_vm0, %v7935_v40 }
0x182f   : > { %8175 = vmatpush3.bf16.msra.mxu1 %v12621_v24 }
0x18fd   : > { %v7946_v32 = vpop.f32.mrb[124].mxu1 }
0x18fe   : > { %v6317_v38 = vsub.f32 %v6124_v18, %v7946_v32  ;;  %v6297_v49 = vpop.f32.mrb[125].mxu1 }
0x18ff   : > { %v6316_v27 = vsub.f32 %v6123_v14, %v6297_v49 }
0x1900   : > { %v6321_v29 = vmul.f32 %v6317_v38, %v6317_v38 }
0x1901   : > { %v6320_v55 = vmul.f32 %v6316_v27, %v6316_v27  ;;  %v7949_v52 = vpop.f32.mrb[126].mxu1 }
0x1902   : > { %v6319_v3 = vsub.f32 %v6126_v33, %v7949_v52  ;;  %v6307_v9 = vpop.f32.mrb[127].mxu1 }
0x1903   : > { %v6318_v0 = vsub.f32 %v6125_v41, %v6307_v9  ;;  %v8160_v16 = vpack.c.bf16 %v6321_v29, %v6320_v55 }
0x1904   : > { %v6323_v46 = vmul.f32 %v6319_v3, %v6319_v3 }
0x1905   : > { %v6322_v36 = vmul.f32 %v6318_v0, %v6318_v0  ;;  %8161 = vmatprep.subr.bf16.mxu0 %v8160_v16 }
0x1906   : > { %8163 = vmatpush3.bf16.msra.mxu0 %v8160_v16 }
0x1907   : > { %v8164_v60 = vpack.c.bf16 %v6323_v46, %v6322_v36 }
0x1909   : > { %8165 = vmatprep.subr.bf16.mxu0 %v8164_v60 }
0x190a   : > { %8167 = vmatpush3.bf16.msra.mxu0 %v8164_v60 }
0x190d   : > { %7959 = vmatmul.mubr.msk.f32.vlgmr.msra.gmra.mrb[134].mxu0 %vm926_vm0, %v8754_v22 }
0x190e   : > { %7961 = vmatprep.mubr.msk.f32.mxu0 %vm926_vm0, %v8754_v22 }
0x1911   : > { %7962 = vmatmul.mubr.msk.f32.gmra.mrb[136].mxu0 %vm926_vm0, %v8754_v22 }
0x19e0   : > { %v7960_v30 = vpop.f32.mrb[134].mxu0 }
0x19e1   : > { %v6390_v45 = vpop.f32.mrb[135].mxu0 }
0x19e2   : > { %7972 = vmatprep.mubr.msk.f32.mxu1 %vm926_vm0, %v6390_v45 }
0x19e3   : > { %7973 = vmatmul.mubr.msk.f32.vlgmr.msra.gmra.mrb[128].mxu1 %vm926_vm0, %v7960_v30 }
0x19e4   : > { %v7963_v54 = vpop.f32.mrb[136].mxu0 }
0x19e5   : > { %v6400_v31 = vpop.f32.mrb[137].mxu0 }
0x19e6   : > { %7975 = vmatprep.mubr.msk.f32.mxu1 %vm926_vm0, %v6400_v31 }
0x19e7   : > { %7976 = vmatmul.mubr.msk.f32.gmra.mrb[130].mxu1 %vm926_vm0, %v7963_v54 }
0x1ab6   : > { %v7974_v48 = vpop.f32.mrb[128].mxu1 }
0x1ab7   : > { %v6493_v26 = vadd.f32 1e-05, %v7974_v48  ;;  %v6487_v37 = vpop.f32.mrb[129].mxu1 }
0x1ab8   : > { %v6488_v56 = vadd.f32 1e-05, %v6487_v37 }
0x1ab9   : > { %8673 = vrsqrt.f32 %v6493_v26 }
0x1aba   : > { %8675 = vrsqrt.f32 %v6488_v56  ;;  %v7977_v17 = vpop.f32.mrb[130].mxu1 }
0x1abb   : > { %v6503_v15 = vadd.f32 1e-05, %v7977_v17  ;;  %v6497_v42 = vpop.f32.mrb[131].mxu1 }
0x1abc   : > { %v6498_v19 = vadd.f32 1e-05, %v6497_v42 }
0x1abd   : > { %8677 = vrsqrt.f32 %v6503_v15 }
0x1abe   : > { %8679 = vrsqrt.f32 %v6498_v19 }
0x1ac3   : > { %v8674_v12 = vpop.eup %8673 }
0x1ac4   : > { %v8676_v59 = vpop.eup %8675  ;;  %v6511_v11 = vmul.f32 %v8674_v12, %v6317_v38 }
0x1ac5   : > { %v6510_v5 = vmul.f32 %v8676_v59, %v6316_v27 }
0x1ac6   : > { %v6521_v25 = vmul.f32 %v7000_v8, %v6511_v11 }
0x1ac7   : > { %v8678_v4 = vpop.eup %8677  ;;  %v6520_v34 = vmul.f32 %v7000_v8, %v6510_v5 }
0x1ac8   : > { %v8680_v6 = vpop.eup %8679  ;;  %v6531_v2 = vadd.f32 %v7001_v1, %v6521_v25  ;;  %v6513_v62 = vmul.f32 %v8678_v4, %v6319_v3 }
0x1ac9   : > { %v6530_v28 = vadd.f32 %v7001_v1, %v6520_v34  ;;  %v6512_v24 = vmul.f32 %v8680_v6, %v6318_v0 }
0x1aca   : > { %v6523_v22 = vmul.f32 %v7000_v8, %v6513_v62  ;;  %6535 = vst.msk [vmem:[%s353_s21 + $0x8] sm:$0xff] %vm926_vm0, %v6531_v2 }
0x1acb   : > { %v6522_v7 = vmul.f32 %v7000_v8, %v6512_v24  ;;  %6534 = vst.msk [vmem:[%s353_s21] sm:$0xff] %vm926_vm0, %v6530_v28 }
0x1acc   : > { %v6533_v43 = vadd.f32 %v7001_v1, %v6523_v22 }
0x1acd   : > { %v6532_v20 = vadd.f32 %v7001_v1, %v6522_v7 }
0x1ace   : > { %6537 = vst.msk [vmem:[%s353_s21 + $0x18] sm:$0xff] %vm926_vm0, %v6533_v43 }
0x1acf   : > { %6536 = vst.msk [vmem:[%s353_s21 + $0x10] sm:$0xff] %vm926_vm0, %v6532_v20 }
0x1ad0   : > { %8698 = shalt.err (!%p8695_p3)
}
0x1ad1   : > { %s8699_s17 = scalar_lea.hbm %s11918_s16, 512  ;;  %s8703_s21 = scalar_lea.hbm %s11974_s9, 1024 }
0x1ad2   : > { %p8700_p4 = scmp.ne.s32.totalorder %s11918_s16, %s8699_s17  ;;  %p8704_p9 = scmp.lt.u32.totalorder %s11918_s16, %s11974_s9 }
0x1ad3   : > { %p8705_p10 = scmp.lt.u32.totalorder %s8703_s21, %s8699_s17  ;;  %p8707_p12 = scmp.lt.u32.totalorder %s8699_s17, %s11918_s16 }
0x1ad4   : > { %p8701_p7 = pnand %p8700_p4, %p8846_p5 }
0x1ad5   : > { %p8706_p11 = por %p8705_p10, %p8704_p9 }
0x1ad6   : > { %p8702_p8 = pneg %p8701_p7 }
0x1ad7   : > { %p8708_p13 = por %p8707_p12, %p8706_p11 }
0x1ad9   : > { %p8709_p0 = pnand %p8708_p13, %p8702_p8 }
0x1adb   : > { %8712 = shalt.err (!%p8709_p0)
}
0x1adc   : > { %s8756_s22 = smov 128   ;;  %s8757_s24 = smov 8  }
0x1add   : > { %8176 = dma.vmem_to_hbm [thread:$0]  (%p8846_p5), %s11920_s27, 512, %s11918_s16, %s11924_s13, %s8756_s22, %s8756_s22, %s8757_s24  }
0x1ade PF: > { %p8182_p1 = scmp.ge.s32.totalorder %s8747_s12, 2  ;;  %s6567_s14 = sand.u32 1, %s8735_s30  }
0x1adf   : > { %s6568_s23 = scalar_lea.sflag [#allocation3], %s6567_s14 }
0x1ae0   : > { %p8179_p2 = pnand %p8182_p1, %p8850_p6 }
0x1ae2   : > { %8730 = dma.done.wait (!%p8179_p2), %s6568_s23, 512  }
0x1ae3   : > { %8732 = vsyncadd (!%p8179_p2), %s6568_s23, 4294966784  ;;  %p19_p3 = scmp.ge.s32.totalorder %s8833_s15, 4   ;;  %s12626_s30 = smov %s8739_s10 }
0x1ae4   : > { %s12627_s10 = smov %s8743_s11  ;;  %s12628_s11 = smov %s8844_s18 }
0x1ae5   : > { %s12629_s12 = smov %s8833_s15  ;;  %21 = sbr.rel (!%p19_p3) target bundleno = 3 (0x3), region = 109 }
0x1aec   :  { %6573 = vsyncpa [#allocation3], 1 }
0x1aed   :  { %6575 = vsyncpa [#allocation3 + $0x1], 1 }

</bundles_post_ra>
